<compile_context>
chip_gen: v5e
topology: v5e:2x2
jax: 0.10.0
libtpu: 0.0.40
codegen_flags: <defaults>
</compile_context>

<pallas_src>
import jax
import jax.numpy as jnp
from jax.experimental import pallas as pl
from jax.experimental.pallas import tpu as pltpu

_HI = jax.lax.Precision.HIGHEST


# ----------------------------------------------------------------------------
# Pallas kernel: one grid step = one RolloutEncoder (reversed-time GRU scan).
# ----------------------------------------------------------------------------
def _rollout_encoder_kernel(feat_ref, rew_ref, wihf_ref, wihr_ref, bih_ref,
                            whh_ref, bhh_ref, o_ref):
    # feat_ref : (T, B, F)   dream features, original (un-flipped) time order
    # rew_ref  : (T, B, 1)   dream rewards
    # wihf_ref : (3, F, H)   input->gate weights (feature cols), gate-major (r,z,n)
    # wihr_ref : (3, 1, H)   input->gate weights (reward column), gate-major
    # bih_ref  : (3, 1, H)   input biases, gate-major
    # whh_ref  : (3, H, H)   hidden->gate weights, gate-major, pre-transposed
    # bhh_ref  : (3, 1, H)   hidden biases, gate-major
    # o_ref    : (B, H)      final hidden state of this encoder
    T, B, _ = feat_ref.shape
    H = o_ref.shape[-1]

    # Load weights/biases once; they stay resident across the whole recurrence.
    wf_r, wf_z, wf_n = wihf_ref[0], wihf_ref[1], wihf_ref[2]
    wr_r, wr_z, wr_n = wihr_ref[0], wihr_ref[1], wihr_ref[2]
    bi_r, bi_z, bi_n = bih_ref[0], bih_ref[1], bih_ref[2]
    wh_r, wh_z, wh_n = whh_ref[0], whh_ref[1], whh_ref[2]
    bh_r, bh_z, bh_n = bhh_ref[0], bhh_ref[1], bhh_ref[2]

    h = jnp.zeros((B, H), jnp.float32)

    # torch.flip(..., [0]) == walk the original sequence back-to-front.
    # Fully unrolled: T is small and static. Input-side terms (i_*) depend only
    # on the inputs/weights, so they are scheduled off the serial h-chain.
    for t in range(T):
        rt = T - 1 - t
        x_t = feat_ref[rt]            # (B, F)
        r_t = rew_ref[rt]             # (B, 1)

        i_r = jnp.dot(x_t, wf_r, preferred_element_type=jnp.float32,
                      precision=_HI) + r_t * wr_r + bi_r
        i_z = jnp.dot(x_t, wf_z, preferred_element_type=jnp.float32,
                      precision=_HI) + r_t * wr_z + bi_z
        i_n = jnp.dot(x_t, wf_n, preferred_element_type=jnp.float32,
                      precision=_HI) + r_t * wr_n + bi_n

        h_r = jnp.dot(h, wh_r, preferred_element_type=jnp.float32,
                      precision=_HI) + bh_r
        h_z = jnp.dot(h, wh_z, preferred_element_type=jnp.float32,
                      precision=_HI) + bh_z
        h_n = jnp.dot(h, wh_n, preferred_element_type=jnp.float32,
                      precision=_HI) + bh_n

        r = jax.nn.sigmoid(i_r + h_r)
        z = jax.nn.sigmoid(i_z + h_z)
        n = jnp.tanh(i_n + r * h_n)
        h = (1.0 - z) * n + z * h

    o_ref[...] = h.astype(o_ref.dtype)


def rollout_encoders_pallas(feats, rews, wihf_g, wihr_g, bih_g, whh_g, bhh_g):
    """feats: (S,T,B,F); rews: (S,T,B,1); wihf_g: (S,3,F,H); wihr_g: (S,3,1,H);
    bih_g/bhh_g: (S,3,1,H); whh_g: (S,3,H,H). Returns (S, B, H)."""
    S, T, B, F = feats.shape
    H = whh_g.shape[-1]

    return pl.pallas_call(
        _rollout_encoder_kernel,
        out_shape=jax.ShapeDtypeStruct((S, B, H), jnp.float32),
        grid=(S,),
        in_specs=[
            pl.BlockSpec((None, T, B, F), lambda i: (i, 0, 0, 0)),
            pl.BlockSpec((None, T, B, 1), lambda i: (i, 0, 0, 0)),
            pl.BlockSpec((None, 3, F, H), lambda i: (i, 0, 0, 0)),
            pl.BlockSpec((None, 3, 1, H), lambda i: (i, 0, 0, 0)),
            pl.BlockSpec((None, 3, 1, H), lambda i: (i, 0, 0, 0)),
            pl.BlockSpec((None, 3, H, H), lambda i: (i, 0, 0, 0)),
            pl.BlockSpec((None, 3, 1, H), lambda i: (i, 0, 0, 0)),
        ],
        out_specs=pl.BlockSpec((None, B, H), lambda i: (i, 0, 0)),
        compiler_params=pltpu.CompilerParams(
            dimension_semantics=("parallel",)),
    )(feats, rews, wihf_g, wihr_g, bih_g, whh_g, bhh_g)


# ----------------------------------------------------------------------------
# Module wrapper (glue in plain JAX: just stacking + gate-major param layout).
# ----------------------------------------------------------------------------
def i2a_style_forward(dreams, params, similar):
    feats = jnp.stack([dreams[f'forward_{i}']['features_pred']
                       for i in range(similar)], axis=0)       # (S, T, B, F)
    rews = jnp.stack([dreams[f'forward_{i}']['reward_pred']
                      for i in range(similar)], axis=0)          # (S, T, B, 1)
    S, T, B, F = feats.shape

    wih, whh = params['wih'], params['whh']                      # (S,Fin,3H), (S,H,3H)
    bih, bhh = params['bih'], params['bhh']                      # (S,1,3H),   (S,1,3H)
    Fin = wih.shape[1]
    H = whh.shape[1]
    assert Fin == F + 1

    # Gate-major, lane-aligned parameter layouts (tiny, one-time reshapes).
    wih_g = wih.reshape(S, Fin, 3, H).transpose(0, 2, 1, 3)      # (S, 3, Fin, H)
    wihf_g = wih_g[:, :, :F, :]                                  # (S, 3, F, H)
    wihr_g = wih_g[:, :, F:, :]                                  # (S, 3, 1, H) reward col
    bih_g = bih.reshape(S, 3, 1, H)                              # (S, 3, 1, H)
    whh_g = whh.reshape(S, H, 3, H).transpose(0, 2, 1, 3)        # (S, 3, H, H)
    bhh_g = bhh.reshape(S, 3, 1, H)                              # (S, 3, 1, H)

    out = rollout_encoders_pallas(feats, rews, wihf_g, wihr_g,
                                  bih_g, whh_g, bhh_g)           # (S, B, H)

    # torch.cat([code_0, ..., code_{S-1}], dim=1) -> (B, S*H)
    return jnp.transpose(out, (1, 0, 2)).reshape(B, S * H)


# ----------------------------------------------------------------------------
# Pure-JAX reference (mirrors PyTorch nn.GRU cell semantics) for verification.
# ----------------------------------------------------------------------------
def i2a_style_reference(dreams, params, similar):
    codes = []
    H = params['whh'].shape[1]
    for i in range(similar):
        feats = jnp.flip(dreams[f'forward_{i}']['features_pred'], axis=0)
        rews = jnp.flip(dreams[f'forward_{i}']['reward_pred'], axis=0)
        x = jnp.concatenate([feats, rews], axis=-1)              # (T, B, Fin)
        wih, whh = params['wih'][i], params['whh'][i]
        bih, bhh = params['bih'][i], params['bhh'][i]
        T, B, _ = x.shape
        h = jnp.zeros((B, H), jnp.float32)
        for t in range(T):
            gi = jnp.dot(x[t], wih, precision=_HI) + bih
            gh = jnp.dot(h, whh, precision=_HI) + bhh
            r = jax.nn.sigmoid(gi[:, :H] + gh[:, :H])
            z = jax.nn.sigmoid(gi[:, H:2 * H] + gh[:, H:2 * H])
            n = jnp.tanh(gi[:, 2 * H:] + r * gh[:, 2 * H:])
            h = (1.0 - z) * n + z * h
        codes.append(h)
    return jnp.concatenate(codes, axis=1)


if __name__ == "__main__":
    # Small shapes consistent with the module's forward.
    SIMILAR = 2      # config['similar']
    T = 8            # rollout length (dream horizon)
    B = 2            # batch
    F = 16           # feature size of features_pred
    H = 32           # GRU hidden size
    FIN = F + 1      # features ++ reward

    key = jax.random.PRNGKey(0)
    k_in, k_par = jax.random.split(key)

    # Deterministic dream inputs.
    dreams = {}
    for i in range(SIMILAR):
        k_in, kf, kr = jax.random.split(k_in, 3)
        dreams[f'forward_{i}'] = {
            'features_pred': jax.random.normal(kf, (T, B, F), jnp.float32),
            'reward_pred': jax.random.normal(kr, (T, B, 1), jnp.float32),
        }

    # Deterministic GRU parameters (PyTorch-style uniform(-1/sqrt(H), 1/sqrt(H))),
    # stored transposed for right-multiplication, stacked over `similar`.
    bound = 1.0 / jnp.sqrt(jnp.float32(H))
    k1, k2, k3, k4 = jax.random.split(k_par, 4)
    params = {
        'wih': jax.random.uniform(k1, (SIMILAR, FIN, 3 * H), jnp.float32, -bound, bound),
        'whh': jax.random.uniform(k2, (SIMILAR, H, 3 * H), jnp.float32, -bound, bound),
        'bih': jax.random.uniform(k3, (SIMILAR, 1, 3 * H), jnp.float32, -bound, bound),
        'bhh': jax.random.uniform(k4, (SIMILAR, 1, 3 * H), jnp.float32, -bound, bound),
    }

    out = i2a_style_forward(dreams, params, SIMILAR)
    out = jax.block_until_ready(out)

    ref = jax.block_until_ready(i2a_style_reference(dreams, params, SIMILAR))
    assert out.shape == (B, SIMILAR * H), out.shape
    assert jnp.allclose(out, ref, atol=1e-4, rtol=1e-4), float(jnp.max(jnp.abs(out - ref)))

    print("KERNEL_OK")
</pallas_src>

<mosaic_0001>
module attributes {stable_mosaic.version = 11 : i64} {
  func.func @_rollout_encoder_kernel(%arg0: i32, %arg1: memref<1x8x2x16xf32, #tpu.memory_space<vmem>>, %arg2: memref<1x8x2x1xf32, #tpu.memory_space<vmem>>, %arg3: memref<1x3x16x32xf32, #tpu.memory_space<vmem>>, %arg4: memref<1x3x1x32xf32, #tpu.memory_space<vmem>>, %arg5: memref<1x3x1x32xf32, #tpu.memory_space<vmem>>, %arg6: memref<1x3x32x32xf32, #tpu.memory_space<vmem>>, %arg7: memref<1x3x1x32xf32, #tpu.memory_space<vmem>>, %arg8: memref<1x2x32xf32, #tpu.memory_space<vmem>>) attributes {dimension_semantics = [#tpu.dimension_semantics<parallel>], iteration_bounds = array<i64: 2>, scalar_prefetch = 0 : i64, scratch_operands = 0 : i64, tpu.core_type = #tpu.core_type<tc>, window_params = [{transform_indices = @transform_0, window_bounds = array<i64: 1, 8, 2, 16>}, {transform_indices = @transform_1, window_bounds = array<i64: 1, 8, 2, 1>}, {transform_indices = @transform_2, window_bounds = array<i64: 1, 3, 16, 32>}, {transform_indices = @transform_3, window_bounds = array<i64: 1, 3, 1, 32>}, {transform_indices = @transform_4, window_bounds = array<i64: 1, 3, 1, 32>}, {transform_indices = @transform_5, window_bounds = array<i64: 1, 3, 32, 32>}, {transform_indices = @transform_6, window_bounds = array<i64: 1, 3, 1, 32>}, {transform_indices = @transform_7, window_bounds = array<i64: 1, 2, 32>}]} {
    %c0 = arith.constant 0 : index
    %c0_0 = arith.constant 0 : index
    %c0_1 = arith.constant 0 : index
    %c0_2 = arith.constant 0 : index
    %0 = vector.load %arg3[%c0, %c0_0, %c0_1, %c0_2] : memref<1x3x16x32xf32, #tpu.memory_space<vmem>>, vector<1x1x16x32xf32>
    %1 = vector.shape_cast %0 : vector<1x1x16x32xf32> to vector<16x32xf32>
    %c0_3 = arith.constant 0 : index
    %c1 = arith.constant 1 : index
    %c0_4 = arith.constant 0 : index
    %c0_5 = arith.constant 0 : index
    %2 = vector.load %arg3[%c0_3, %c1, %c0_4, %c0_5] : memref<1x3x16x32xf32, #tpu.memory_space<vmem>>, vector<1x1x16x32xf32>
    %3 = vector.shape_cast %2 : vector<1x1x16x32xf32> to vector<16x32xf32>
    %c0_6 = arith.constant 0 : index
    %c2 = arith.constant 2 : index
    %c0_7 = arith.constant 0 : index
    %c0_8 = arith.constant 0 : index
    %4 = vector.load %arg3[%c0_6, %c2, %c0_7, %c0_8] : memref<1x3x16x32xf32, #tpu.memory_space<vmem>>, vector<1x1x16x32xf32>
    %5 = vector.shape_cast %4 : vector<1x1x16x32xf32> to vector<16x32xf32>
    %c0_9 = arith.constant 0 : index
    %c0_10 = arith.constant 0 : index
    %c0_11 = arith.constant 0 : index
    %c0_12 = arith.constant 0 : index
    %6 = vector.load %arg4[%c0_9, %c0_10, %c0_11, %c0_12] : memref<1x3x1x32xf32, #tpu.memory_space<vmem>>, vector<1x1x1x32xf32>
    %7 = vector.shape_cast %6 : vector<1x1x1x32xf32> to vector<1x32xf32>
    %c0_13 = arith.constant 0 : index
    %c1_14 = arith.constant 1 : index
    %c0_15 = arith.constant 0 : index
    %c0_16 = arith.constant 0 : index
    %8 = vector.load %arg4[%c0_13, %c1_14, %c0_15, %c0_16] : memref<1x3x1x32xf32, #tpu.memory_space<vmem>>, vector<1x1x1x32xf32>
    %9 = vector.shape_cast %8 : vector<1x1x1x32xf32> to vector<1x32xf32>
    %c0_17 = arith.constant 0 : index
    %c2_18 = arith.constant 2 : index
    %c0_19 = arith.constant 0 : index
    %c0_20 = arith.constant 0 : index
    %10 = vector.load %arg4[%c0_17, %c2_18, %c0_19, %c0_20] : memref<1x3x1x32xf32, #tpu.memory_space<vmem>>, vector<1x1x1x32xf32>
    %11 = vector.shape_cast %10 : vector<1x1x1x32xf32> to vector<1x32xf32>
    %c0_21 = arith.constant 0 : index
    %c0_22 = arith.constant 0 : index
    %c0_23 = arith.constant 0 : index
    %c0_24 = arith.constant 0 : index
    %12 = vector.load %arg5[%c0_21, %c0_22, %c0_23, %c0_24] : memref<1x3x1x32xf32, #tpu.memory_space<vmem>>, vector<1x1x1x32xf32>
    %13 = vector.shape_cast %12 : vector<1x1x1x32xf32> to vector<1x32xf32>
    %c0_25 = arith.constant 0 : index
    %c1_26 = arith.constant 1 : index
    %c0_27 = arith.constant 0 : index
    %c0_28 = arith.constant 0 : index
    %14 = vector.load %arg5[%c0_25, %c1_26, %c0_27, %c0_28] : memref<1x3x1x32xf32, #tpu.memory_space<vmem>>, vector<1x1x1x32xf32>
    %15 = vector.shape_cast %14 : vector<1x1x1x32xf32> to vector<1x32xf32>
    %c0_29 = arith.constant 0 : index
    %c2_30 = arith.constant 2 : index
    %c0_31 = arith.constant 0 : index
    %c0_32 = arith.constant 0 : index
    %16 = vector.load %arg5[%c0_29, %c2_30, %c0_31, %c0_32] : memref<1x3x1x32xf32, #tpu.memory_space<vmem>>, vector<1x1x1x32xf32>
    %17 = vector.shape_cast %16 : vector<1x1x1x32xf32> to vector<1x32xf32>
    %c0_33 = arith.constant 0 : index
    %c0_34 = arith.constant 0 : index
    %c0_35 = arith.constant 0 : index
    %c0_36 = arith.constant 0 : index
    %18 = vector.load %arg6[%c0_33, %c0_34, %c0_35, %c0_36] : memref<1x3x32x32xf32, #tpu.memory_space<vmem>>, vector<1x1x32x32xf32>
    %19 = vector.shape_cast %18 : vector<1x1x32x32xf32> to vector<32x32xf32>
    %c0_37 = arith.constant 0 : index
    %c1_38 = arith.constant 1 : index
    %c0_39 = arith.constant 0 : index
    %c0_40 = arith.constant 0 : index
    %20 = vector.load %arg6[%c0_37, %c1_38, %c0_39, %c0_40] : memref<1x3x32x32xf32, #tpu.memory_space<vmem>>, vector<1x1x32x32xf32>
    %21 = vector.shape_cast %20 : vector<1x1x32x32xf32> to vector<32x32xf32>
    %c0_41 = arith.constant 0 : index
    %c2_42 = arith.constant 2 : index
    %c0_43 = arith.constant 0 : index
    %c0_44 = arith.constant 0 : index
    %22 = vector.load %arg6[%c0_41, %c2_42, %c0_43, %c0_44] : memref<1x3x32x32xf32, #tpu.memory_space<vmem>>, vector<1x1x32x32xf32>
    %23 = vector.shape_cast %22 : vector<1x1x32x32xf32> to vector<32x32xf32>
    %c0_45 = arith.constant 0 : index
    %c0_46 = arith.constant 0 : index
    %c0_47 = arith.constant 0 : index
    %c0_48 = arith.constant 0 : index
    %24 = vector.load %arg7[%c0_45, %c0_46, %c0_47, %c0_48] : memref<1x3x1x32xf32, #tpu.memory_space<vmem>>, vector<1x1x1x32xf32>
    %25 = vector.shape_cast %24 : vector<1x1x1x32xf32> to vector<1x32xf32>
    %c0_49 = arith.constant 0 : index
    %c1_50 = arith.constant 1 : index
    %c0_51 = arith.constant 0 : index
    %c0_52 = arith.constant 0 : index
    %26 = vector.load %arg7[%c0_49, %c1_50, %c0_51, %c0_52] : memref<1x3x1x32xf32, #tpu.memory_space<vmem>>, vector<1x1x1x32xf32>
    %27 = vector.shape_cast %26 : vector<1x1x1x32xf32> to vector<1x32xf32>
    %c0_53 = arith.constant 0 : index
    %c2_54 = arith.constant 2 : index
    %c0_55 = arith.constant 0 : index
    %c0_56 = arith.constant 0 : index
    %28 = vector.load %arg7[%c0_53, %c2_54, %c0_55, %c0_56] : memref<1x3x1x32xf32, #tpu.memory_space<vmem>>, vector<1x1x1x32xf32>
    %29 = vector.shape_cast %28 : vector<1x1x1x32xf32> to vector<1x32xf32>
    %cst = arith.constant 0.000000e+00 : f32
    %30 = vector.broadcast %cst : f32 to vector<2x32xf32>
    %c0_57 = arith.constant 0 : index
    %c7 = arith.constant 7 : index
    %c0_58 = arith.constant 0 : index
    %c0_59 = arith.constant 0 : index
    %31 = vector.load %arg1[%c0_57, %c7, %c0_58, %c0_59] : memref<1x8x2x16xf32, #tpu.memory_space<vmem>>, vector<1x1x2x16xf32>
    %32 = vector.shape_cast %31 : vector<1x1x2x16xf32> to vector<2x16xf32>
    %c0_60 = arith.constant 0 : index
    %c7_61 = arith.constant 7 : index
    %c0_62 = arith.constant 0 : index
    %c0_63 = arith.constant 0 : index
    %33 = vector.load %arg2[%c0_60, %c7_61, %c0_62, %c0_63] : memref<1x8x2x1xf32, #tpu.memory_space<vmem>>, vector<1x1x2x1xf32>
    %34 = vector.shape_cast %33 : vector<1x1x2x1xf32> to vector<2x1xf32>
    %cst_64 = arith.constant dense<0.000000e+00> : vector<2x32xf32>
    %35 = tpu.matmul %32, %1, %cst_64 {dimension_numbers = #tpu.dot_dimension_numbers<[1], [0], [0], [1], [0, 0, 1, 1], [], []>, precision = #tpu.contract_precision<fp32>} : vector<2x16xf32>, vector<16x32xf32>, vector<2x32xf32> -> vector<2x32xf32>
    %36 = vector.broadcast %34 : vector<2x1xf32> to vector<2x32xf32>
    %37 = vector.broadcast %7 : vector<1x32xf32> to vector<2x32xf32>
    %38 = arith.mulf %36, %37 : vector<2x32xf32>
    %39 = arith.addf %35, %38 : vector<2x32xf32>
    %40 = vector.broadcast %13 : vector<1x32xf32> to vector<2x32xf32>
    %41 = arith.addf %39, %40 : vector<2x32xf32>
    %cst_65 = arith.constant dense<0.000000e+00> : vector<2x32xf32>
    %42 = tpu.matmul %32, %3, %cst_65 {dimension_numbers = #tpu.dot_dimension_numbers<[1], [0], [0], [1], [0, 0, 1, 1], [], []>, precision = #tpu.contract_precision<fp32>} : vector<2x16xf32>, vector<16x32xf32>, vector<2x32xf32> -> vector<2x32xf32>
    %43 = vector.broadcast %34 : vector<2x1xf32> to vector<2x32xf32>
    %44 = vector.broadcast %9 : vector<1x32xf32> to vector<2x32xf32>
    %45 = arith.mulf %43, %44 : vector<2x32xf32>
    %46 = arith.addf %42, %45 : vector<2x32xf32>
    %47 = vector.broadcast %15 : vector<1x32xf32> to vector<2x32xf32>
    %48 = arith.addf %46, %47 : vector<2x32xf32>
    %cst_66 = arith.constant dense<0.000000e+00> : vector<2x32xf32>
    %49 = tpu.matmul %32, %5, %cst_66 {dimension_numbers = #tpu.dot_dimension_numbers<[1], [0], [0], [1], [0, 0, 1, 1], [], []>, precision = #tpu.contract_precision<fp32>} : vector<2x16xf32>, vector<16x32xf32>, vector<2x32xf32> -> vector<2x32xf32>
    %50 = vector.broadcast %34 : vector<2x1xf32> to vector<2x32xf32>
    %51 = vector.broadcast %11 : vector<1x32xf32> to vector<2x32xf32>
    %52 = arith.mulf %50, %51 : vector<2x32xf32>
    %53 = arith.addf %49, %52 : vector<2x32xf32>
    %54 = vector.broadcast %17 : vector<1x32xf32> to vector<2x32xf32>
    %55 = arith.addf %53, %54 : vector<2x32xf32>
    %cst_67 = arith.constant dense<0.000000e+00> : vector<2x32xf32>
    %56 = tpu.matmul %30, %19, %cst_67 {dimension_numbers = #tpu.dot_dimension_numbers<[1], [0], [0], [1], [0, 0, 1, 1], [], []>, precision = #tpu.contract_precision<fp32>} : vector<2x32xf32>, vector<32x32xf32>, vector<2x32xf32> -> vector<2x32xf32>
    %57 = vector.broadcast %25 : vector<1x32xf32> to vector<2x32xf32>
    %58 = arith.addf %56, %57 : vector<2x32xf32>
    %cst_68 = arith.constant dense<0.000000e+00> : vector<2x32xf32>
    %59 = tpu.matmul %30, %21, %cst_68 {dimension_numbers = #tpu.dot_dimension_numbers<[1], [0], [0], [1], [0, 0, 1, 1], [], []>, precision = #tpu.contract_precision<fp32>} : vector<2x32xf32>, vector<32x32xf32>, vector<2x32xf32> -> vector<2x32xf32>
    %60 = vector.broadcast %27 : vector<1x32xf32> to vector<2x32xf32>
    %61 = arith.addf %59, %60 : vector<2x32xf32>
    %cst_69 = arith.constant dense<0.000000e+00> : vector<2x32xf32>
    %62 = tpu.matmul %30, %23, %cst_69 {dimension_numbers = #tpu.dot_dimension_numbers<[1], [0], [0], [1], [0, 0, 1, 1], [], []>, precision = #tpu.contract_precision<fp32>} : vector<2x32xf32>, vector<32x32xf32>, vector<2x32xf32> -> vector<2x32xf32>
    %63 = vector.broadcast %29 : vector<1x32xf32> to vector<2x32xf32>
    %64 = arith.addf %62, %63 : vector<2x32xf32>
    %65 = arith.addf %41, %58 : vector<2x32xf32>
    %66 = arith.negf %65 : vector<2x32xf32>
    %67 = math.exp %66 : vector<2x32xf32>
    %cst_70 = arith.constant 1.000000e+00 : f32
    %68 = vector.broadcast %cst_70 : f32 to vector<2x32xf32>
    %69 = arith.addf %68, %67 : vector<2x32xf32>
    %70 = arith.divf %68, %69 : vector<2x32xf32>
    %71 = arith.addf %48, %61 : vector<2x32xf32>
    %72 = arith.negf %71 : vector<2x32xf32>
    %73 = math.exp %72 : vector<2x32xf32>
    %cst_71 = arith.constant 1.000000e+00 : f32
    %74 = vector.broadcast %cst_71 : f32 to vector<2x32xf32>
    %75 = arith.addf %74, %73 : vector<2x32xf32>
    %76 = arith.divf %74, %75 : vector<2x32xf32>
    %77 = arith.mulf %70, %64 : vector<2x32xf32>
    %78 = arith.addf %55, %77 : vector<2x32xf32>
    %79 = math.tanh %78 : vector<2x32xf32>
    %cst_72 = arith.constant 1.000000e+00 : f32
    %80 = vector.broadcast %cst_72 : f32 to vector<2x32xf32>
    %81 = arith.subf %80, %76 : vector<2x32xf32>
    %82 = arith.mulf %81, %79 : vector<2x32xf32>
    %83 = arith.mulf %76, %30 : vector<2x32xf32>
    %84 = arith.addf %82, %83 : vector<2x32xf32>
    %c0_73 = arith.constant 0 : index
    %c6 = arith.constant 6 : index
    %c0_74 = arith.constant 0 : index
    %c0_75 = arith.constant 0 : index
    %85 = vector.load %arg1[%c0_73, %c6, %c0_74, %c0_75] : memref<1x8x2x16xf32, #tpu.memory_space<vmem>>, vector<1x1x2x16xf32>
    %86 = vector.shape_cast %85 : vector<1x1x2x16xf32> to vector<2x16xf32>
    %c0_76 = arith.constant 0 : index
    %c6_77 = arith.constant 6 : index
    %c0_78 = arith.constant 0 : index
    %c0_79 = arith.constant 0 : index
    %87 = vector.load %arg2[%c0_76, %c6_77, %c0_78, %c0_79] : memref<1x8x2x1xf32, #tpu.memory_space<vmem>>, vector<1x1x2x1xf32>
    %88 = vector.shape_cast %87 : vector<1x1x2x1xf32> to vector<2x1xf32>
    %cst_80 = arith.constant dense<0.000000e+00> : vector<2x32xf32>
    %89 = tpu.matmul %86, %1, %cst_80 {dimension_numbers = #tpu.dot_dimension_numbers<[1], [0], [0], [1], [0, 0, 1, 1], [], []>, precision = #tpu.contract_precision<fp32>} : vector<2x16xf32>, vector<16x32xf32>, vector<2x32xf32> -> vector<2x32xf32>
    %90 = vector.broadcast %88 : vector<2x1xf32> to vector<2x32xf32>
    %91 = vector.broadcast %7 : vector<1x32xf32> to vector<2x32xf32>
    %92 = arith.mulf %90, %91 : vector<2x32xf32>
    %93 = arith.addf %89, %92 : vector<2x32xf32>
    %94 = vector.broadcast %13 : vector<1x32xf32> to vector<2x32xf32>
    %95 = arith.addf %93, %94 : vector<2x32xf32>
    %cst_81 = arith.constant dense<0.000000e+00> : vector<2x32xf32>
    %96 = tpu.matmul %86, %3, %cst_81 {dimension_numbers = #tpu.dot_dimension_numbers<[1], [0], [0], [1], [0, 0, 1, 1], [], []>, precision = #tpu.contract_precision<fp32>} : vector<2x16xf32>, vector<16x32xf32>, vector<2x32xf32> -> vector<2x32xf32>
    %97 = vector.broadcast %88 : vector<2x1xf32> to vector<2x32xf32>
    %98 = vector.broadcast %9 : vector<1x32xf32> to vector<2x32xf32>
    %99 = arith.mulf %97, %98 : vector<2x32xf32>
    %100 = arith.addf %96, %99 : vector<2x32xf32>
    %101 = vector.broadcast %15 : vector<1x32xf32> to vector<2x32xf32>
    %102 = arith.addf %100, %101 : vector<2x32xf32>
    %cst_82 = arith.constant dense<0.000000e+00> : vector<2x32xf32>
    %103 = tpu.matmul %86, %5, %cst_82 {dimension_numbers = #tpu.dot_dimension_numbers<[1], [0], [0], [1], [0, 0, 1, 1], [], []>, precision = #tpu.contract_precision<fp32>} : vector<2x16xf32>, vector<16x32xf32>, vector<2x32xf32> -> vector<2x32xf32>
    %104 = vector.broadcast %88 : vector<2x1xf32> to vector<2x32xf32>
    %105 = vector.broadcast %11 : vector<1x32xf32> to vector<2x32xf32>
    %106 = arith.mulf %104, %105 : vector<2x32xf32>
    %107 = arith.addf %103, %106 : vector<2x32xf32>
    %108 = vector.broadcast %17 : vector<1x32xf32> to vector<2x32xf32>
    %109 = arith.addf %107, %108 : vector<2x32xf32>
    %cst_83 = arith.constant dense<0.000000e+00> : vector<2x32xf32>
    %110 = tpu.matmul %84, %19, %cst_83 {dimension_numbers = #tpu.dot_dimension_numbers<[1], [0], [0], [1], [0, 0, 1, 1], [], []>, precision = #tpu.contract_precision<fp32>} : vector<2x32xf32>, vector<32x32xf32>, vector<2x32xf32> -> vector<2x32xf32>
    %111 = vector.broadcast %25 : vector<1x32xf32> to vector<2x32xf32>
    %112 = arith.addf %110, %111 : vector<2x32xf32>
    %cst_84 = arith.constant dense<0.000000e+00> : vector<2x32xf32>
    %113 = tpu.matmul %84, %21, %cst_84 {dimension_numbers = #tpu.dot_dimension_numbers<[1], [0], [0], [1], [0, 0, 1, 1], [], []>, precision = #tpu.contract_precision<fp32>} : vector<2x32xf32>, vector<32x32xf32>, vector<2x32xf32> -> vector<2x32xf32>
    %114 = vector.broadcast %27 : vector<1x32xf32> to vector<2x32xf32>
    %115 = arith.addf %113, %114 : vector<2x32xf32>
    %cst_85 = arith.constant dense<0.000000e+00> : vector<2x32xf32>
    %116 = tpu.matmul %84, %23, %cst_85 {dimension_numbers = #tpu.dot_dimension_numbers<[1], [0], [0], [1], [0, 0, 1, 1], [], []>, precision = #tpu.contract_precision<fp32>} : vector<2x32xf32>, vector<32x32xf32>, vector<2x32xf32> -> vector<2x32xf32>
    %117 = vector.broadcast %29 : vector<1x32xf32> to vector<2x32xf32>
    %118 = arith.addf %116, %117 : vector<2x32xf32>
    %119 = arith.addf %95, %112 : vector<2x32xf32>
    %120 = arith.negf %119 : vector<2x32xf32>
    %121 = math.exp %120 : vector<2x32xf32>
    %cst_86 = arith.constant 1.000000e+00 : f32
    %122 = vector.broadcast %cst_86 : f32 to vector<2x32xf32>
    %123 = arith.addf %122, %121 : vector<2x32xf32>
    %124 = arith.divf %122, %123 : vector<2x32xf32>
    %125 = arith.addf %102, %115 : vector<2x32xf32>
    %126 = arith.negf %125 : vector<2x32xf32>
    %127 = math.exp %126 : vector<2x32xf32>
    %cst_87 = arith.constant 1.000000e+00 : f32
    %128 = vector.broadcast %cst_87 : f32 to vector<2x32xf32>
    %129 = arith.addf %128, %127 : vector<2x32xf32>
    %130 = arith.divf %128, %129 : vector<2x32xf32>
    %131 = arith.mulf %124, %118 : vector<2x32xf32>
    %132 = arith.addf %109, %131 : vector<2x32xf32>
    %133 = math.tanh %132 : vector<2x32xf32>
    %cst_88 = arith.constant 1.000000e+00 : f32
    %134 = vector.broadcast %cst_88 : f32 to vector<2x32xf32>
    %135 = arith.subf %134, %130 : vector<2x32xf32>
    %136 = arith.mulf %135, %133 : vector<2x32xf32>
    %137 = arith.mulf %130, %84 : vector<2x32xf32>
    %138 = arith.addf %136, %137 : vector<2x32xf32>
    %c0_89 = arith.constant 0 : index
    %c5 = arith.constant 5 : index
    %c0_90 = arith.constant 0 : index
    %c0_91 = arith.constant 0 : index
    %139 = vector.load %arg1[%c0_89, %c5, %c0_90, %c0_91] : memref<1x8x2x16xf32, #tpu.memory_space<vmem>>, vector<1x1x2x16xf32>
    %140 = vector.shape_cast %139 : vector<1x1x2x16xf32> to vector<2x16xf32>
    %c0_92 = arith.constant 0 : index
    %c5_93 = arith.constant 5 : index
    %c0_94 = arith.constant 0 : index
    %c0_95 = arith.constant 0 : index
    %141 = vector.load %arg2[%c0_92, %c5_93, %c0_94, %c0_95] : memref<1x8x2x1xf32, #tpu.memory_space<vmem>>, vector<1x1x2x1xf32>
    %142 = vector.shape_cast %141 : vector<1x1x2x1xf32> to vector<2x1xf32>
    %cst_96 = arith.constant dense<0.000000e+00> : vector<2x32xf32>
    %143 = tpu.matmul %140, %1, %cst_96 {dimension_numbers = #tpu.dot_dimension_numbers<[1], [0], [0], [1], [0, 0, 1, 1], [], []>, precision = #tpu.contract_precision<fp32>} : vector<2x16xf32>, vector<16x32xf32>, vector<2x32xf32> -> vector<2x32xf32>
    %144 = vector.broadcast %142 : vector<2x1xf32> to vector<2x32xf32>
    %145 = vector.broadcast %7 : vector<1x32xf32> to vector<2x32xf32>
    %146 = arith.mulf %144, %145 : vector<2x32xf32>
    %147 = arith.addf %143, %146 : vector<2x32xf32>
    %148 = vector.broadcast %13 : vector<1x32xf32> to vector<2x32xf32>
    %149 = arith.addf %147, %148 : vector<2x32xf32>
    %cst_97 = arith.constant dense<0.000000e+00> : vector<2x32xf32>
    %150 = tpu.matmul %140, %3, %cst_97 {dimension_numbers = #tpu.dot_dimension_numbers<[1], [0], [0], [1], [0, 0, 1, 1], [], []>, precision = #tpu.contract_precision<fp32>} : vector<2x16xf32>, vector<16x32xf32>, vector<2x32xf32> -> vector<2x32xf32>
    %151 = vector.broadcast %142 : vector<2x1xf32> to vector<2x32xf32>
    %152 = vector.broadcast %9 : vector<1x32xf32> to vector<2x32xf32>
    %153 = arith.mulf %151, %152 : vector<2x32xf32>
    %154 = arith.addf %150, %153 : vector<2x32xf32>
    %155 = vector.broadcast %15 : vector<1x32xf32> to vector<2x32xf32>
    %156 = arith.addf %154, %155 : vector<2x32xf32>
    %cst_98 = arith.constant dense<0.000000e+00> : vector<2x32xf32>
    %157 = tpu.matmul %140, %5, %cst_98 {dimension_numbers = #tpu.dot_dimension_numbers<[1], [0], [0], [1], [0, 0, 1, 1], [], []>, precision = #tpu.contract_precision<fp32>} : vector<2x16xf32>, vector<16x32xf32>, vector<2x32xf32> -> vector<2x32xf32>
    %158 = vector.broadcast %142 : vector<2x1xf32> to vector<2x32xf32>
    %159 = vector.broadcast %11 : vector<1x32xf32> to vector<2x32xf32>
    %160 = arith.mulf %158, %159 : vector<2x32xf32>
    %161 = arith.addf %157, %160 : vector<2x32xf32>
    %162 = vector.broadcast %17 : vector<1x32xf32> to vector<2x32xf32>
    %163 = arith.addf %161, %162 : vector<2x32xf32>
    %cst_99 = arith.constant dense<0.000000e+00> : vector<2x32xf32>
    %164 = tpu.matmul %138, %19, %cst_99 {dimension_numbers = #tpu.dot_dimension_numbers<[1], [0], [0], [1], [0, 0, 1, 1], [], []>, precision = #tpu.contract_precision<fp32>} : vector<2x32xf32>, vector<32x32xf32>, vector<2x32xf32> -> vector<2x32xf32>
    %165 = vector.broadcast %25 : vector<1x32xf32> to vector<2x32xf32>
    %166 = arith.addf %164, %165 : vector<2x32xf32>
    %cst_100 = arith.constant dense<0.000000e+00> : vector<2x32xf32>
    %167 = tpu.matmul %138, %21, %cst_100 {dimension_numbers = #tpu.dot_dimension_numbers<[1], [0], [0], [1], [0, 0, 1, 1], [], []>, precision = #tpu.contract_precision<fp32>} : vector<2x32xf32>, vector<32x32xf32>, vector<2x32xf32> -> vector<2x32xf32>
    %168 = vector.broadcast %27 : vector<1x32xf32> to vector<2x32xf32>
    %169 = arith.addf %167, %168 : vector<2x32xf32>
    %cst_101 = arith.constant dense<0.000000e+00> : vector<2x32xf32>
    %170 = tpu.matmul %138, %23, %cst_101 {dimension_numbers = #tpu.dot_dimension_numbers<[1], [0], [0], [1], [0, 0, 1, 1], [], []>, precision = #tpu.contract_precision<fp32>} : vector<2x32xf32>, vector<32x32xf32>, vector<2x32xf32> -> vector<2x32xf32>
    %171 = vector.broadcast %29 : vector<1x32xf32> to vector<2x32xf32>
    %172 = arith.addf %170, %171 : vector<2x32xf32>
    %173 = arith.addf %149, %166 : vector<2x32xf32>
    %174 = arith.negf %173 : vector<2x32xf32>
    %175 = math.exp %174 : vector<2x32xf32>
    %cst_102 = arith.constant 1.000000e+00 : f32
    %176 = vector.broadcast %cst_102 : f32 to vector<2x32xf32>
    %177 = arith.addf %176, %175 : vector<2x32xf32>
    %178 = arith.divf %176, %177 : vector<2x32xf32>
    %179 = arith.addf %156, %169 : vector<2x32xf32>
    %180 = arith.negf %179 : vector<2x32xf32>
    %181 = math.exp %180 : vector<2x32xf32>
    %cst_103 = arith.constant 1.000000e+00 : f32
    %182 = vector.broadcast %cst_103 : f32 to vector<2x32xf32>
    %183 = arith.addf %182, %181 : vector<2x32xf32>
    %184 = arith.divf %182, %183 : vector<2x32xf32>
    %185 = arith.mulf %178, %172 : vector<2x32xf32>
    %186 = arith.addf %163, %185 : vector<2x32xf32>
    %187 = math.tanh %186 : vector<2x32xf32>
    %cst_104 = arith.constant 1.000000e+00 : f32
    %188 = vector.broadcast %cst_104 : f32 to vector<2x32xf32>
    %189 = arith.subf %188, %184 : vector<2x32xf32>
    %190 = arith.mulf %189, %187 : vector<2x32xf32>
    %191 = arith.mulf %184, %138 : vector<2x32xf32>
    %192 = arith.addf %190, %191 : vector<2x32xf32>
    %c0_105 = arith.constant 0 : index
    %c4 = arith.constant 4 : index
    %c0_106 = arith.constant 0 : index
    %c0_107 = arith.constant 0 : index
    %193 = vector.load %arg1[%c0_105, %c4, %c0_106, %c0_107] : memref<1x8x2x16xf32, #tpu.memory_space<vmem>>, vector<1x1x2x16xf32>
    %194 = vector.shape_cast %193 : vector<1x1x2x16xf32> to vector<2x16xf32>
    %c0_108 = arith.constant 0 : index
    %c4_109 = arith.constant 4 : index
    %c0_110 = arith.constant 0 : index
    %c0_111 = arith.constant 0 : index
    %195 = vector.load %arg2[%c0_108, %c4_109, %c0_110, %c0_111] : memref<1x8x2x1xf32, #tpu.memory_space<vmem>>, vector<1x1x2x1xf32>
    %196 = vector.shape_cast %195 : vector<1x1x2x1xf32> to vector<2x1xf32>
    %cst_112 = arith.constant dense<0.000000e+00> : vector<2x32xf32>
    %197 = tpu.matmul %194, %1, %cst_112 {dimension_numbers = #tpu.dot_dimension_numbers<[1], [0], [0], [1], [0, 0, 1, 1], [], []>, precision = #tpu.contract_precision<fp32>} : vector<2x16xf32>, vector<16x32xf32>, vector<2x32xf32> -> vector<2x32xf32>
    %198 = vector.broadcast %196 : vector<2x1xf32> to vector<2x32xf32>
    %199 = vector.broadcast %7 : vector<1x32xf32> to vector<2x32xf32>
    %200 = arith.mulf %198, %199 : vector<2x32xf32>
    %201 = arith.addf %197, %200 : vector<2x32xf32>
    %202 = vector.broadcast %13 : vector<1x32xf32> to vector<2x32xf32>
    %203 = arith.addf %201, %202 : vector<2x32xf32>
    %cst_113 = arith.constant dense<0.000000e+00> : vector<2x32xf32>
    %204 = tpu.matmul %194, %3, %cst_113 {dimension_numbers = #tpu.dot_dimension_numbers<[1], [0], [0], [1], [0, 0, 1, 1], [], []>, precision = #tpu.contract_precision<fp32>} : vector<2x16xf32>, vector<16x32xf32>, vector<2x32xf32> -> vector<2x32xf32>
    %205 = vector.broadcast %196 : vector<2x1xf32> to vector<2x32xf32>
    %206 = vector.broadcast %9 : vector<1x32xf32> to vector<2x32xf32>
    %207 = arith.mulf %205, %206 : vector<2x32xf32>
    %208 = arith.addf %204, %207 : vector<2x32xf32>
    %209 = vector.broadcast %15 : vector<1x32xf32> to vector<2x32xf32>
    %210 = arith.addf %208, %209 : vector<2x32xf32>
    %cst_114 = arith.constant dense<0.000000e+00> : vector<2x32xf32>
    %211 = tpu.matmul %194, %5, %cst_114 {dimension_numbers = #tpu.dot_dimension_numbers<[1], [0], [0], [1], [0, 0, 1, 1], [], []>, precision = #tpu.contract_precision<fp32>} : vector<2x16xf32>, vector<16x32xf32>, vector<2x32xf32> -> vector<2x32xf32>
    %212 = vector.broadcast %196 : vector<2x1xf32> to vector<2x32xf32>
    %213 = vector.broadcast %11 : vector<1x32xf32> to vector<2x32xf32>
    %214 = arith.mulf %212, %213 : vector<2x32xf32>
    %215 = arith.addf %211, %214 : vector<2x32xf32>
    %216 = vector.broadcast %17 : vector<1x32xf32> to vector<2x32xf32>
    %217 = arith.addf %215, %216 : vector<2x32xf32>
    %cst_115 = arith.constant dense<0.000000e+00> : vector<2x32xf32>
    %218 = tpu.matmul %192, %19, %cst_115 {dimension_numbers = #tpu.dot_dimension_numbers<[1], [0], [0], [1], [0, 0, 1, 1], [], []>, precision = #tpu.contract_precision<fp32>} : vector<2x32xf32>, vector<32x32xf32>, vector<2x32xf32> -> vector<2x32xf32>
    %219 = vector.broadcast %25 : vector<1x32xf32> to vector<2x32xf32>
    %220 = arith.addf %218, %219 : vector<2x32xf32>
    %cst_116 = arith.constant dense<0.000000e+00> : vector<2x32xf32>
    %221 = tpu.matmul %192, %21, %cst_116 {dimension_numbers = #tpu.dot_dimension_numbers<[1], [0], [0], [1], [0, 0, 1, 1], [], []>, precision = #tpu.contract_precision<fp32>} : vector<2x32xf32>, vector<32x32xf32>, vector<2x32xf32> -> vector<2x32xf32>
    %222 = vector.broadcast %27 : vector<1x32xf32> to vector<2x32xf32>
    %223 = arith.addf %221, %222 : vector<2x32xf32>
    %cst_117 = arith.constant dense<0.000000e+00> : vector<2x32xf32>
    %224 = tpu.matmul %192, %23, %cst_117 {dimension_numbers = #tpu.dot_dimension_numbers<[1], [0], [0], [1], [0, 0, 1, 1], [], []>, precision = #tpu.contract_precision<fp32>} : vector<2x32xf32>, vector<32x32xf32>, vector<2x32xf32> -> vector<2x32xf32>
    %225 = vector.broadcast %29 : vector<1x32xf32> to vector<2x32xf32>
    %226 = arith.addf %224, %225 : vector<2x32xf32>
    %227 = arith.addf %203, %220 : vector<2x32xf32>
    %228 = arith.negf %227 : vector<2x32xf32>
    %229 = math.exp %228 : vector<2x32xf32>
    %cst_118 = arith.constant 1.000000e+00 : f32
    %230 = vector.broadcast %cst_118 : f32 to vector<2x32xf32>
    %231 = arith.addf %230, %229 : vector<2x32xf32>
    %232 = arith.divf %230, %231 : vector<2x32xf32>
    %233 = arith.addf %210, %223 : vector<2x32xf32>
    %234 = arith.negf %233 : vector<2x32xf32>
    %235 = math.exp %234 : vector<2x32xf32>
    %cst_119 = arith.constant 1.000000e+00 : f32
    %236 = vector.broadcast %cst_119 : f32 to vector<2x32xf32>
    %237 = arith.addf %236, %235 : vector<2x32xf32>
    %238 = arith.divf %236, %237 : vector<2x32xf32>
    %239 = arith.mulf %232, %226 : vector<2x32xf32>
    %240 = arith.addf %217, %239 : vector<2x32xf32>
    %241 = math.tanh %240 : vector<2x32xf32>
    %cst_120 = arith.constant 1.000000e+00 : f32
    %242 = vector.broadcast %cst_120 : f32 to vector<2x32xf32>
    %243 = arith.subf %242, %238 : vector<2x32xf32>
    %244 = arith.mulf %243, %241 : vector<2x32xf32>
    %245 = arith.mulf %238, %192 : vector<2x32xf32>
    %246 = arith.addf %244, %245 : vector<2x32xf32>
    %c0_121 = arith.constant 0 : index
    %c3 = arith.constant 3 : index
    %c0_122 = arith.constant 0 : index
    %c0_123 = arith.constant 0 : index
    %247 = vector.load %arg1[%c0_121, %c3, %c0_122, %c0_123] : memref<1x8x2x16xf32, #tpu.memory_space<vmem>>, vector<1x1x2x16xf32>
    %248 = vector.shape_cast %247 : vector<1x1x2x16xf32> to vector<2x16xf32>
    %c0_124 = arith.constant 0 : index
    %c3_125 = arith.constant 3 : index
    %c0_126 = arith.constant 0 : index
    %c0_127 = arith.constant 0 : index
    %249 = vector.load %arg2[%c0_124, %c3_125, %c0_126, %c0_127] : memref<1x8x2x1xf32, #tpu.memory_space<vmem>>, vector<1x1x2x1xf32>
    %250 = vector.shape_cast %249 : vector<1x1x2x1xf32> to vector<2x1xf32>
    %cst_128 = arith.constant dense<0.000000e+00> : vector<2x32xf32>
    %251 = tpu.matmul %248, %1, %cst_128 {dimension_numbers = #tpu.dot_dimension_numbers<[1], [0], [0], [1], [0, 0, 1, 1], [], []>, precision = #tpu.contract_precision<fp32>} : vector<2x16xf32>, vector<16x32xf32>, vector<2x32xf32> -> vector<2x32xf32>
    %252 = vector.broadcast %250 : vector<2x1xf32> to vector<2x32xf32>
    %253 = vector.broadcast %7 : vector<1x32xf32> to vector<2x32xf32>
    %254 = arith.mulf %252, %253 : vector<2x32xf32>
    %255 = arith.addf %251, %254 : vector<2x32xf32>
    %256 = vector.broadcast %13 : vector<1x32xf32> to vector<2x32xf32>
    %257 = arith.addf %255, %256 : vector<2x32xf32>
    %cst_129 = arith.constant dense<0.000000e+00> : vector<2x32xf32>
    %258 = tpu.matmul %248, %3, %cst_129 {dimension_numbers = #tpu.dot_dimension_numbers<[1], [0], [0], [1], [0, 0, 1, 1], [], []>, precision = #tpu.contract_precision<fp32>} : vector<2x16xf32>, vector<16x32xf32>, vector<2x32xf32> -> vector<2x32xf32>
    %259 = vector.broadcast %250 : vector<2x1xf32> to vector<2x32xf32>
    %260 = vector.broadcast %9 : vector<1x32xf32> to vector<2x32xf32>
    %261 = arith.mulf %259, %260 : vector<2x32xf32>
    %262 = arith.addf %258, %261 : vector<2x32xf32>
    %263 = vector.broadcast %15 : vector<1x32xf32> to vector<2x32xf32>
    %264 = arith.addf %262, %263 : vector<2x32xf32>
    %cst_130 = arith.constant dense<0.000000e+00> : vector<2x32xf32>
    %265 = tpu.matmul %248, %5, %cst_130 {dimension_numbers = #tpu.dot_dimension_numbers<[1], [0], [0], [1], [0, 0, 1, 1], [], []>, precision = #tpu.contract_precision<fp32>} : vector<2x16xf32>, vector<16x32xf32>, vector<2x32xf32> -> vector<2x32xf32>
    %266 = vector.broadcast %250 : vector<2x1xf32> to vector<2x32xf32>
    %267 = vector.broadcast %11 : vector<1x32xf32> to vector<2x32xf32>
    %268 = arith.mulf %266, %267 : vector<2x32xf32>
    %269 = arith.addf %265, %268 : vector<2x32xf32>
    %270 = vector.broadcast %17 : vector<1x32xf32> to vector<2x32xf32>
    %271 = arith.addf %269, %270 : vector<2x32xf32>
    %cst_131 = arith.constant dense<0.000000e+00> : vector<2x32xf32>
    %272 = tpu.matmul %246, %19, %cst_131 {dimension_numbers = #tpu.dot_dimension_numbers<[1], [0], [0], [1], [0, 0, 1, 1], [], []>, precision = #tpu.contract_precision<fp32>} : vector<2x32xf32>, vector<32x32xf32>, vector<2x32xf32> -> vector<2x32xf32>
    %273 = vector.broadcast %25 : vector<1x32xf32> to vector<2x32xf32>
    %274 = arith.addf %272, %273 : vector<2x32xf32>
    %cst_132 = arith.constant dense<0.000000e+00> : vector<2x32xf32>
    %275 = tpu.matmul %246, %21, %cst_132 {dimension_numbers = #tpu.dot_dimension_numbers<[1], [0], [0], [1], [0, 0, 1, 1], [], []>, precision = #tpu.contract_precision<fp32>} : vector<2x32xf32>, vector<32x32xf32>, vector<2x32xf32> -> vector<2x32xf32>
    %276 = vector.broadcast %27 : vector<1x32xf32> to vector<2x32xf32>
    %277 = arith.addf %275, %276 : vector<2x32xf32>
    %cst_133 = arith.constant dense<0.000000e+00> : vector<2x32xf32>
    %278 = tpu.matmul %246, %23, %cst_133 {dimension_numbers = #tpu.dot_dimension_numbers<[1], [0], [0], [1], [0, 0, 1, 1], [], []>, precision = #tpu.contract_precision<fp32>} : vector<2x32xf32>, vector<32x32xf32>, vector<2x32xf32> -> vector<2x32xf32>
    %279 = vector.broadcast %29 : vector<1x32xf32> to vector<2x32xf32>
    %280 = arith.addf %278, %279 : vector<2x32xf32>
    %281 = arith.addf %257, %274 : vector<2x32xf32>
    %282 = arith.negf %281 : vector<2x32xf32>
    %283 = math.exp %282 : vector<2x32xf32>
    %cst_134 = arith.constant 1.000000e+00 : f32
    %284 = vector.broadcast %cst_134 : f32 to vector<2x32xf32>
    %285 = arith.addf %284, %283 : vector<2x32xf32>
    %286 = arith.divf %284, %285 : vector<2x32xf32>
    %287 = arith.addf %264, %277 : vector<2x32xf32>
    %288 = arith.negf %287 : vector<2x32xf32>
    %289 = math.exp %288 : vector<2x32xf32>
    %cst_135 = arith.constant 1.000000e+00 : f32
    %290 = vector.broadcast %cst_135 : f32 to vector<2x32xf32>
    %291 = arith.addf %290, %289 : vector<2x32xf32>
    %292 = arith.divf %290, %291 : vector<2x32xf32>
    %293 = arith.mulf %286, %280 : vector<2x32xf32>
    %294 = arith.addf %271, %293 : vector<2x32xf32>
    %295 = math.tanh %294 : vector<2x32xf32>
    %cst_136 = arith.constant 1.000000e+00 : f32
    %296 = vector.broadcast %cst_136 : f32 to vector<2x32xf32>
    %297 = arith.subf %296, %292 : vector<2x32xf32>
    %298 = arith.mulf %297, %295 : vector<2x32xf32>
    %299 = arith.mulf %292, %246 : vector<2x32xf32>
    %300 = arith.addf %298, %299 : vector<2x32xf32>
    %c0_137 = arith.constant 0 : index
    %c2_138 = arith.constant 2 : index
    %c0_139 = arith.constant 0 : index
    %c0_140 = arith.constant 0 : index
    %301 = vector.load %arg1[%c0_137, %c2_138, %c0_139, %c0_140] : memref<1x8x2x16xf32, #tpu.memory_space<vmem>>, vector<1x1x2x16xf32>
    %302 = vector.shape_cast %301 : vector<1x1x2x16xf32> to vector<2x16xf32>
    %c0_141 = arith.constant 0 : index
    %c2_142 = arith.constant 2 : index
    %c0_143 = arith.constant 0 : index
    %c0_144 = arith.constant 0 : index
    %303 = vector.load %arg2[%c0_141, %c2_142, %c0_143, %c0_144] : memref<1x8x2x1xf32, #tpu.memory_space<vmem>>, vector<1x1x2x1xf32>
    %304 = vector.shape_cast %303 : vector<1x1x2x1xf32> to vector<2x1xf32>
    %cst_145 = arith.constant dense<0.000000e+00> : vector<2x32xf32>
    %305 = tpu.matmul %302, %1, %cst_145 {dimension_numbers = #tpu.dot_dimension_numbers<[1], [0], [0], [1], [0, 0, 1, 1], [], []>, precision = #tpu.contract_precision<fp32>} : vector<2x16xf32>, vector<16x32xf32>, vector<2x32xf32> -> vector<2x32xf32>
    %306 = vector.broadcast %304 : vector<2x1xf32> to vector<2x32xf32>
    %307 = vector.broadcast %7 : vector<1x32xf32> to vector<2x32xf32>
    %308 = arith.mulf %306, %307 : vector<2x32xf32>
    %309 = arith.addf %305, %308 : vector<2x32xf32>
    %310 = vector.broadcast %13 : vector<1x32xf32> to vector<2x32xf32>
    %311 = arith.addf %309, %310 : vector<2x32xf32>
    %cst_146 = arith.constant dense<0.000000e+00> : vector<2x32xf32>
    %312 = tpu.matmul %302, %3, %cst_146 {dimension_numbers = #tpu.dot_dimension_numbers<[1], [0], [0], [1], [0, 0, 1, 1], [], []>, precision = #tpu.contract_precision<fp32>} : vector<2x16xf32>, vector<16x32xf32>, vector<2x32xf32> -> vector<2x32xf32>
    %313 = vector.broadcast %304 : vector<2x1xf32> to vector<2x32xf32>
    %314 = vector.broadcast %9 : vector<1x32xf32> to vector<2x32xf32>
    %315 = arith.mulf %313, %314 : vector<2x32xf32>
    %316 = arith.addf %312, %315 : vector<2x32xf32>
    %317 = vector.broadcast %15 : vector<1x32xf32> to vector<2x32xf32>
    %318 = arith.addf %316, %317 : vector<2x32xf32>
    %cst_147 = arith.constant dense<0.000000e+00> : vector<2x32xf32>
    %319 = tpu.matmul %302, %5, %cst_147 {dimension_numbers = #tpu.dot_dimension_numbers<[1], [0], [0], [1], [0, 0, 1, 1], [], []>, precision = #tpu.contract_precision<fp32>} : vector<2x16xf32>, vector<16x32xf32>, vector<2x32xf32> -> vector<2x32xf32>
    %320 = vector.broadcast %304 : vector<2x1xf32> to vector<2x32xf32>
    %321 = vector.broadcast %11 : vector<1x32xf32> to vector<2x32xf32>
    %322 = arith.mulf %320, %321 : vector<2x32xf32>
    %323 = arith.addf %319, %322 : vector<2x32xf32>
    %324 = vector.broadcast %17 : vector<1x32xf32> to vector<2x32xf32>
    %325 = arith.addf %323, %324 : vector<2x32xf32>
    %cst_148 = arith.constant dense<0.000000e+00> : vector<2x32xf32>
    %326 = tpu.matmul %300, %19, %cst_148 {dimension_numbers = #tpu.dot_dimension_numbers<[1], [0], [0], [1], [0, 0, 1, 1], [], []>, precision = #tpu.contract_precision<fp32>} : vector<2x32xf32>, vector<32x32xf32>, vector<2x32xf32> -> vector<2x32xf32>
    %327 = vector.broadcast %25 : vector<1x32xf32> to vector<2x32xf32>
    %328 = arith.addf %326, %327 : vector<2x32xf32>
    %cst_149 = arith.constant dense<0.000000e+00> : vector<2x32xf32>
    %329 = tpu.matmul %300, %21, %cst_149 {dimension_numbers = #tpu.dot_dimension_numbers<[1], [0], [0], [1], [0, 0, 1, 1], [], []>, precision = #tpu.contract_precision<fp32>} : vector<2x32xf32>, vector<32x32xf32>, vector<2x32xf32> -> vector<2x32xf32>
    %330 = vector.broadcast %27 : vector<1x32xf32> to vector<2x32xf32>
    %331 = arith.addf %329, %330 : vector<2x32xf32>
    %cst_150 = arith.constant dense<0.000000e+00> : vector<2x32xf32>
    %332 = tpu.matmul %300, %23, %cst_150 {dimension_numbers = #tpu.dot_dimension_numbers<[1], [0], [0], [1], [0, 0, 1, 1], [], []>, precision = #tpu.contract_precision<fp32>} : vector<2x32xf32>, vector<32x32xf32>, vector<2x32xf32> -> vector<2x32xf32>
    %333 = vector.broadcast %29 : vector<1x32xf32> to vector<2x32xf32>
    %334 = arith.addf %332, %333 : vector<2x32xf32>
    %335 = arith.addf %311, %328 : vector<2x32xf32>
    %336 = arith.negf %335 : vector<2x32xf32>
    %337 = math.exp %336 : vector<2x32xf32>
    %cst_151 = arith.constant 1.000000e+00 : f32
    %338 = vector.broadcast %cst_151 : f32 to vector<2x32xf32>
    %339 = arith.addf %338, %337 : vector<2x32xf32>
    %340 = arith.divf %338, %339 : vector<2x32xf32>
    %341 = arith.addf %318, %331 : vector<2x32xf32>
    %342 = arith.negf %341 : vector<2x32xf32>
    %343 = math.exp %342 : vector<2x32xf32>
    %cst_152 = arith.constant 1.000000e+00 : f32
    %344 = vector.broadcast %cst_152 : f32 to vector<2x32xf32>
    %345 = arith.addf %344, %343 : vector<2x32xf32>
    %346 = arith.divf %344, %345 : vector<2x32xf32>
    %347 = arith.mulf %340, %334 : vector<2x32xf32>
    %348 = arith.addf %325, %347 : vector<2x32xf32>
    %349 = math.tanh %348 : vector<2x32xf32>
    %cst_153 = arith.constant 1.000000e+00 : f32
    %350 = vector.broadcast %cst_153 : f32 to vector<2x32xf32>
    %351 = arith.subf %350, %346 : vector<2x32xf32>
    %352 = arith.mulf %351, %349 : vector<2x32xf32>
    %353 = arith.mulf %346, %300 : vector<2x32xf32>
    %354 = arith.addf %352, %353 : vector<2x32xf32>
    %c0_154 = arith.constant 0 : index
    %c1_155 = arith.constant 1 : index
    %c0_156 = arith.constant 0 : index
    %c0_157 = arith.constant 0 : index
    %355 = vector.load %arg1[%c0_154, %c1_155, %c0_156, %c0_157] : memref<1x8x2x16xf32, #tpu.memory_space<vmem>>, vector<1x1x2x16xf32>
    %356 = vector.shape_cast %355 : vector<1x1x2x16xf32> to vector<2x16xf32>
    %c0_158 = arith.constant 0 : index
    %c1_159 = arith.constant 1 : index
    %c0_160 = arith.constant 0 : index
    %c0_161 = arith.constant 0 : index
    %357 = vector.load %arg2[%c0_158, %c1_159, %c0_160, %c0_161] : memref<1x8x2x1xf32, #tpu.memory_space<vmem>>, vector<1x1x2x1xf32>
    %358 = vector.shape_cast %357 : vector<1x1x2x1xf32> to vector<2x1xf32>
    %cst_162 = arith.constant dense<0.000000e+00> : vector<2x32xf32>
    %359 = tpu.matmul %356, %1, %cst_162 {dimension_numbers = #tpu.dot_dimension_numbers<[1], [0], [0], [1], [0, 0, 1, 1], [], []>, precision = #tpu.contract_precision<fp32>} : vector<2x16xf32>, vector<16x32xf32>, vector<2x32xf32> -> vector<2x32xf32>
    %360 = vector.broadcast %358 : vector<2x1xf32> to vector<2x32xf32>
    %361 = vector.broadcast %7 : vector<1x32xf32> to vector<2x32xf32>
    %362 = arith.mulf %360, %361 : vector<2x32xf32>
    %363 = arith.addf %359, %362 : vector<2x32xf32>
    %364 = vector.broadcast %13 : vector<1x32xf32> to vector<2x32xf32>
    %365 = arith.addf %363, %364 : vector<2x32xf32>
    %cst_163 = arith.constant dense<0.000000e+00> : vector<2x32xf32>
    %366 = tpu.matmul %356, %3, %cst_163 {dimension_numbers = #tpu.dot_dimension_numbers<[1], [0], [0], [1], [0, 0, 1, 1], [], []>, precision = #tpu.contract_precision<fp32>} : vector<2x16xf32>, vector<16x32xf32>, vector<2x32xf32> -> vector<2x32xf32>
    %367 = vector.broadcast %358 : vector<2x1xf32> to vector<2x32xf32>
    %368 = vector.broadcast %9 : vector<1x32xf32> to vector<2x32xf32>
    %369 = arith.mulf %367, %368 : vector<2x32xf32>
    %370 = arith.addf %366, %369 : vector<2x32xf32>
    %371 = vector.broadcast %15 : vector<1x32xf32> to vector<2x32xf32>
    %372 = arith.addf %370, %371 : vector<2x32xf32>
    %cst_164 = arith.constant dense<0.000000e+00> : vector<2x32xf32>
    %373 = tpu.matmul %356, %5, %cst_164 {dimension_numbers = #tpu.dot_dimension_numbers<[1], [0], [0], [1], [0, 0, 1, 1], [], []>, precision = #tpu.contract_precision<fp32>} : vector<2x16xf32>, vector<16x32xf32>, vector<2x32xf32> -> vector<2x32xf32>
    %374 = vector.broadcast %358 : vector<2x1xf32> to vector<2x32xf32>
    %375 = vector.broadcast %11 : vector<1x32xf32> to vector<2x32xf32>
    %376 = arith.mulf %374, %375 : vector<2x32xf32>
    %377 = arith.addf %373, %376 : vector<2x32xf32>
    %378 = vector.broadcast %17 : vector<1x32xf32> to vector<2x32xf32>
    %379 = arith.addf %377, %378 : vector<2x32xf32>
    %cst_165 = arith.constant dense<0.000000e+00> : vector<2x32xf32>
    %380 = tpu.matmul %354, %19, %cst_165 {dimension_numbers = #tpu.dot_dimension_numbers<[1], [0], [0], [1], [0, 0, 1, 1], [], []>, precision = #tpu.contract_precision<fp32>} : vector<2x32xf32>, vector<32x32xf32>, vector<2x32xf32> -> vector<2x32xf32>
    %381 = vector.broadcast %25 : vector<1x32xf32> to vector<2x32xf32>
    %382 = arith.addf %380, %381 : vector<2x32xf32>
    %cst_166 = arith.constant dense<0.000000e+00> : vector<2x32xf32>
    %383 = tpu.matmul %354, %21, %cst_166 {dimension_numbers = #tpu.dot_dimension_numbers<[1], [0], [0], [1], [0, 0, 1, 1], [], []>, precision = #tpu.contract_precision<fp32>} : vector<2x32xf32>, vector<32x32xf32>, vector<2x32xf32> -> vector<2x32xf32>
    %384 = vector.broadcast %27 : vector<1x32xf32> to vector<2x32xf32>
    %385 = arith.addf %383, %384 : vector<2x32xf32>
    %cst_167 = arith.constant dense<0.000000e+00> : vector<2x32xf32>
    %386 = tpu.matmul %354, %23, %cst_167 {dimension_numbers = #tpu.dot_dimension_numbers<[1], [0], [0], [1], [0, 0, 1, 1], [], []>, precision = #tpu.contract_precision<fp32>} : vector<2x32xf32>, vector<32x32xf32>, vector<2x32xf32> -> vector<2x32xf32>
    %387 = vector.broadcast %29 : vector<1x32xf32> to vector<2x32xf32>
    %388 = arith.addf %386, %387 : vector<2x32xf32>
    %389 = arith.addf %365, %382 : vector<2x32xf32>
    %390 = arith.negf %389 : vector<2x32xf32>
    %391 = math.exp %390 : vector<2x32xf32>
    %cst_168 = arith.constant 1.000000e+00 : f32
    %392 = vector.broadcast %cst_168 : f32 to vector<2x32xf32>
    %393 = arith.addf %392, %391 : vector<2x32xf32>
    %394 = arith.divf %392, %393 : vector<2x32xf32>
    %395 = arith.addf %372, %385 : vector<2x32xf32>
    %396 = arith.negf %395 : vector<2x32xf32>
    %397 = math.exp %396 : vector<2x32xf32>
    %cst_169 = arith.constant 1.000000e+00 : f32
    %398 = vector.broadcast %cst_169 : f32 to vector<2x32xf32>
    %399 = arith.addf %398, %397 : vector<2x32xf32>
    %400 = arith.divf %398, %399 : vector<2x32xf32>
    %401 = arith.mulf %394, %388 : vector<2x32xf32>
    %402 = arith.addf %379, %401 : vector<2x32xf32>
    %403 = math.tanh %402 : vector<2x32xf32>
    %cst_170 = arith.constant 1.000000e+00 : f32
    %404 = vector.broadcast %cst_170 : f32 to vector<2x32xf32>
    %405 = arith.subf %404, %400 : vector<2x32xf32>
    %406 = arith.mulf %405, %403 : vector<2x32xf32>
    %407 = arith.mulf %400, %354 : vector<2x32xf32>
    %408 = arith.addf %406, %407 : vector<2x32xf32>
    %c0_171 = arith.constant 0 : index
    %c0_172 = arith.constant 0 : index
    %c0_173 = arith.constant 0 : index
    %c0_174 = arith.constant 0 : index
    %409 = vector.load %arg1[%c0_171, %c0_172, %c0_173, %c0_174] : memref<1x8x2x16xf32, #tpu.memory_space<vmem>>, vector<1x1x2x16xf32>
    %410 = vector.shape_cast %409 : vector<1x1x2x16xf32> to vector<2x16xf32>
    %c0_175 = arith.constant 0 : index
    %c0_176 = arith.constant 0 : index
    %c0_177 = arith.constant 0 : index
    %c0_178 = arith.constant 0 : index
    %411 = vector.load %arg2[%c0_175, %c0_176, %c0_177, %c0_178] : memref<1x8x2x1xf32, #tpu.memory_space<vmem>>, vector<1x1x2x1xf32>
    %412 = vector.shape_cast %411 : vector<1x1x2x1xf32> to vector<2x1xf32>
    %cst_179 = arith.constant dense<0.000000e+00> : vector<2x32xf32>
    %413 = tpu.matmul %410, %1, %cst_179 {dimension_numbers = #tpu.dot_dimension_numbers<[1], [0], [0], [1], [0, 0, 1, 1], [], []>, precision = #tpu.contract_precision<fp32>} : vector<2x16xf32>, vector<16x32xf32>, vector<2x32xf32> -> vector<2x32xf32>
    %414 = vector.broadcast %412 : vector<2x1xf32> to vector<2x32xf32>
    %415 = vector.broadcast %7 : vector<1x32xf32> to vector<2x32xf32>
    %416 = arith.mulf %414, %415 : vector<2x32xf32>
    %417 = arith.addf %413, %416 : vector<2x32xf32>
    %418 = vector.broadcast %13 : vector<1x32xf32> to vector<2x32xf32>
    %419 = arith.addf %417, %418 : vector<2x32xf32>
    %cst_180 = arith.constant dense<0.000000e+00> : vector<2x32xf32>
    %420 = tpu.matmul %410, %3, %cst_180 {dimension_numbers = #tpu.dot_dimension_numbers<[1], [0], [0], [1], [0, 0, 1, 1], [], []>, precision = #tpu.contract_precision<fp32>} : vector<2x16xf32>, vector<16x32xf32>, vector<2x32xf32> -> vector<2x32xf32>
    %421 = vector.broadcast %412 : vector<2x1xf32> to vector<2x32xf32>
    %422 = vector.broadcast %9 : vector<1x32xf32> to vector<2x32xf32>
    %423 = arith.mulf %421, %422 : vector<2x32xf32>
    %424 = arith.addf %420, %423 : vector<2x32xf32>
    %425 = vector.broadcast %15 : vector<1x32xf32> to vector<2x32xf32>
    %426 = arith.addf %424, %425 : vector<2x32xf32>
    %cst_181 = arith.constant dense<0.000000e+00> : vector<2x32xf32>
    %427 = tpu.matmul %410, %5, %cst_181 {dimension_numbers = #tpu.dot_dimension_numbers<[1], [0], [0], [1], [0, 0, 1, 1], [], []>, precision = #tpu.contract_precision<fp32>} : vector<2x16xf32>, vector<16x32xf32>, vector<2x32xf32> -> vector<2x32xf32>
    %428 = vector.broadcast %412 : vector<2x1xf32> to vector<2x32xf32>
    %429 = vector.broadcast %11 : vector<1x32xf32> to vector<2x32xf32>
    %430 = arith.mulf %428, %429 : vector<2x32xf32>
    %431 = arith.addf %427, %430 : vector<2x32xf32>
    %432 = vector.broadcast %17 : vector<1x32xf32> to vector<2x32xf32>
    %433 = arith.addf %431, %432 : vector<2x32xf32>
    %cst_182 = arith.constant dense<0.000000e+00> : vector<2x32xf32>
    %434 = tpu.matmul %408, %19, %cst_182 {dimension_numbers = #tpu.dot_dimension_numbers<[1], [0], [0], [1], [0, 0, 1, 1], [], []>, precision = #tpu.contract_precision<fp32>} : vector<2x32xf32>, vector<32x32xf32>, vector<2x32xf32> -> vector<2x32xf32>
    %435 = vector.broadcast %25 : vector<1x32xf32> to vector<2x32xf32>
    %436 = arith.addf %434, %435 : vector<2x32xf32>
    %cst_183 = arith.constant dense<0.000000e+00> : vector<2x32xf32>
    %437 = tpu.matmul %408, %21, %cst_183 {dimension_numbers = #tpu.dot_dimension_numbers<[1], [0], [0], [1], [0, 0, 1, 1], [], []>, precision = #tpu.contract_precision<fp32>} : vector<2x32xf32>, vector<32x32xf32>, vector<2x32xf32> -> vector<2x32xf32>
    %438 = vector.broadcast %27 : vector<1x32xf32> to vector<2x32xf32>
    %439 = arith.addf %437, %438 : vector<2x32xf32>
    %cst_184 = arith.constant dense<0.000000e+00> : vector<2x32xf32>
    %440 = tpu.matmul %408, %23, %cst_184 {dimension_numbers = #tpu.dot_dimension_numbers<[1], [0], [0], [1], [0, 0, 1, 1], [], []>, precision = #tpu.contract_precision<fp32>} : vector<2x32xf32>, vector<32x32xf32>, vector<2x32xf32> -> vector<2x32xf32>
    %441 = vector.broadcast %29 : vector<1x32xf32> to vector<2x32xf32>
    %442 = arith.addf %440, %441 : vector<2x32xf32>
    %443 = arith.addf %419, %436 : vector<2x32xf32>
    %444 = arith.negf %443 : vector<2x32xf32>
    %445 = math.exp %444 : vector<2x32xf32>
    %cst_185 = arith.constant 1.000000e+00 : f32
    %446 = vector.broadcast %cst_185 : f32 to vector<2x32xf32>
    %447 = arith.addf %446, %445 : vector<2x32xf32>
    %448 = arith.divf %446, %447 : vector<2x32xf32>
    %449 = arith.addf %426, %439 : vector<2x32xf32>
    %450 = arith.negf %449 : vector<2x32xf32>
    %451 = math.exp %450 : vector<2x32xf32>
    %cst_186 = arith.constant 1.000000e+00 : f32
    %452 = vector.broadcast %cst_186 : f32 to vector<2x32xf32>
    %453 = arith.addf %452, %451 : vector<2x32xf32>
    %454 = arith.divf %452, %453 : vector<2x32xf32>
    %455 = arith.mulf %448, %442 : vector<2x32xf32>
    %456 = arith.addf %433, %455 : vector<2x32xf32>
    %457 = math.tanh %456 : vector<2x32xf32>
    %cst_187 = arith.constant 1.000000e+00 : f32
    %458 = vector.broadcast %cst_187 : f32 to vector<2x32xf32>
    %459 = arith.subf %458, %454 : vector<2x32xf32>
    %460 = arith.mulf %459, %457 : vector<2x32xf32>
    %461 = arith.mulf %454, %408 : vector<2x32xf32>
    %462 = arith.addf %460, %461 : vector<2x32xf32>
    %c0_188 = arith.constant 0 : index
    %c0_189 = arith.constant 0 : index
    %c0_190 = arith.constant 0 : index
    %463 = vector.load %arg8[%c0_188, %c0_189, %c0_190] : memref<1x2x32xf32, #tpu.memory_space<vmem>>, vector<1x2x32xf32>
    %464 = vector.shape_cast %463 : vector<1x2x32xf32> to vector<2x32xf32>
    %465 = vector.shape_cast %462 : vector<2x32xf32> to vector<1x2x32xf32>
    tpu.vector_store %arg8[%c0_188, %c0_189, %c0_190], %465 {strides = array<i32>} : memref<1x2x32xf32, #tpu.memory_space<vmem>>, vector<1x2x32xf32>,
    return
  }
  func.func @transform_0(%arg0: i32) -> (i32, i32, i32, i32) {
    %c0_i32 = arith.constant 0 : i32
    %c0_i32_0 = arith.constant 0 : i32
    %c0_i32_1 = arith.constant 0 : i32
    %c0_i32_2 = arith.constant 0 : i32
    return %arg0, %c0_i32, %c0_i32_0, %c0_i32_1 : i32, i32, i32, i32
  }
  func.func @transform_1(%arg0: i32) -> (i32, i32, i32, i32) {
    %c0_i32 = arith.constant 0 : i32
    %c0_i32_0 = arith.constant 0 : i32
    %c0_i32_1 = arith.constant 0 : i32
    %c0_i32_2 = arith.constant 0 : i32
    return %arg0, %c0_i32, %c0_i32_0, %c0_i32_1 : i32, i32, i32, i32
  }
  func.func @transform_2(%arg0: i32) -> (i32, i32, i32, i32) {
    %c0_i32 = arith.constant 0 : i32
    %c0_i32_0 = arith.constant 0 : i32
    %c0_i32_1 = arith.constant 0 : i32
    %c0_i32_2 = arith.constant 0 : i32
    return %arg0, %c0_i32, %c0_i32_0, %c0_i32_1 : i32, i32, i32, i32
  }
  func.func @transform_3(%arg0: i32) -> (i32, i32, i32, i32) {
    %c0_i32 = arith.constant 0 : i32
    %c0_i32_0 = arith.constant 0 : i32
    %c0_i32_1 = arith.constant 0 : i32
    %c0_i32_2 = arith.constant 0 : i32
    return %arg0, %c0_i32, %c0_i32_0, %c0_i32_1 : i32, i32, i32, i32
  }
  func.func @transform_4(%arg0: i32) -> (i32, i32, i32, i32) {
    %c0_i32 = arith.constant 0 : i32
    %c0_i32_0 = arith.constant 0 : i32
    %c0_i32_1 = arith.constant 0 : i32
    %c0_i32_2 = arith.constant 0 : i32
    return %arg0, %c0_i32, %c0_i32_0, %c0_i32_1 : i32, i32, i32, i32
  }
  func.func @transform_5(%arg0: i32) -> (i32, i32, i32, i32) {
    %c0_i32 = arith.constant 0 : i32
    %c0_i32_0 = arith.constant 0 : i32
    %c0_i32_1 = arith.constant 0 : i32
    %c0_i32_2 = arith.constant 0 : i32
    return %arg0, %c0_i32, %c0_i32_0, %c0_i32_1 : i32, i32, i32, i32
  }
  func.func @transform_6(%arg0: i32) -> (i32, i32, i32, i32) {
    %c0_i32 = arith.constant 0 : i32
    %c0_i32_0 = arith.constant 0 : i32
    %c0_i32_1 = arith.constant 0 : i32
    %c0_i32_2 = arith.constant 0 : i32
    return %arg0, %c0_i32, %c0_i32_0, %c0_i32_1 : i32, i32, i32, i32
  }
  func.func @transform_7(%arg0: i32) -> (i32, i32, i32) {
    %c0_i32 = arith.constant 0 : i32
    %c0_i32_0 = arith.constant 0 : i32
    %c0_i32_1 = arith.constant 0 : i32
    return %arg0, %c0_i32, %c0_i32_0 : i32, i32, i32
  }
}

</mosaic_0001>

<bundles_post_ra>
// kernel: tpu_custom_call.1
= control target key start
LH: loop header
LB: loop body
LE: loop exit
PB: predicated region body
PF: predicated region fallthrough
CT: control target
= control target key end

     0   :  { %s12050_s0 = inlined_call_operand.vmem [shape: f32[2,8,2,16], index: 0, kind: input, shape index: {}]   ;;  %s12051_s1 = inlined_call_operand.vmem [shape: f32[2,8,2,1], index: 1, kind: input, shape index: {}]   ;;  %s12052_s2 = inlined_call_operand.hbm [shape: f32[2,3,16,32], index: 2, kind: input, shape index: {}]   ;;  %s12053_s3 = inlined_call_operand.vmem [shape: f32[2,3,1,32], index: 3, kind: input, shape index: {}]   ;;  %s12054_s4 = inlined_call_operand.hbm [shape: f32[2,3,1,32], index: 4, kind: input, shape index: {}]   ;;  %s12055_s5 = inlined_call_operand.hbm [shape: f32[2,3,32,32], index: 5, kind: input, shape index: {}]   ;;  %s12056_s6 = inlined_call_operand.hbm [shape: f32[2,3,1,32], index: 6, kind: input, shape index: {}]   ;;  %s12057_s7 = inlined_call_operand.hbm [shape: f32[2,2,32], index: 7, kind: output, shape index: {}]  }
   0x1   :  { %12264 = sst [smem:[#allocation82_spill]] %s12052_s2 }
   0x2   :  { %12265 = sst [smem:[#allocation83_spill]] %s12053_s3 }
   0x3   :  { %12266 = sst [smem:[#allocation84_spill]] %s12054_s4 }
   0x4   :  { %12267 = sst [smem:[#allocation85_spill]] %s12057_s7 }
   0x5   :  { %12 = vsyncpa [#allocation3], 0 }
   0x6   :  { %14 = vsyncpa [#allocation3 + $0x1], 0 }
   0x7   :  { %15 = vsyncpa [#allocation6], 0 }
   0x8   :  { %17 = vsyncpa [#allocation6 + $0x1], 0 }
   0x9   :  { %18 = vsyncpa [#allocation9], 0 }
   0xa   :  { %20 = vsyncpa [#allocation9 + $0x1], 0 }
   0xb   :  { %21 = vsyncpa [#allocation4], 0 }
   0xc   :  { %23 = vsyncpa [#allocation4 + $0x1], 0  ;;  %s10036_s24 = smov 0   ;;  %s10038_s25 = smov 0  }
   0xd   :  { %s10040_s26 = smov 0   ;;  %s10042_s27 = smov 0  }
   0xe LB: > { %12268 = sst [smem:[#allocation15_spill]] %s9976_s24  ;;  %s10057_s28 = sadd.s32 4294967295, %s9988_s27   ;;  %s9988_s27 = sphi %s10042_s27, %s12630_s27   ;;  %s9984_s26 = sphi %s10040_s26, %s12632_s26   ;;  %s9980_s25 = sphi %s10038_s25, %s12634_s25   ;;  %s9976_s24 = sphi %s10036_s24, %s12633_s24  }
   0xf   : > { %12269 = sst [smem:[#allocation16_spill]] %s9984_s26  ;;  %s9531_s29 = sadd.s32 4294967294, %s9988_s27  }
  0x10   : > { %s10061_s30 = sadd.s32 1, %s9988_s27   ;;  %s88_s8 = sadd.s32 1, %s9984_s26 }
  0x11   : > { %12270 = sst [smem:[#allocation17_spill]] %s10061_s30  ;;  %s85_s9 = ssub.s32 %s9988_s27, %s10061_s30 }
  0x12   : > { %p95_p0 = scmp.ne.s32.totalorder %s9984_s26, %s9980_s25  ;;  %p86_p1 = scmp.eq.s32.totalorder %s85_s9, 0 }
  0x13   : > { %p96_p2 = scmp.eq.s32.totalorder %s9988_s27, 0  ;;  %p101_p3 = scmp.ne.s32.totalorder %s9980_s25, %s9976_s24 }
  0x14   : > { %p102_p4 = scmp.eq.s32.totalorder %s10057_s28, 0  ;;  %p229_p7 = scmp.eq.s32.totalorder %s10057_s28, 1 }
  0x15   : > { %s10073_s10 = scalar_select %p86_p1, %s9984_s26, %s88_s8  }
  0x16   : > { %p97_p5 = por %p96_p2, %p95_p0  ;;  %p10075_p6 = por %p102_p4, %p101_p3 }
  0x17   : > { %12271 = sst [smem:[#allocation18_spill]] %s10073_s10  ;;  %p235_p8 = scmp.eq.s32.totalorder %s9531_s29, 1 }
  0x18   : > { %p9533_p9 = scmp.ge.s32.totalorder %s9988_s27, 2  ;;  %p9635_p10 = scmp.lt.s32.totalorder %s9988_s27, 2 }
  0x19   : > { %p10082_p11 = por %p229_p7, %p95_p0  ;;  %p10086_p12 = por %p235_p8, %p101_p3 }
  0x1a   : > { %s10091_s14 = sand.u32 1, %s9984_s26   ;;  %p10093_p13 = pnand %p9635_p10, %p97_p5 }
  0x1b   : > { %s12273_s12 = scalar_select %p10082_p11, 1, 0 }
  0x1c   : > { %s12275_s13 = scalar_select %p10086_p12, 1, 0 }
  0x1d   : > { %12274 = sst [smem:[#allocation19_spill]] %s12273_s12  ;;  %s300_s16 = sand.u32 1, %s9988_s27  }
  0x1e   : > { %12276 = sst [smem:[#allocation20_spill]] %s12275_s13  ;;  %s12058_s17 = smul.u32 3, %s10091_s14 }
  0x1f   : > { %s12059_s18 = smul.u32 3, %s9988_s27  ;;  %s12278_s4 = sld [smem:[#allocation84_spill]] }
  0x20   : > { %s304_s19 = scalar_lea.vmem [#allocation5], %s12058_s17  ;;  %p9536_p0 = scmp.ge.s32.totalorder %s9988_s27, 1 }
  0x21   : > { %s311_s20 = sshll.u32 %s304_s19, 4  ;;  %s10108_s8 = scalar_lea.sflag [#allocation6], %s300_s16  ;;  %s312_s20 = int_to_ptr.vmem [resolvable:$true] %s311_s20 }
  0x22   : > { %p9798_p2 = pneg %p10093_p13 }
  0x25   : > { %s308_s23 = scalar_lea.hbm %s12278_s4, %s12059_s18  ;;  %s9801_s21 = scalar_lea.hbm %s12278_s4, 6 }
  0x26   : > { %s309_s29 = sshll.u32 %s308_s23, 4  ;;  %s310_s29 = int_to_ptr.hbm [resolvable:$true] %s309_s29 }
  0x27   : > { %s9794_s9 = sshra.s32 %s310_s29, 4  ;;  %s9795_s9 = int_to_ptr.hbm [resolvable:$true] %s9794_s9 }
  0x28   : > { %s9796_s10 = scalar_lea.hbm %s9795_s9, 3  ;;  %p9802_p5 = scmp.lt.s32.totalorder %s9795_s9, %s12278_s4 }
  0x29   : > { %p9797_p1 = scmp.ne.s32.totalorder %s9795_s9, %s9796_s10  ;;  %p9803_p7 = scmp.lt.s32.totalorder %s9801_s21, %s9796_s10 }
  0x2b   : > { %p9799_p3 = pnand %p9798_p2, %p9797_p1  ;;  %p9804_p8 = por %p9803_p7, %p9802_p5 }
  0x2d   : > { %p9800_p4 = pneg %p9799_p3 }
  0x2f   : > { %p9805_p10 = pnand %p9804_p8, %p9800_p4 }
  0x31   : > { %9808 = shalt.err (!%p9805_p10)
}
  0x32   : > { %s12063_s16 = smov 16   ;;  %s12064_s18 = smov 1  }
  0x33   : > { %9624 = dma.hbm_to_vmem [thread:$0]  (!%p10093_p13), %s310_s29, 48, %s312_s20, %s10108_s8, %s12063_s16, %s12063_s16, %s12064_s18  }
  0x34   : > { %p362_p1 = scmp.lt.s32.totalorder %s9988_s27, 3  ;;  %s9596_s10 = smul.u32 48, %s10091_s14 }
  0x35   : > { %s9597_s9 = smul.u32 48, %s9988_s27  ;;  %s12280_s2 = sld [smem:[#allocation82_spill]] }
  0x36   : > { %p10131_p3 = pnand %p9536_p0, %p362_p1  ;;  %s275_s23 = scalar_lea.vmem [#allocation2], %s9596_s10 }
  0x37   : > { %s283_s4 = sshll.u32 %s275_s23, 4  ;;  %s9600_s30 = smul.u32 96, %s10091_s14  ;;  %s284_s4 = int_to_ptr.vmem [resolvable:$true] %s283_s4 }
  0x38   : > { %s272_s20 = scalar_lea.sflag [#allocation3], %s10091_s14 }
  0x3b   : > { %s280_s22 = scalar_lea.hbm %s12280_s2, %s9597_s9  ;;  %s9831_s19 = scalar_lea.hbm %s12280_s2, 96 }
  0x3c   : > { %s281_s26 = sshll.u32 %s280_s22, 4  ;;  %s282_s26 = int_to_ptr.hbm [resolvable:$true] %s281_s26 }
  0x3d   : > { %s9824_s29 = sshra.s32 %s282_s26, 4  ;;  %s9825_s29 = int_to_ptr.hbm [resolvable:$true] %s9824_s29 }
  0x3e   : > { %s9826_s16 = scalar_lea.hbm %s9825_s29, 48  ;;  %p9832_p7 = scmp.lt.s32.totalorder %s9825_s29, %s12280_s2 }
  0x3f   : > { %p9827_p4 = scmp.ne.s32.totalorder %s9825_s29, %s9826_s16  ;;  %p9833_p8 = scmp.lt.s32.totalorder %s9831_s19, %s9826_s16 }
  0x41   : > { %p9829_p0 = pnand %p9827_p4, %p9798_p2  ;;  %p9834_p10 = por %p9833_p8, %p9832_p7 }
  0x43   : > { %p9830_p5 = pneg %p9829_p0 }
  0x45   : > { %p9835_p1 = pnand %p9834_p10, %p9830_p5 }
  0x47   : > { %9838 = shalt.err (!%p9835_p1)
}
  0x48   : > { %s9992_s21 = smov 128   ;;  %s9993_s22 = smov 8  }
  0x49   : > { %9621 = dma.hbm_to_vmem [thread:$0]  (!%p10093_p13), %s282_s26, 768, %s284_s4, %s272_s20, %s9992_s21, %s9992_s21, %s9993_s22  }
  0x4a   : > { %s9601_s23 = smul.u32 96, %s9988_s27  ;;  %s325_s24 = scalar_lea.vmem [#allocation7], %s9600_s30 }
  0x4b   : > { %s333_s13 = sshll.u32 %s325_s24, 4  ;;  %s12281_s29 = smul.u32 3, %s9988_s27  ;;  %s334_s13 = int_to_ptr.vmem [resolvable:$true] %s333_s13 }
  0x4c   : > { %s330_s9 = scalar_lea.hbm %s12055_s5, %s9601_s23  ;;  %s9861_s26 = scalar_lea.hbm %s12055_s5, 192 }
  0x4d   : > { %s331_s16 = sshll.u32 %s330_s9, 4  ;;  %s351_s2 = scalar_lea.hbm %s12056_s6, %s12281_s29  ;;  %s332_s16 = int_to_ptr.hbm [resolvable:$true] %s331_s16 }
  0x4e   : > { %s9854_s7 = sshra.s32 %s332_s16, 4  ;;  %s9855_s7 = int_to_ptr.hbm [resolvable:$true] %s9854_s7 }
  0x4f   : > { %s9856_s3 = scalar_lea.hbm %s9855_s7, 96  ;;  %p9862_p7 = scmp.lt.s32.totalorder %s9855_s7, %s12055_s5 }
  0x50   : > { %p9857_p4 = scmp.ne.s32.totalorder %s9855_s7, %s9856_s3  ;;  %p9863_p8 = scmp.lt.s32.totalorder %s9861_s26, %s9856_s3 }
  0x52   : > { %p9859_p0 = pnand %p9857_p4, %p9798_p2  ;;  %p9864_p10 = por %p9863_p8, %p9862_p7 }
  0x54   : > { %p9860_p5 = pneg %p9859_p0 }
  0x56   : > { %p9865_p1 = pnand %p9864_p10, %p9860_p5 }
  0x58   : > { %9868 = shalt.err (!%p9865_p1)
}
  0x59   : > { %9627 = dma.hbm_to_vmem [thread:$0]  (!%p10093_p13), %s332_s16, 1536, %s334_s13, %s10108_s8, %s9992_s21, %s9992_s21, %s9993_s22  }
  0x5a   : > { %s352_s20 = sshll.u32 %s351_s2, 4  ;;  %s12282_s23 = smul.u32 3, %s10091_s14  ;;  %s353_s20 = int_to_ptr.hbm [resolvable:$true] %s352_s20 }
  0x5b   : > { %s344_s29 = scalar_lea.sflag [#allocation9], %s10091_s14  ;;  %s9884_s19 = sshra.s32 %s353_s20, 4  ;;  %s9885_s19 = int_to_ptr.hbm [resolvable:$true] %s9884_s19 }
  0x5c   : > { %s347_s18 = scalar_lea.vmem [#allocation8], %s12282_s23  ;;  %s9886_s3 = scalar_lea.hbm %s9885_s19, 3 }
  0x5d   : > { %s354_s9 = sshll.u32 %s347_s18, 4  ;;  %p9887_p4 = scmp.ne.s32.totalorder %s9885_s19, %s9886_s3  ;;  %s355_s9 = int_to_ptr.vmem [resolvable:$true] %s354_s9 }
  0x5e   : > { %s9891_s4 = scalar_lea.hbm %s12056_s6, 6  ;;  %p9892_p7 = scmp.lt.s32.totalorder %s9885_s19, %s12056_s6 }
  0x5f   : > { %p9889_p0 = pnand %p9887_p4, %p9798_p2  ;;  %p9893_p8 = scmp.lt.s32.totalorder %s9891_s4, %s9886_s3 }
  0x61   : > { %p9890_p5 = pneg %p9889_p0  ;;  %p9894_p10 = por %p9893_p8, %p9892_p7 }
  0x63   : > { %p9895_p1 = pnand %p9894_p10, %p9890_p5 }
  0x65   : > { %9898 = shalt.err (!%p9895_p1)
}
  0x66   : > { %s12283_s14 = smov 1   ;;  %s12284_s21 = smov 16  }
  0x67   : > { %9630 = dma.hbm_to_vmem [thread:$0]  (!%p10093_p13), %s353_s20, 48, %s355_s9, %s344_s29, %s12284_s21, %s12284_s21, %s12283_s14  }
  0x68   : > { %366 = sbr.rel (%p10131_p3) target bundleno = 1786 (0x6fa), region = 48 }
  0x6d   : > { %s10193_s22 = sand.u32 1, %s9980_s25  }
  0x6e   : > { %s9604_s13 = smul.u32 48, %s10193_s22  ;;  %s369_s16 = scalar_lea.sflag [#allocation3], %s10193_s22 }
  0x70   : > { %s10197_s24 = scalar_lea.vmem [#allocation2], %s9604_s13 }
  0x71   : > { %9959 = dma.done.wait (%p10075_p6), %s369_s16, 768  }
  0x72   : > { %9961 = vsyncadd (%p10075_p6), %s369_s16, 4294966528  ;;  %s378_s15 = sand.u32 1, %s10057_s28   ;;  %s9605_s17 = smul.u32 3, %s10193_s22 }
  0x73   : > { %s379_s26 = scalar_lea.sflag [#allocation6], %s378_s15 }
  0x74   : > { %s10205_s30 = scalar_lea.vmem [#allocation5], %s9605_s17 }
  0x75   : > { %9963 = dma.done.wait (%p10075_p6), %s379_s26, 1584  }
  0x76   : > { %9965 = vsyncadd (%p10075_p6), %s379_s26, 4294965712  ;;  %s9606_s12 = smul.u32 96, %s10193_s22  ;;  %s399_s23 = scalar_lea.sflag [#allocation9], %s10193_s22 }
  0x77   : > { %s10215_s18 = scalar_lea.vmem [#allocation8], %s9605_s17 }
  0x78   : > { %s10212_s20 = scalar_lea.vmem [#allocation7], %s9606_s12 }
  0x79   : > { %9967 = dma.done.wait (%p10075_p6), %s399_s23, 48  }
  0x7a   : > { %9969 = vsyncadd (%p10075_p6), %s399_s23, 4294967248  ;;  %p463_p13 = scmp.lt.s32.totalorder %s10057_s28, 1  ;;  %v9994_v0 = vmov 0   ;;  %vm527_vm0 = vcmask 130048   ;;  %v478_v1 = vld [vmem:[%s10197_s24 + $0x8] sm:$0xff]  ;;  %v477_v2 = vld [vmem:[%s10197_s24] sm:$0xff] }
  0x7b   : > { %9675 = vset.pattern.permute.xlu0 %v9994_v0  ;;  %9676 = vset.pattern.permute.xlu1 %v9994_v0  ;;  %v10236_v4 = vand.u32 4294901760, %v478_v1  ;;  %v10238_v5 = vand.u32 4294901760, %v477_v2  ;;  %v9543_v7 = vld [vmem:[%s10197_s24 + $0x18] sm:$0xff]  ;;  %v9542_v8 = vld [vmem:[%s10197_s24 + $0x10] sm:$0xff]  ;;  %v9545_v9 = vld [vmem:[%s10197_s24 + $0x28] sm:$0xff]  ;;  %s12291_s21 = sld [smem:[#allocation83_spill]] }
  0x7c   : > { %s464_s9 = scalar_select %p463_p13, %s10057_s28, 1  ;;  %9677 = vset.pattern.permute.xlu2 %v9994_v0  ;;  %v10246_v11 = vand.u32 4294901760, %v9543_v7  ;;  %v10248_v12 = vand.u32 4294901760, %v9542_v8  ;;  %v10264_v16 = vand.u32 4294901760, %v9545_v9  ;;  %v9544_v17 = vld [vmem:[%s10197_s24 + $0x20] sm:$0xff]  ;;  %vm1031_vm9 = vcmask 261120  }
  0x7d   : > { %12285 = vst [vmem:[#allocation21_spill] sm:$0xff] %v10236_v4  ;;  %v10252_v14 = vsub.f32 %v478_v1, %v10236_v4  ;;  %v10255_v15 = vsub.f32 %v477_v2, %v10238_v5  ;;  %630 = vmatpush.msra.mxu3 %v10236_v4  ;;  %546 = vmatpush.msra.mxu0 %v10236_v4  ;;  %v498_v21 = vld [vmem:[%s10212_s20 + $0x18] sm:$0xff]  ;;  %v497_v24 = vld [vmem:[%s10212_s20 + $0x10] sm:$0xff]  ;;  %v10296_v28 = vand.u32 4294901760, %v9544_v17  ;;  %v496_v36 = vld [vmem:[%s10212_s20 + $0x8] sm:$0xff]  ;;  %s9537_s16 = sshll.u32 %s10193_s22, 1 }
  0x7e   : > { %s9594_s29 = sshll.u32 %s464_s9, 4  ;;  %s9607_s11 = smul.u32 3, %s464_s9  ;;  %12286 = vst [vmem:[#allocation22_spill] sm:$0xff] %v10238_v5  ;;  %v10271_v19 = vsub.f32 %v9543_v7, %v10246_v11  ;;  %v10274_v20 = vsub.f32 %v9542_v8, %v10248_v12  ;;  %v10305_v31 = vsub.f32 %v9545_v9, %v10264_v16  ;;  %v10307_v32 = vand.u32 4294901760, %v498_v21  ;;  %v495_v47 = vld [vmem:[%s10212_s20] sm:$0xff]  ;;  %v9553_v7 = vld [vmem:[%s10212_s20 + $0x38] sm:$0xff] }
  0x7f   : > { %s10226_s7 = scalar_lea.vmem %s12050_s0, %s9594_s29  ;;  %s10231_s8 = scalar_lea.vmem %s12051_s1, %s9594_s29  ;;  %12287 = vst [vmem:[#allocation23_spill] sm:$0xff] %v10246_v11  ;;  %605 = vmatpush.msra.mxu2 %v10252_v14  ;;  %632 = vmatpush.msra.mxu3 %v10238_v5  ;;  %v10280_v22 = vand.u32 4294901760, %v10252_v14  ;;  %v10283_v23 = vand.u32 4294901760, %v10255_v15  ;;  %v10324_v39 = vand.u32 4294901760, %v497_v24  ;;  %v10333_v43 = vsub.f32 %v9544_v17, %v10296_v28  ;;  %v9552_v8 = vld [vmem:[%s10212_s20 + $0x30] sm:$0xff] }
  0x80   : > { %v9560_v3 = vld [vmem:[%s10226_s7 + $0xe] sm:$0x3]  ;;  %12288 = vst [vmem:[#allocation24_spill] sm:$0xff] %v10248_v12  ;;  %548 = vmatpush.msra.mxu0 %v10238_v5  ;;  %v10291_v26 = vand.u32 4294901760, %v10271_v19  ;;  %v10294_v27 = vand.u32 4294901760, %v10274_v20  ;;  %v10338_v44 = vand.u32 4294901760, %v10305_v31  ;;  %v10341_v45 = vsub.f32 %v498_v21, %v10307_v32 }
  0x81   : > { %v529_v6 = vsel %vm527_vm0, %v9560_v3, 0  ;;  %v9561_v13 = vld [vmem:[%s10231_s8 + $0xe] sm:$0x3]  ;;  %12289 = vst [vmem:[#allocation25_spill] sm:$0xff] %v10252_v14  ;;  %s10261_s13 = scalar_lea.vmem %s12291_s21, %s9607_s11  ;;  %608 = vmatpush.msra.mxu2 %v10255_v15  ;;  %v575_v29 = vsub.f32 %v10252_v14, %v10280_v22  ;;  %v581_v30 = vsub.f32 %v10255_v15, %v10283_v23  ;;  %v10343_v46 = vand.u32 4294901760, %v496_v36  ;;  %s9591_s24 = sshll.u32 %s10057_s28, 1 }
  0x82   : > { %v10244_v10 = vand.u32 4294901760, %v529_v6  ;;  %12290 = vst [vmem:[#allocation26_spill] sm:$0xff] %v10255_v15  ;;  %520 = vperm.xlu0 %9675, %v9561_v13   ;;  %657 = vmatpush.msrb.mxu0 %v10280_v22  ;;  %v742_v34 = vsub.f32 %v10271_v19, %v10291_v26  ;;  %v748_v35 = vsub.f32 %v10274_v20, %v10294_v27  ;;  %v10356_v49 = vand.u32 4294901760, %v10333_v43  ;;  %v9565_v1 = vld [vmem:[%s10231_s8 + $0xc] sm:$0x3]  ;;  %v9551_v21 = vld [vmem:[%s10212_s20 + $0x28] sm:$0xff] }
  0x83   : > { %12292 = vst [vmem:[#allocation27_spill] sm:$0xff] %v10264_v16  ;;  %713 = vmatpush.msrb.mxu2 %v10246_v11  ;;  %v10319_v37 = vand.u32 4294901760, %v575_v29  ;;  %v10321_v38 = vand.u32 4294901760, %v581_v30  ;;  %v10351_v48 = vsub.f32 %v497_v24, %v10324_v39  ;;  %v10358_v50 = vand.u32 4294901760, %v495_v47  ;;  %s12625_s26 = sld [smem:[#allocation85_spill]]  ;;  %s462_s23 = scalar_lea.vmem [#allocation10], %s9537_s16 }
  0x84   : > { %v10268_v18 = vsub.f32 %v529_v6, %v10244_v10  ;;  %12293 = vst [vmem:[#allocation28_spill] sm:$0xff] %v10271_v19  ;;  %661 = vmatpush.msrb.mxu0 %v10283_v23  ;;  %v10328_v41 = vand.u32 4294901760, %v742_v34  ;;  %v10330_v42 = vand.u32 4294901760, %v748_v35  ;;  %v909_v51 = vsub.f32 %v10305_v31, %v10338_v44  ;;  %s9344_s28 = scalar_lea.sflag [#allocation4], %s10193_s22 }
  0x85   : > { %12294 = vst [vmem:[#allocation29_spill] sm:$0xff] %v10274_v20  ;;  %577 = vmatpush.msra.mxu1 %v10319_v37  ;;  %715 = vmatpush.msrb.mxu2 %v10248_v12  ;;  %v10365_v52 = vand.u32 4294901760, %v10341_v45  ;;  %v10368_v53 = vsub.f32 %v496_v36, %v10343_v46  ;;  %v10375_v54 = vand.u32 4294901760, %v10351_v48  ;;  %v915_v55 = vsub.f32 %v10333_v43, %v10356_v49 }
  0x86   : > { %12295 = vst [vmem:[#allocation30_spill] sm:$0xff] %v10280_v22  ;;  %v10287_v25 = vand.u32 4294901760, %v10268_v18  ;;  %611 = vmatmul.f32.vlgmr.msra.gmra.mxu2 %v10268_v18  ;;  %744 = vmatpush.msrb.mxu3 %v10328_v41  ;;  %v10382_v56 = vsub.f32 %v495_v47, %v10358_v50  ;;  %v10386_v57 = vand.u32 4294901760, %v909_v51  ;;  %v10436_v13 = vand.u32 4294901760, %v9553_v7 }
  0x87   : > { %12296 = vst [vmem:[#allocation31_spill] sm:$0xff] %v10283_v23  ;;  %583 = vmatpush.msra.mxu1 %v10321_v38  ;;  %824 = vmatpush.msra.mxu2 %v10291_v26  ;;  %v1079_v58 = vsub.f32 %v10341_v45, %v10365_v52  ;;  %v10391_v59 = vand.u32 4294901760, %v10368_v53  ;;  %v1085_v60 = vsub.f32 %v10351_v48, %v10375_v54  ;;  %v10401_v61 = vand.u32 4294901760, %v915_v55 }
  0x88   : > { %12297 = vst [vmem:[#allocation32_spill] sm:$0xff] %v10291_v26  ;;  %636 = vmatmul.f32.vlgmr.msra.gmra.mxu3 %v10287_v25  ;;  %v552_v33 = vsub.f32 %v10268_v18, %v10287_v25  ;;  %585 = vmatmul.f32.vlgmr.msra.gmra.mxu1 %v10244_v10  ;;  %v10404_v62 = vand.u32 4294901760, %v10382_v56  ;;  %v10442_v17 = vand.u32 4294901760, %v9552_v8  ;;  %v10450_v24 = vsub.f32 %v9553_v7, %v10436_v13 }
  0x89   : > { %12298 = vst [vmem:[#allocation33_spill] sm:$0xff] %v10294_v27  ;;  %750 = vmatpush.msrb.mxu3 %v10330_v42  ;;  %682 = vmatpush.msrb.mxu1 %v10236_v4  ;;  %v10408_v63 = vand.u32 4294901760, %v1079_v58  ;;  %v1091_v0 = vsub.f32 %v10368_v53, %v10391_v59  ;;  %v10417_v2 = vand.u32 4294901760, %v1085_v60  ;;  %v10461_v30 = vand.u32 4294901760, %v9551_v21  ;;  %v9555_v58 = vld [vmem:[%s10212_s20 + $0x48] sm:$0xff]  ;;  %s9354_s12 = scalar_lea.hbm %s12625_s26, %s9591_s24 }
  0x8a   : > { %12299 = vst [vmem:[#allocation34_spill] sm:$0xff] %v10296_v28  ;;  %v10326_v40 = vand.u32 4294901760, %v552_v33  ;;  %828 = vmatpush.msra.mxu2 %v10294_v27  ;;  %v1097_v3 = vsub.f32 %v10382_v56, %v10404_v62  ;;  %1649 = vperm.xlu0 %9675, %v9565_v1   ;;  %v10459_v29 = vsub.f32 %v9552_v8, %v10442_v17  ;;  %v9556_v33 = vld [vmem:[%s10212_s20 + $0x50] sm:$0xff]  ;;  %v10469_v34 = vand.u32 4294901760, %v10450_v24  ;;  %s9358_s9 = sshll.u32 %s9354_s12, 4  ;;  %s9359_s9 = int_to_ptr.hbm [resolvable:$true] %s9358_s9 }
  0x8b   : > { %12300 = vst [vmem:[#allocation35_spill] sm:$0xff] %v10305_v31  ;;  %684 = vmatpush.msrb.mxu1 %v10238_v5  ;;  %849 = vmatpush.msra.mxu3 %v10246_v11  ;;  %v10424_v6 = vand.u32 4294901760, %v1091_v0  ;;  %v10480_v47 = vsub.f32 %v9551_v21, %v10461_v30  ;;  %v10485_v55 = vand.u32 4294901760, %v9556_v33  ;;  %v10503_v7 = vand.u32 4294901760, %v9555_v58  ;;  %s9928_s29 = sshra.s32 %s9359_s9, 4  ;;  %s9929_s29 = int_to_ptr.hbm [resolvable:$true] %s9928_s29 }
  0x8c   : > { %12301 = vst [vmem:[#allocation36_spill] sm:$0xff] %v10307_v32  ;;  %554 = vmatmul.f32.vlgmr.msra.gmra.mxu0 %v10326_v40  ;;  %v10434_v9 = vand.u32 4294901760, %v1097_v3  ;;  %v10483_v51 = vand.u32 4294901760, %v10459_v29  ;;  %v1267_v60 = vsub.f32 %v10450_v24, %v10469_v34  ;;  %v9554_v3 = vld [vmem:[%s10212_s20 + $0x40] sm:$0xff]  ;;  %s9930_s19 = scalar_lea.hbm %s9929_s29, 2 }
  0x8d   : > { %12302 = vst [vmem:[#allocation37_spill] sm:$0xff] %v10319_v37  ;;  %772 = vmatpush.msra.mxu0 %v10271_v19  ;;  %797 = vmatpush.msra.mxu1 %v10246_v11  ;;  %v10510_v21 = vand.u32 4294901760, %v10480_v47  ;;  %p9931_p6 = scmp.ne.s32.totalorder %s9929_s29, %s9930_s19 }
  0x8e   : > { %12303 = vst [vmem:[#allocation38_spill] sm:$0xff] %v10321_v38  ;;  %721 = vmatmul.f32.vlgmr.msrb.gmra.mxu2 %v10326_v40  ;;  %851 = vmatpush.msra.mxu3 %v10248_v12  ;;  %v1273_v8 = vsub.f32 %v10459_v29, %v10483_v51 }
  0x8f   : > { %12304 = vst [vmem:[#allocation39_spill] sm:$0xff] %v10324_v39  ;;  %775 = vmatpush.msra.mxu0 %v10274_v20  ;;  %799 = vmatpush.msra.mxu1 %v10248_v12  ;;  %p9932_p2 = pnand %p9931_p6, %p10082_p11 }
  0x90   : > { %12305 = vst [vmem:[#allocation40_spill] sm:$0xff] %v10328_v41  ;;  %752 = vmatmul.f32.vlgmr.msrb.gmra.mxu3 %v10244_v10  ;;  %939 = vmatpush.msrb.mxu2 %v10305_v31 }
  0x91   : > { %12306 = vst [vmem:[#allocation41_spill] sm:$0xff] %v10330_v42  ;;  %686 = vmatmul.f32.vlgmr.msrb.gmra.mxu1 %v10244_v10  ;;  %964 = vmatpush.msrb.mxu3 %v10264_v16  ;;  %p9933_p3 = pneg %p9932_p2 }
  0x92   : > { %12307 = vst [vmem:[#allocation42_spill] sm:$0xff] %v10333_v43  ;;  %911 = vmatpush.msrb.mxu1 %v10386_v57  ;;  %942 = vmatpush.msrb.mxu2 %v10333_v43 }
  0x93   : > { %12308 = vst [vmem:[#allocation43_spill] sm:$0xff] %v10338_v44  ;;  %966 = vmatpush.msrb.mxu3 %v10296_v28 }
  0x94   : > { %12309 = vst [vmem:[#allocation44_spill] sm:$0xff] %v10341_v45  ;;  %663 = vmatmul.f32.vlgmr.msrb.gmra.mxu0 %v10244_v10  ;;  %917 = vmatpush.msrb.mxu1 %v10401_v61 }
  0x95   : > { %12310 = vst [vmem:[#allocation45_spill] sm:$0xff] %v10343_v46  ;;  %880 = vmatpush.msrb.mxu0 %v10264_v16 }
  0x96   : > { %12311 = vst [vmem:[#allocation46_spill] sm:$0xff] %v10351_v48  ;;  %830 = vmatmul.f32.vlgmr.msra.gmra.mxu2 %v10244_v10 }
  0x97   : > { %12312 = vst [vmem:[#allocation47_spill] sm:$0xff] %v10356_v49  ;;  %882 = vmatpush.msrb.mxu0 %v10296_v28  ;;  %1048 = vmatpush.msra.mxu2 %v10307_v32 }
  0x98   : > { %12313 = vst [vmem:[#allocation48_spill] sm:$0xff] %v10358_v50  ;;  %853 = vmatmul.f32.vlgmr.msra.gmra.mxu3 %v10244_v10 }
  0x99   : > { %12314 = vst [vmem:[#allocation49_spill] sm:$0xff] %v10365_v52  ;;  %1081 = vmatpush.msra.mxu3 %v10408_v63  ;;  %1050 = vmatpush.msra.mxu2 %v10324_v39 }
  0x9a   : > { %12315 = vst [vmem:[#allocation50_spill] sm:$0xff] %v10368_v53  ;;  %803 = vmatmul.f32.vlgmr.msra.gmra.mxu1 %v10287_v25 }
  0x9b   : > { %12316 = vst [vmem:[#allocation51_spill] sm:$0xff] %v10375_v54  ;;  %1087 = vmatpush.msra.mxu3 %v10417_v2  ;;  %1052 = vmatpush.msra.mxu2 %v10343_v46 }
  0x9c   : > { %12317 = vst [vmem:[#allocation52_spill] sm:$0xff] %v10382_v56  ;;  %778 = vmatmul.f32.vlgmr.msra.gmra.mxu0 %v10268_v18  ;;  %1016 = vmatpush.msra.mxu1 %v10264_v16 }
  0x9d   : > { %12318 = vst [vmem:[#allocation53_spill] sm:$0xff] %v10386_v57  ;;  %991 = vmatpush.msra.mxu0 %v10338_v44  ;;  %1093 = vmatpush.msra.mxu3 %v10424_v6 }
  0x9e   : > { %12319 = vst [vmem:[#allocation54_spill] sm:$0xff] %v10391_v59  ;;  %945 = vmatmul.f32.vlgmr.msrb.gmra.mxu2 %v10268_v18  ;;  %1018 = vmatpush.msra.mxu1 %v10296_v28  ;;  %v9550_v18 = vld [vmem:[%s10212_s20 + $0x20] sm:$0xff] }
  0x9f   : > { %12320 = vst [vmem:[#allocation55_spill] sm:$0xff] %v10401_v61  ;;  %1054 = vmatpush.msra.mxu2 %v10358_v50  ;;  %995 = vmatpush.msra.mxu0 %v10356_v49  ;;  %v10471_v35 = vand.u32 4294901760, %v9550_v18 }
  0xa0   : > { %12321 = vst [vmem:[#allocation56_spill] sm:$0xff] %v10404_v62  ;;  %970 = vmatmul.f32.vlgmr.msrb.gmra.mxu3 %v10287_v25  ;;  %v9557_v25 = vld [vmem:[%s10212_s20 + $0x58] sm:$0xff] }
  0xa1   : > { %12322 = vst [vmem:[#allocation57_spill] sm:$0xff] %v10408_v63  ;;  %1099 = vmatpush.msra.mxu3 %v10434_v9  ;;  %1177 = vmatpush.msrb.mxu2 %v10365_v52  ;;  %v10473_v36 = vand.u32 4294901760, %v9557_v25  ;;  %v10495_v0 = vsub.f32 %v9550_v18, %v10471_v35  ;;  %v10513_v18 = vsub.f32 %v9556_v33, %v10485_v55 }
  0xa2   : > { %12323 = vst [vmem:[#allocation58_spill] sm:$0xff] %v10417_v2  ;;  %919 = vmatmul.f32.vlgmr.msrb.gmra.mxu1 %v10244_v10  ;;  %v10532_v33 = vsub.f32 %v9555_v58, %v10503_v7 }
  0xa3   : > { %12324 = vst [vmem:[#allocation59_spill] sm:$0xff] %v10424_v6  ;;  %1208 = vmatpush.msrb.mxu3 %v10307_v32  ;;  %1181 = vmatpush.msrb.mxu2 %v10375_v54  ;;  %v10498_v1 = vsub.f32 %v9557_v25, %v10473_v36  ;;  %v10517_v25 = vand.u32 4294901760, %v9554_v3 }
  0xa4   : > { %12325 = vst [vmem:[#allocation60_spill] sm:$0xff] %v10434_v9  ;;  %888 = vmatmul.f32.vlgmr.msrb.gmra.mxu0 %v10326_v40  ;;  %1148 = vmatpush.msrb.mxu1 %v10307_v32  ;;  %v12070_v40 = vmov 0.0  }
  0xa5   : > { %12326 = vst [vmem:[#allocation61_spill] sm:$0xff] %v10450_v24  ;;  %1119 = vmatpush.msrb.mxu0 %v10341_v45  ;;  %1210 = vmatpush.msrb.mxu3 %v10324_v39  ;;  %v10546_v58 = vsub.f32 %v9554_v3, %v10517_v25  ;;  %v9585_v3 = vld [vmem:[%s10231_s8 + $0x2] sm:$0x3] }
  0xa6   : > { %12327 = vst [vmem:[#allocation62_spill] sm:$0xff] %v10459_v29  ;;  %1185 = vmatpush.msrb.mxu2 %v10391_v59  ;;  %1150 = vmatpush.msrb.mxu1 %v10324_v39 }
  0xa7   : > { %1122 = vmatpush.msrb.mxu0 %v10351_v48  ;;  %1060 = vmatmul.f32.vlgmr.msra.gmra.mxu2 %v12070_v40  ;;  %12328 = vst [vmem:[#allocation63_spill] sm:$0xff] %v10480_v47 }
  0xa8   : > { %1101 = vmatmul.f32.vlgmr.msra.gmra.mxu3 %v12070_v40  ;;  %12329 = vst [vmem:[#allocation64_spill] sm:$0xff] %v10485_v55  ;;  %1189 = vmatpush.msrb.mxu2 %v10404_v62  ;;  %v10521_v40 = vand.u32 4294901760, %v1267_v60  ;;  %v10527_v62 = vand.u32 4294901760, %v10495_v0  ;;  %v1279_v60 = vsub.f32 %v10480_v47, %v10510_v21 }
  0xa9   : > { %1212 = vmatpush.msrb.mxu3 %v10343_v46  ;;  %1125 = vmatpush.msrb.mxu0 %v10368_v53  ;;  %12330 = vst [vmem:[#allocation65_spill] sm:$0xff] %v10495_v0 }
  0xaa   : > { %1307 = vmatpush.msra.mxu2 %v10450_v24  ;;  %12331 = vst [vmem:[#allocation66_spill] sm:$0xff] %v10503_v7  ;;  %1152 = vmatpush.msrb.mxu1 %v10343_v46  ;;  %v10524_v24 = vand.u32 4294901760, %v10498_v1  ;;  %v1285_v59 = vsub.f32 %v10495_v0, %v10527_v62  ;;  %v10562_v53 = vand.u32 4294901760, %v1279_v60 }
  0xab   : > { %1214 = vmatpush.msrb.mxu3 %v10358_v50  ;;  %1128 = vmatpush.msrb.mxu0 %v10382_v56  ;;  %12332 = vst [vmem:[#allocation67_spill] sm:$0xff] %v10517_v25  ;;  %v10541_v56 = vand.u32 4294901760, %v10513_v18 }
  0xac   : > { %997 = vmatmul.f32.vlgmr.msra.gmra.mxu0 %v10244_v10  ;;  %1310 = vmatpush.msra.mxu2 %v10459_v29  ;;  %12333 = vst [vmem:[#allocation68_spill] sm:$0xff] %v10521_v40  ;;  %v12336_v29 = vmov 0.0  }
  0xad   : > { %1020 = vmatmul.f32.vlgmr.msra.gmra.mxu1 %v10244_v10  ;;  %1336 = vmatpush.msra.mxu3 %v10436_v13  ;;  %12334 = vst [vmem:[#allocation69_spill] sm:$0xff] %v10524_v24  ;;  %v10536_v10 = vand.u32 4294901760, %v1273_v8  ;;  %v1455_v8 = vsub.f32 %v10498_v1, %v10524_v24 }
  0xae   : > { %1154 = vmatpush.msrb.mxu1 %v10358_v50  ;;  %1236 = vmatpush.msra.mxu0 %v10436_v13  ;;  %12335 = vst [vmem:[#allocation70_spill] sm:$0xff] %v10532_v33 }
  0xaf   : > { %1191 = vmatmul.f32.vlgmr.msrb.gmra.mxu2 %v12336_v29  ;;  %12337 = vst [vmem:[#allocation71_spill] sm:$0xff] %v10536_v10  ;;  %1338 = vmatpush.msra.mxu3 %v10442_v17  ;;  %v10573_v48 = vand.u32 4294901760, %v1455_v8 }
  0xb0   : > { %1216 = vmatmul.f32.vlgmr.msrb.gmra.mxu3 %v12336_v29  ;;  %12338 = vst [vmem:[#allocation72_spill] sm:$0xff] %v10541_v56  ;;  %1313 = vmatpush.msra.mxu2 %v10480_v47  ;;  %v10557_v47 = vand.u32 4294901760, %v10532_v33 }
  0xb1   : > { %12339 = vst [vmem:[#allocation73_spill] sm:$0xff] %v10546_v58  ;;  %1238 = vmatpush.msra.mxu0 %v10442_v17  ;;  %1269 = vmatpush.msra.mxu1 %v10521_v40  ;;  %v1461_v40 = vsub.f32 %v10513_v18, %v10541_v56 }
  0xb2   : > { %1316 = vmatpush.msra.mxu2 %v10495_v0  ;;  %1340 = vmatpush.msra.mxu3 %v10461_v30  ;;  %12340 = vst [vmem:[#allocation74_spill] sm:$0xff] %v10557_v47  ;;  %v10569_v0 = vand.u32 4294901760, %v10546_v58  ;;  %v1467_v60 = vsub.f32 %v10532_v33, %v10557_v47 }
  0xb3   : > { %1275 = vmatpush.msra.mxu1 %v10536_v10  ;;  %12341 = vst [vmem:[#allocation75_spill] sm:$0xff] %v10562_v53  ;;  %1240 = vmatpush.msra.mxu0 %v10461_v30  ;;  %v10575_v10 = vand.u32 4294901760, %v1285_v59  ;;  %v10582_v54 = vand.u32 4294901760, %v1461_v40 }
  0xb4   : > { %1131 = vmatmul.f32.vlgmr.msrb.gmra.mxu0 %v12336_v29  ;;  %1342 = vmatpush.msra.mxu3 %v10471_v35  ;;  %12342 = vst [vmem:[#allocation76_spill] sm:$0xff] %v10569_v0  ;;  %v1473_v59 = vsub.f32 %v10546_v58, %v10569_v0  ;;  %v10592_v8 = vand.u32 4294901760, %v1467_v60 }
  0xb5   : > { %1158 = vmatmul.f32.vlgmr.msrb.gmra.mxu1 %v12336_v29  ;;  %1424 = vmatpush.msrb.mxu2 %v10473_v36  ;;  %12343 = vst [vmem:[#allocation77_spill] sm:$0xff] %v10573_v48 }
  0xb6   : > { %12344 = vst [vmem:[#allocation78_spill] sm:$0xff] %v10575_v10  ;;  %7149 = vperm.xlu0 %9675, %v9585_v3   ;;  %1242 = vmatpush.msra.mxu0 %v10471_v35  ;;  %v9564_v3 = vld [vmem:[%s10226_s7 + $0xc] sm:$0x3]  ;;  %v10599_v40 = vand.u32 4294901760, %v1473_v59 }
  0xb7   : > { %1319 = vmatmul.f32.vlgmr.msra.gmra.mxu2 %v12336_v29  ;;  %1281 = vmatpush.msra.mxu1 %v10562_v53 }
  0xb8   : > { %1346 = vmatmul.f32.vlgmr.msra.gmra.mxu3 %v12336_v29  ;;  %1426 = vmatpush.msrb.mxu2 %v10485_v55  ;;  %12345 = vst [vmem:[#allocation79_spill] sm:$0xff] %v10599_v40 }
  0xb9   : > { %1457 = vmatpush.msrb.mxu3 %v10573_v48  ;;  %1287 = vmatpush.msra.mxu1 %v10575_v10  ;;  %v1654_v48 = vsel %vm527_vm0, %v9564_v3, 0 }
  0xba   : > { %1365 = vmatpush.msrb.mxu0 %v10469_v34  ;;  %1428 = vmatpush.msrb.mxu2 %v10503_v7  ;;  %v10610_v60 = vand.u32 4294901760, %v1654_v48 }
  0xbb   : > { %1463 = vmatpush.msrb.mxu3 %v10582_v54  ;;  %1396 = vmatpush.msrb.mxu1 %v10436_v13 }
  0xbc   : > { %1248 = vmatmul.f32.vlgmr.msra.gmra.mxu0 %v12336_v29  ;;  %1430 = vmatpush.msrb.mxu2 %v10517_v25  ;;  %v10621_v59 = vsub.f32 %v1654_v48, %v10610_v60 }
  0xbd   : > { %1369 = vmatpush.msrb.mxu0 %v10483_v51  ;;  %1289 = vmatmul.f32.vlgmr.msra.gmra.mxu1 %v12336_v29 }
  0xbe   : > { %1469 = vmatpush.msrb.mxu3 %v10592_v8  ;;  %1398 = vmatpush.msrb.mxu1 %v10442_v17  ;;  %v10632_v3 = vand.u32 4294901760, %v10621_v59 }
  0xbf   : > { %1373 = vmatpush.msrb.mxu0 %v10510_v21  ;;  %1436 = vmatmul.f32.vlgmr.msrb.gmra.mxu2 %v12336_v29 }
  0xc0   : > { %1475 = vmatpush.msrb.mxu3 %v10599_v40  ;;  %1553 = vmatpush.msra.mxu2 %v10524_v24  ;;  %v1677_v48 = vsub.f32 %v10621_v59, %v10632_v3 }
  0xc1   : > { %1377 = vmatpush.msrb.mxu0 %v10527_v62  ;;  %1400 = vmatpush.msrb.mxu1 %v10461_v30 }
  0xc2   : > { %1477 = vmatmul.f32.vlgmr.msrb.gmra.mxu3 %v12336_v29  ;;  %1557 = vmatpush.msra.mxu2 %v10541_v56 }
  0xc3   : > { %1584 = vmatpush.msra.mxu3 %v10473_v36  ;;  %1402 = vmatpush.msrb.mxu1 %v10471_v35 }
  0xc4   : > { %1379 = vmatmul.f32.vlgmr.msrb.gmra.mxu0 %v12336_v29  ;;  %1561 = vmatpush.msra.mxu2 %v10557_v47 }
  0xc5   : > { %1495 = vmatpush.msra.mxu0 %v10498_v1  ;;  %1586 = vmatpush.msra.mxu3 %v10485_v55 }
  0xc6   : > { %1404 = vmatmul.f32.vlgmr.msrb.gmra.mxu1 %v12336_v29  ;;  %1565 = vmatpush.msra.mxu2 %v10569_v0 }
  0xc7   : > { %1498 = vmatpush.msra.mxu0 %v10513_v18  ;;  %1524 = vmatpush.msra.mxu1 %v10473_v36 }
  0xc8   : > { %1588 = vmatpush.msra.mxu3 %v10503_v7  ;;  %1567 = vmatmul.f32.vlgmr.msra.gmra.mxu2 %v12336_v29 }
  0xc9   : > { %1501 = vmatpush.msra.mxu0 %v10532_v33  ;;  %1526 = vmatpush.msra.mxu1 %v10485_v55 }
  0xca   : > { %1590 = vmatpush.msra.mxu3 %v10517_v25  ;;  %1730 = vmatpush.msrb.mxu2 %v10252_v14  ;;  %v1678_v14 = vand.u32 4294901760, %v1677_v48  ;;  %v12348_v48 = vld [vmem:[#allocation50_spill] sm:$0xff] }
  0xcb   : > { %1592 = vmatmul.f32.vlgmr.msra.gmra.mxu3 %v12336_v29  ;;  %1504 = vmatpush.msra.mxu0 %v10546_v58 }
  0xcc   : > { %1528 = vmatpush.msra.mxu1 %v10503_v7  ;;  %1507 = vmatmul.f32.vlgmr.msra.gmra.mxu0 %v12336_v29 }
  0xcd   : > { %1733 = vmatpush.msrb.mxu2 %v10255_v15  ;;  %1755 = vmatpush.msrb.mxu3 %v10236_v4  ;;  %v10749_v15 = vld [vmem:[%s10205_s30] ss:$0 sm:$0xff] }
  0xce   : > { %1530 = vmatpush.msra.mxu1 %v10517_v25  ;;  %1671 = vmatpush.msrb.mxu0 %v10236_v4 }
  0xcf   : > { %1534 = vmatmul.f32.vlgmr.msra.gmra.mxu1 %v12336_v29  ;;  %1757 = vmatpush.msrb.mxu3 %v10238_v5  ;;  %v12346_v29 = vld [vmem:[#allocation51_spill] sm:$0xff] }
  0xd0   : > { %1736 = vmatmul.f32.vlgmr.msrb.gmra.mxu2 %v10621_v59  ;;  %1673 = vmatpush.msrb.mxu0 %v10238_v5 }
  0xd1   : > { %1702 = vmatpush.msrb.mxu1 %v10319_v37  ;;  %1832 = vmatpush.msra.mxu2 %v10246_v11 }
  0xd2   : > { %1863 = vmatpush.msra.mxu3 %v10328_v41  ;;  %1782 = vmatpush.msra.mxu0 %v10280_v22 }
  0xd3   : > { %1761 = vmatmul.f32.vlgmr.msrb.gmra.mxu3 %v10632_v3  ;;  %1708 = vmatpush.msrb.mxu1 %v10321_v38 }
  0xd4   : > { %1679 = vmatmul.f32.vlgmr.msrb.gmra.mxu0 %v1678_v14  ;;  %1834 = vmatpush.msra.mxu2 %v10248_v12 }
  0xd5   : > { %1869 = vmatpush.msra.mxu3 %v10330_v42  ;;  %1786 = vmatpush.msra.mxu0 %v10283_v23 }
  0xd6   : > { %1807 = vmatpush.msra.mxu1 %v10236_v4  ;;  %1943 = vmatpush.msrb.mxu2 %v10291_v26 }
  0xd7   : > { %1710 = vmatmul.f32.vlgmr.msrb.gmra.mxu1 %v10610_v60  ;;  %1891 = vmatpush.msrb.mxu0 %v10271_v19 }
  0xd8   : > { %1840 = vmatmul.f32.vlgmr.msra.gmra.mxu2 %v1678_v14  ;;  %1809 = vmatpush.msra.mxu1 %v10238_v5 }
  0xd9   : > { %1947 = vmatpush.msrb.mxu2 %v10294_v27  ;;  %1968 = vmatpush.msrb.mxu3 %v10246_v11 }
  0xda   : > { %1894 = vmatpush.msrb.mxu0 %v10274_v20  ;;  %1916 = vmatpush.msrb.mxu1 %v10246_v11 }
  0xdb   : > { %1871 = vmatmul.f32.vlgmr.msra.gmra.mxu3 %v10610_v60  ;;  %2052 = vmatpush.msra.mxu2 %v10305_v31  ;;  %v10740_v31 = vld [vmem:[%s10215_s18] ss:$0 sm:$0xff] }
  0xdc   : > { %1788 = vmatmul.f32.vlgmr.msra.gmra.mxu0 %v10610_v60  ;;  %1970 = vmatpush.msrb.mxu3 %v10248_v12 }
  0xdd   : > { %1918 = vmatpush.msrb.mxu1 %v10248_v12  ;;  %1993 = vmatpush.msra.mxu0 %v10264_v16 }
  0xde   : > { %2055 = vmatpush.msra.mxu2 %v10333_v43  ;;  %2077 = vmatpush.msra.mxu3 %v10264_v16  ;;  %v10737_v43 = vld [vmem:[%s10261_s13 + $0x1] ss:$0 sm:$0xff] }
  0xdf   : > { %1811 = vmatmul.f32.vlgmr.msra.gmra.mxu1 %v10610_v60  ;;  %1995 = vmatpush.msra.mxu0 %v10296_v28  ;;  %12355 = vst [vmem:[#allocation81_spill] sm:$0xff] %v10737_v43 }
  0xe0   : > { %1949 = vmatmul.f32.vlgmr.msrb.gmra.mxu2 %v10610_v60  ;;  %2024 = vmatpush.msra.mxu1 %v10386_v57 }
  0xe1   : > { %2079 = vmatpush.msra.mxu3 %v10296_v28  ;;  %2154 = vmatpush.msrb.mxu2 %v10307_v32 }
  0xe2   : > { %2030 = vmatpush.msra.mxu1 %v10401_v61 }
  0xe3   : > { %1972 = vmatmul.f32.vlgmr.msrb.gmra.mxu3 %v10610_v60  ;;  %2156 = vmatpush.msrb.mxu2 %v10324_v39 }
  0xe4   : > { %1897 = vmatmul.f32.vlgmr.msrb.gmra.mxu0 %v10621_v59  ;;  %2187 = vmatpush.msrb.mxu3 %v10408_v63 }
  0xe5   : > { %2104 = vmatpush.msrb.mxu0 %v10338_v44  ;;  %2158 = vmatpush.msrb.mxu2 %v10343_v46 }
  0xe6   : > { %2193 = vmatpush.msrb.mxu3 %v10417_v2 }
  0xe7   : > { %1922 = vmatmul.f32.vlgmr.msrb.gmra.mxu1 %v10632_v3  ;;  %2108 = vmatpush.msrb.mxu0 %v10356_v49 }
  0xe8   : > { %2058 = vmatmul.f32.vlgmr.msra.gmra.mxu2 %v10621_v59  ;;  %2129 = vmatpush.msrb.mxu1 %v10264_v16  ;;  %v12347_v59 = vld [vmem:[#allocation46_spill] sm:$0xff] }
  0xe9   : > { %2199 = vmatpush.msrb.mxu3 %v10424_v6  ;;  %2160 = vmatpush.msrb.mxu2 %v10358_v50 }
  0xea   : > { %2131 = vmatpush.msrb.mxu1 %v10296_v28 }
  0xeb   : > { %2283 = vmatpush.msra.mxu2 %v10365_v52  ;;  %2083 = vmatmul.f32.vlgmr.msra.gmra.mxu3 %v10632_v3  ;;  %v12349_v3 = vld [vmem:[#allocation54_spill] sm:$0xff]  ;;  %v12351_v52 = vld [vmem:[#allocation56_spill] sm:$0xff] }
  0xec   : > { %2001 = vmatmul.f32.vlgmr.msra.gmra.mxu0 %v1678_v14  ;;  %2205 = vmatpush.msrb.mxu3 %v10434_v9  ;;  %v12350_v14 = vld [vmem:[#allocation52_spill] sm:$0xff] }
  0xed   : > { %2225 = vmatpush.msra.mxu0 %v10341_v45  ;;  %2287 = vmatpush.msra.mxu2 %v12346_v29 }
  0xee   : > { %2314 = vmatpush.msra.mxu3 %v10307_v32 }
  0xef   : > { %2032 = vmatmul.f32.vlgmr.msra.gmra.mxu1 %v10610_v60  ;;  %2228 = vmatpush.msra.mxu0 %v12347_v59 }
  0xf0   : > { %2254 = vmatpush.msra.mxu1 %v10307_v32  ;;  %2316 = vmatpush.msra.mxu3 %v10324_v39 }
  0xf1   : > { %2231 = vmatpush.msra.mxu0 %v12348_v48  ;;  %2291 = vmatpush.msra.mxu2 %v12349_v3  ;;  %v12352_v3 = vld [vmem:[#allocation68_spill] sm:$0xff] }
  0xf2   : > { %2256 = vmatpush.msra.mxu1 %v10324_v39  ;;  %2318 = vmatpush.msra.mxu3 %v10343_v46 }
  0xf3   : > { %2234 = vmatpush.msra.mxu0 %v12350_v14  ;;  %2295 = vmatpush.msra.mxu2 %v12351_v52  ;;  %v12353_v52 = vld [vmem:[#allocation71_spill] sm:$0xff] }
  0xf4   : > { %2110 = vmatmul.f32.vlgmr.msrb.gmra.mxu0 %v10610_v60  ;;  %2258 = vmatpush.msra.mxu1 %v10343_v46  ;;  %v521_v9 = vpop.permute.xlu0 %520 }
  0xf5   : > { %2339 = vmatpush.msrb.mxu0 %v10436_v13  ;;  %2320 = vmatpush.msra.mxu3 %v10358_v50  ;;  %v697_v61 = vmul.f32 %v10737_v43, %v521_v9 }
  0xf6   : > { %2260 = vmatpush.msra.mxu1 %v10358_v50 }
  0xf7   : > { %2133 = vmatmul.f32.vlgmr.msrb.gmra.mxu1 %v10610_v60  ;;  %2341 = vmatpush.msrb.mxu0 %v10442_v17 }
  0xf8   : > { %2372 = vmatpush.msrb.mxu1 %v12352_v3  ;;  %v10729_v3 = vld [vmem:[%s10261_s13] ss:$0 sm:$0xff] }
  0xf9   : > { %2343 = vmatpush.msrb.mxu0 %v10461_v30  ;;  %12354 = vst [vmem:[#allocation80_spill] sm:$0xff] %v10729_v3 }
  0xfa   : > { %2378 = vmatpush.msrb.mxu1 %v12353_v52 }
  0xfb   : > { %2345 = vmatpush.msrb.mxu0 %v10471_v35 }
  0xfc   : > { %2384 = vmatpush.msrb.mxu1 %v10562_v53  ;;  %v526_v53 = vmul.f32 %v10729_v3, %v521_v9 }
  0xfe   : > { %2390 = vmatpush.msrb.mxu1 %v10575_v10 }
 0x105   : > { %v586_v29 = vpop.f32.mrf.mxu1 }
 0x109   : > { %v555_v14 = vpop.f32.mrf.mxu0  ;;  %v612_v48 = vpop.f32.mrf.mxu2 }
 0x10a   : > { %v556_v10 = vadd.f32 %v555_v14, %v526_v53 }
 0x10b   : > { %v637_v59 = vpop.f32.mrf.mxu3 }
 0x10c   : > { %v587_v32 = vadd.f32 %v586_v29, %v556_v10 }
 0x10e   : > { %v687_v45 = vpop.f32.mrf.mxu1  ;;  %v613_v16 = vadd.f32 %v612_v48, %v587_v32 }
 0x110   : > { %v638_v14 = vadd.f32 %v637_v59, %v613_v16  ;;  %v10752_v59 = vld [vmem:[%s10215_s18 + $0x1] ss:$0 sm:$0xff] }
 0x111   : > { %v664_v60 = vpop.f32.mrf.mxu0  ;;  %v722_v50 = vpop.f32.mrf.mxu2 }
 0x112   : > { %v723_v29 = vadd.f32 %v722_v50, %v697_v61  ;;  %v665_v26 = vadd.f32 %v664_v60, %v638_v14  ;;  %v10761_v14 = vld [vmem:[%s10215_s18 + $0x2] ss:$0 sm:$0xff] }
 0x113   : > { %v753_v46 = vpop.f32.mrf.mxu3 }
 0x114   : > { %v754_v32 = vadd.f32 %v753_v46, %v723_v29  ;;  %v688_v11 = vadd.f32 %v687_v45, %v665_v26 }
 0x117   : > { %v804_v49 = vpop.f32.mrf.mxu1 }
 0x119   : > { %v779_v52 = vpop.f32.mrf.mxu0  ;;  %v831_v6 = vpop.f32.mrf.mxu2 }
 0x11a   : > { %v780_v0 = vadd.f32 %v779_v52, %v754_v32 }
 0x11b   : > { %v854_v44 = vpop.f32.mrf.mxu3 }
 0x11c   : > { %v805_v46 = vadd.f32 %v804_v49, %v780_v0  ;;  %v10764_v49 = vld [vmem:[%s10205_s30 + $0x1] ss:$0 sm:$0xff] }
 0x11f   : > { %v920_v39 = vpop.f32.mrf.mxu1 }
 0x121   : > { %v889_v2 = vpop.f32.mrf.mxu0  ;;  %v10732_v63 = vpop.f32.mrf.mxu2 }
 0x123   : > { %v10734_v28 = vpop.f32.mrf.mxu3 }
 0x129   : > { %v10743_v20 = vpop.f32.mrf.mxu0 }
 0x12a   : > { %v10745_v57 = vpop.f32.mrf.mxu1  ;;  %v1061_v53 = vpop.f32.mrf.mxu2 }
 0x12b   : > { %v1062_v19 = vadd.f32 %v10740_v31, %v1061_v53  ;;  %v1102_v10 = vpop.f32.mrf.mxu3  ;;  %v693_v53 = vadd.f32 %v10749_v15, %v688_v11 }
 0x12d   : > { %v1103_v27 = vadd.f32 %v1102_v10, %v1062_v19  ;;  %v10756_v19 = vld [vmem:[%s10261_s13 + $0x2] ss:$0 sm:$0xff] }
 0x131   : > { %v1132_v48 = vpop.f32.mrf.mxu0 }
 0x132   : > { %v1133_v3 = vadd.f32 %v1132_v48, %v1103_v27  ;;  %v1159_v12 = vpop.f32.mrf.mxu1  ;;  %v1192_v43 = vpop.f32.mrf.mxu2 }
 0x133   : > { %v1217_v41 = vpop.f32.mrf.mxu3 }
 0x134   : > { %v1160_v42 = vadd.f32 %v1159_v12, %v1133_v3 }
 0x136   : > { %v1193_v16 = vadd.f32 %v1192_v43, %v1160_v42  ;;  %v864_v42 = vmul.f32 %v10756_v19, %v521_v9  ;;  %v832_v43 = vadd.f32 %v831_v6, %v805_v46 }
 0x138   : > { %v1218_v50 = vadd.f32 %v1217_v41, %v1193_v16  ;;  %v855_v10 = vadd.f32 %v854_v44, %v832_v43  ;;  %v890_v0 = vadd.f32 %v889_v2, %v864_v42 }
 0x139   : > { %v1249_v27 = vpop.f32.mrf.mxu0 }
 0x13a   : > { %v1596_v61 = vadd.f32 %v1218_v50, %v693_v53  ;;  %v1250_v26 = vadd.f32 %v10752_v59, %v1249_v27  ;;  %v1290_v45 = vpop.f32.mrf.mxu1  ;;  %v1320_v60 = vpop.f32.mrf.mxu2  ;;  %v860_v27 = vadd.f32 %v10764_v49, %v855_v10  ;;  %v921_v9 = vadd.f32 %v920_v39, %v890_v0 }
 0x13b   : > { %v1347_v52 = vpop.f32.mrf.mxu3 }
 0x13c   : > { %v9562_v12 = vmul.f32 -1.442695, %v1596_v61  ;;  %v1291_v3 = vadd.f32 %v1290_v45, %v1250_v26  ;;  %v947_v44 = vadd.f32 %v10732_v63, %v921_v9 }
 0x13e   : > { %9687 = vpow2.f32 %v9562_v12  ;;  %v1321_v11 = vadd.f32 %v1320_v60, %v1291_v3 }
 0x140   : > { %v1348_v41 = vadd.f32 %v1347_v52, %v1321_v11  ;;  %v972_v52 = vadd.f32 %v10734_v28, %v947_v44 }
 0x141   : > { %v1380_v29 = vpop.f32.mrf.mxu0 }
 0x142   : > { %v1381_v32 = vadd.f32 %v1380_v29, %v1348_v41  ;;  %v1437_v48 = vpop.f32.mrf.mxu2  ;;  %v999_v29 = vadd.f32 %v10743_v20, %v972_v52 }
 0x143   : > { %v1405_v53 = vpop.f32.mrf.mxu1  ;;  %v1438_v50 = vadd.f32 %v10761_v14, %v1437_v48 }
 0x144   : > { %v9688_v16 = vpop.eup %9687  ;;  %v1406_v46 = vadd.f32 %v1405_v53, %v1381_v32  ;;  %v1022_v9 = vadd.f32 %v10745_v57, %v999_v29 }
 0x145   : > { %v1600_v6 = vadd.f32 1.0, %v9688_v16  ;;  %v1478_v61 = vpop.f32.mrf.mxu3 }
 0x146   : > { %v1616_v26 = vadd.f32 %v1406_v46, %v860_v27  ;;  %v1479_v45 = vadd.f32 %v1478_v61, %v1438_v50  ;;  %v10773_v46 = vld [vmem:[%s10205_s30 + $0x2] ss:$0 sm:$0xff] }
 0x147   : > { %9689 = vrcp.f32 %v1600_v6  ;;  %v1612_v32 = vand.u32 2147483648, %v1600_v6  ;;  %v1610_v16 = vand.u32 2147483647, %v1600_v6  ;;  %vm1606_vm2 = vweird.f32 %v1600_v6 }
 0x148   : > { %v9563_v60 = vmul.f32 -1.442695, %v1616_v26  ;;  %v1027_v44 = vadd.f32 %v10773_v46, %v1022_v9  ;;  %v12358_v9 = vld [vmem:[#allocation62_spill] sm:$0xff] }
 0x149   : > { %v1508_v2 = vpop.f32.mrf.mxu0  ;;  %v1613_v28 = vor.u32 1.1754944e-38, %v1612_v32  ;;  %vm1611_vm4 = vcmp.eq.f32.partialorder %v1610_v16, 8.507059e+37 }
 0x14a   : > { %9691 = vpow2.f32 %v9563_v60  ;;  %v1509_v12 = vadd.f32 %v1508_v2, %v1479_v45 }
 0x14b   : > { %v1568_v41 = vpop.f32.mrf.mxu2 }
 0x14c   : > { %v1535_v42 = vpop.f32.mrf.mxu1 }
 0x14d   : > { %v9690_v3 = vpop.eup %9689  ;;  %v1536_v43 = vadd.f32 %v1535_v42, %v1509_v12 }
 0x14e   : > { %v1602_v11 = vmul.f32 %v9690_v3, %v1600_v6  ;;  %vm1607_vm1 = vweird.f32 %v9690_v3  ;;  %v1593_v53 = vpop.f32.mrf.mxu3 }
 0x14f   : > { %v1569_v39 = vadd.f32 %v1568_v41, %v1536_v43  ;;  %vm1608_vm3 = vmor %vm1606_vm2, %vm1607_vm1 }
 0x150   : > { %v1603_v10 = vsub.f32 1.0, %v1602_v11  ;;  %v9692_v0 = vpop.eup %9691 }
 0x151   : > { %v1620_v48 = vadd.f32 1.0, %v9692_v0  ;;  %v1594_v50 = vadd.f32 %v1593_v53, %v1569_v39 }
 0x152   : > { %v1604_v63 = vmul.f32 %v9690_v3, %v1603_v10 }
 0x153   : > { %9693 = vrcp.f32 %v1620_v48  ;;  %v1632_v52 = vand.u32 2147483648, %v1620_v48  ;;  %v1630_v6 = vand.u32 2147483647, %v1620_v48  ;;  %vm1626_vm6 = vweird.f32 %v1620_v48 }
 0x154   : > { %v1605_v27 = vadd.f32 %v9690_v3, %v1604_v63 }
 0x155   : > { %v1633_v57 = vor.u32 1.1754944e-38, %v1632_v52  ;;  %vm1631_vm8 = vcmp.eq.f32.partialorder %v1630_v6, 8.507059e+37  ;;  %v12367_v52 = vld [vmem:[#allocation24_spill] sm:$0xff]  ;;  %v1711_v6 = vpop.f32.mrf.mxu1 }
 0x156   : > { %v1609_v61 = vsel %vm1608_vm3, %v9690_v3, %v1605_v27  ;;  %v12356_v27 = vld [vmem:[#allocation61_spill] sm:$0xff] }
 0x157   : > { %v1614_v26 = vsel %vm1611_vm4, %v1613_v28, %v1609_v61  ;;  %v12357_v28 = vld [vmem:[#allocation77_spill] sm:$0xff]  ;;  %v12359_v61 = vld [vmem:[#allocation63_spill] sm:$0xff] }
 0x158   : > { %v1636_v20 = vmul.f32 %v1614_v26, %v1594_v50  ;;  %v12360_v26 = vld [vmem:[#allocation65_spill] sm:$0xff] }
 0x159   : > { %v9694_v45 = vpop.eup %9693 }
 0x15a   : > { %v1622_v60 = vmul.f32 %v9694_v45, %v1620_v48  ;;  %v1637_v2 = vadd.f32 %v1636_v20, %v1027_v44  ;;  %vm1627_vm5 = vweird.f32 %v9694_v45  ;;  %v12361_v20 = vld [vmem:[#allocation76_spill] sm:$0xff]  ;;  %v12363_v44 = vld [vmem:[#allocation25_spill] sm:$0xff] }
 0x15b   : > { %vm1628_vm7 = vmor %vm1626_vm6, %vm1627_vm5 }
 0x15c   : > { %v1623_v12 = vsub.f32 1.0, %v1622_v60  ;;  %9695 = vtanh.f32 %v1637_v2  ;;  %v12364_v60 = vld [vmem:[#allocation41_spill] sm:$0xff]  ;;  %v12365_v2 = vld [vmem:[#allocation26_spill] sm:$0xff] }
 0x15e   : > { %v1624_v42 = vmul.f32 %v9694_v45, %v1623_v12  ;;  %v12366_v12 = vld [vmem:[#allocation23_spill] sm:$0xff] }
 0x160   : > { %v1625_v43 = vadd.f32 %v9694_v45, %v1624_v42  ;;  %v1680_v42 = vpop.f32.mrf.mxu0 }
 0x162   : > { %v1629_v11 = vsel %vm1628_vm7, %v9694_v45, %v1625_v43  ;;  %v9696_v39 = vpop.eup %9695  ;;  %v12362_v45 = vld [vmem:[#allocation40_spill] sm:$0xff]  ;;  %v1762_v43 = vpop.f32.mrf.mxu3 }
 0x163   : > { %v1634_v3 = vsel %vm1631_vm8, %v1633_v57, %v1629_v11  ;;  %v1737_v11 = vpop.f32.mrf.mxu2 }
 0x164   : > { %v1639_v41 = vsub.f32 1.0, %v1634_v3  ;;  %v1641_v0 = vmul.f32 0.0, %v1634_v3  ;;  %v10848_v3 = vpop.f32.mrf.mxu1 }
 0x166   : > { %v1640_v10 = vmul.f32 %v9696_v39, %v1639_v41 }
 0x168   : > { %v10776_v29 = vadd.f32 %v1641_v0, %v1640_v10  ;;  %v1789_v57 = vpop.f32.mrf.mxu0 }
 0x16a   : > { %v2139_v32 = vsel %vm1031_vm9, %v10776_v29, 0  ;;  %v1872_v41 = vpop.f32.mrf.mxu3 }
 0x16b   : > { %v10780_v63 = vand.u32 4294901760, %v2139_v32  ;;  %v1841_v10 = vpop.f32.mrf.mxu2 }
 0x16c   : > { %v10852_v0 = vpop.f32.mrf.mxu1 }
 0x16d   : > { %2207 = vmatmul.f32.vlgmr.msrb.gmra.mxu3 %v10780_v63  ;;  %v2162_v48 = vsub.f32 %v2139_v32, %v10780_v63 }
 0x16e   : > { %2439 = vmatpush.msrb.mxu3 %v10436_v13 }
 0x16f   : > { %2237 = vmatmul.f32.vlgmr.msra.gmra.mxu0 %v2162_v48  ;;  %v2163_v16 = vand.u32 4294901760, %v2162_v48 }
 0x170   : > { %2441 = vmatpush.msrb.mxu3 %v10442_v17  ;;  %2468 = vmatpush.msra.mxu0 %v10469_v34  ;;  %v10850_v39 = vpop.f32.mrf.mxu0 }
 0x171   : > { %2264 = vmatmul.f32.vlgmr.msra.gmra.mxu1 %v2163_v16  ;;  %v2164_v53 = vsub.f32 %v2162_v48, %v2163_v16 }
 0x172   : > { %2443 = vmatpush.msrb.mxu3 %v10461_v30  ;;  %2472 = vmatpush.msra.mxu0 %v10483_v51  ;;  %v10854_v32 = vpop.f32.mrf.mxu3 }
 0x173   : > { %v2165_v50 = vand.u32 4294901760, %v2164_v53  ;;  %2499 = vmatpush.msra.mxu1 %v10436_v13  ;;  %v9568_v53 = vld [vmem:[%s10226_s7 + $0xa] sm:$0x3] }
 0x174   : > { %2445 = vmatpush.msrb.mxu3 %v10471_v35  ;;  %2476 = vmatpush.msra.mxu0 %v10510_v21 }
 0x175   : > { %2166 = vmatmul.f32.vlgmr.msrb.gmra.mxu2 %v2165_v50  ;;  %2322 = vmatmul.f32.vlgmr.msra.gmra.mxu3 %v10780_v63 }
 0x176   : > { %2501 = vmatpush.msra.mxu1 %v10442_v17  ;;  %2410 = vmatpush.msrb.mxu2 %v12356_v27 }
 0x177   : > { %2351 = vmatmul.f32.vlgmr.msrb.gmra.mxu0 %v2165_v50  ;;  %2557 = vmatpush.msra.mxu3 %v12357_v28 }
 0x178   : > { %2480 = vmatpush.msra.mxu0 %v10527_v62  ;;  %2503 = vmatpush.msra.mxu1 %v10461_v30 }
 0x179   : > { %2392 = vmatmul.f32.vlgmr.msrb.gmra.mxu1 %v10780_v63  ;;  %2413 = vmatpush.msrb.mxu2 %v12358_v9 }
 0x17a   : > { %2505 = vmatpush.msra.mxu1 %v10471_v35  ;;  %2563 = vmatpush.msra.mxu3 %v10582_v54 }
 0x17b   : > { %2595 = vmatpush.msrb.mxu0 %v10498_v1  ;;  %2416 = vmatpush.msrb.mxu2 %v12359_v61 }
 0x17c   : > { %2569 = vmatpush.msra.mxu3 %v10592_v8  ;;  %2624 = vmatpush.msrb.mxu1 %v10473_v36 }
 0x17d   : > { %2297 = vmatmul.f32.vlgmr.msra.gmra.mxu2 %v10780_v63  ;;  %2449 = vmatmul.f32.vlgmr.msrb.gmra.mxu3 %v2163_v16 }
 0x17e   : > { %2598 = vmatpush.msrb.mxu0 %v10513_v18  ;;  %2419 = vmatpush.msrb.mxu2 %v12360_v26 }
 0x17f   : > { %2482 = vmatmul.f32.vlgmr.msra.gmra.mxu0 %v10780_v63  ;;  %2575 = vmatpush.msra.mxu3 %v10599_v40 }
 0x180   : > { %2601 = vmatpush.msrb.mxu0 %v10532_v33  ;;  %2626 = vmatpush.msrb.mxu1 %v10485_v55 }
 0x181   : > { %2507 = vmatmul.f32.vlgmr.msra.gmra.mxu1 %v10780_v63  ;;  %2524 = vmatpush.msra.mxu2 %v10473_v36 }
 0x182   : > { %2604 = vmatpush.msrb.mxu0 %v10546_v58  ;;  %2628 = vmatpush.msrb.mxu1 %v10503_v7 }
 0x183   : > { %2684 = vmatpush.msrb.mxu3 %v10473_v36  ;;  %2526 = vmatpush.msra.mxu2 %v10485_v55 }
 0x184   : > { %2630 = vmatpush.msrb.mxu1 %v10517_v25  ;;  %2771 = vmatpush.msra.mxu0 %v10236_v4 }
 0x185   : > { %2422 = vmatmul.f32.vlgmr.msrb.gmra.mxu2 %v2162_v48  ;;  %2577 = vmatmul.f32.vlgmr.msra.gmra.mxu3 %v10780_v63 }
 0x186   : > { %2686 = vmatpush.msrb.mxu3 %v10485_v55  ;;  %2528 = vmatpush.msra.mxu2 %v10503_v7 }
 0x187   : > { %2607 = vmatmul.f32.vlgmr.msrb.gmra.mxu0 %v2162_v48  ;;  %2802 = vmatpush.msra.mxu1 %v10319_v37  ;;  %v10858_v48 = vpop.f32.mrf.mxu2  ;;  %v12376_v37 = vld [vmem:[#allocation35_spill] sm:$0xff] }
 0x188   : > { %2688 = vmatpush.msrb.mxu3 %v10503_v7  ;;  %2530 = vmatpush.msra.mxu2 %v10517_v25  ;;  %v12378_v7 = vld [vmem:[#allocation42_spill] sm:$0xff] }
 0x189   : > { %2634 = vmatmul.f32.vlgmr.msrb.gmra.mxu1 %v2163_v16  ;;  %2773 = vmatpush.msra.mxu0 %v10238_v5  ;;  %v10860_v16 = vpop.permute.xlu0 %1649 }
 0x18a   : > { %2653 = vmatpush.msrb.mxu2 %v10524_v24  ;;  %2690 = vmatpush.msrb.mxu3 %v10517_v25  ;;  %v12372_v24 = vld [vmem:[#allocation53_spill] sm:$0xff]  ;;  %v12377_v25 = vld [vmem:[#allocation27_spill] sm:$0xff] }
 0x18b   : > { %2808 = vmatpush.msra.mxu1 %v10321_v38  ;;  %2882 = vmatpush.msrb.mxu0 %v10280_v22 }
 0x18c   : > { %2657 = vmatpush.msrb.mxu2 %v10541_v56  ;;  %2855 = vmatpush.msra.mxu3 %v10236_v4 }
 0x18d   : > { %2536 = vmatmul.f32.vlgmr.msra.gmra.mxu2 %v2165_v50  ;;  %2692 = vmatmul.f32.vlgmr.msrb.gmra.mxu3 %v10780_v63  ;;  %v12368_v50 = vld [vmem:[#allocation80_spill] sm:$0xff] }
 0x18e   : > { %2661 = vmatpush.msrb.mxu2 %v10557_v47  ;;  %2857 = vmatpush.msra.mxu3 %v10238_v5  ;;  %v10874_v47 = vpop.f32.mrf.mxu3 }
 0x18f   : > { %2886 = vmatpush.msrb.mxu0 %v10283_v23  ;;  %2907 = vmatpush.msrb.mxu1 %v10236_v4 }
 0x190   : > { %2665 = vmatpush.msrb.mxu2 %v12361_v20  ;;  %2963 = vmatpush.msrb.mxu3 %v12362_v45  ;;  %v10865_v45 = vpop.f32.mrf.mxu1 }
 0x191   : > { %2909 = vmatpush.msrb.mxu1 %v10238_v5  ;;  %v12371_v5 = vld [vmem:[#allocation28_spill] sm:$0xff] }
 0x192   : > { %2830 = vmatpush.msra.mxu2 %v12363_v44  ;;  %2969 = vmatpush.msrb.mxu3 %v12364_v60  ;;  %v1652_v60 = vmul.f32 %v12368_v50, %v10860_v16 }
 0x194   : > { %2833 = vmatpush.msra.mxu2 %v12365_v2  ;;  %v2754_v2 = vsel %vm527_vm0, %v9568_v53, 0  ;;  %v1681_v20 = vadd.f32 %v1680_v42, %v1652_v60  ;;  %v12369_v60 = vld [vmem:[#allocation32_spill] sm:$0xff]  ;;  %v10888_v42 = vpop.f32.mrf.mxu2  ;;  %v12370_v53 = vld [vmem:[#allocation33_spill] sm:$0xff] }
 0x195   : > { %2667 = vmatmul.f32.vlgmr.msrb.gmra.mxu2 %v10780_v63  ;;  %v10856_v63 = vpop.f32.mrf.mxu0  ;;  %v10868_v44 = vand.u32 4294901760, %v2754_v2 }
 0x196   : > { %2932 = vmatpush.msrb.mxu2 %v12366_v12  ;;  %v1712_v50 = vadd.f32 %v1711_v6, %v1681_v20 }
 0x197   : > { %v10871_v23 = vsub.f32 %v2754_v2, %v10868_v44  ;;  %2810 = vmatmul.f32.vlgmr.msra.gmra.mxu1 %v10868_v44 }
 0x198   : > { %2934 = vmatpush.msrb.mxu2 %v12367_v52  ;;  %3016 = vmatpush.msra.mxu1 %v12366_v12  ;;  %v1738_v20 = vadd.f32 %v1737_v11, %v1712_v50  ;;  %v10894_v6 = vpop.f32.mrf.mxu1  ;;  %v12374_v11 = vld [vmem:[#allocation55_spill] sm:$0xff]  ;;  %v12375_v50 = vld [vmem:[#allocation81_spill] sm:$0xff] }
 0x199   : > { %v10878_v22 = vand.u32 4294901760, %v10871_v23 }
 0x19a   : > { %3018 = vmatpush.msra.mxu1 %v12367_v52 }
 0x19b   : > { %v2777_v2 = vsub.f32 %v10871_v23, %v10878_v22  ;;  %2861 = vmatmul.f32.vlgmr.msra.gmra.mxu3 %v10878_v22 }
 0x19c   : > { %3068 = vmatpush.msra.mxu3 %v12366_v12  ;;  %v1763_v12 = vadd.f32 %v1762_v43, %v1738_v20 }
 0x19d   : > { %2836 = vmatmul.f32.vlgmr.msra.gmra.mxu2 %v10871_v23  ;;  %v10881_v38 = vpop.f32.mrf.mxu0  ;;  %v10892_v56 = vand.u32 4294901760, %v2777_v2  ;;  %v12373_v2 = vld [vmem:[#allocation29_spill] sm:$0xff] }
 0x19e   : > { %3043 = vmatpush.msra.mxu2 %v12369_v60  ;;  %3070 = vmatpush.msra.mxu3 %v12367_v52  ;;  %v1816_v52 = vmul.f32 %v12375_v50, %v10860_v16  ;;  %v1790_v43 = vadd.f32 %v1789_v57, %v1763_v12 }
 0x19f   : > { %2779 = vmatmul.f32.vlgmr.msra.gmra.mxu0 %v10892_v56  ;;  %2911 = vmatmul.f32.vlgmr.msrb.gmra.mxu1 %v10868_v44 }
 0x1a0   : > { %3047 = vmatpush.msra.mxu2 %v12370_v53  ;;  %2991 = vmatpush.msra.mxu0 %v12371_v5  ;;  %v1842_v5 = vadd.f32 %v1841_v10, %v1816_v52  ;;  %v12380_v52 = vld [vmem:[#allocation36_spill] sm:$0xff] }
 0x1a1   : > { %3124 = vmatpush.msrb.mxu1 %v12372_v24 }
 0x1a2   : > { %2994 = vmatpush.msra.mxu0 %v12373_v2  ;;  %v12379_v2 = vld [vmem:[#allocation34_spill] sm:$0xff]  ;;  %v1873_v50 = vadd.f32 %v1872_v41, %v1842_v5  ;;  %v12381_v5 = vld [vmem:[#allocation57_spill] sm:$0xff] }
 0x1a3   : > { %3130 = vmatpush.msrb.mxu1 %v12374_v11  ;;  %2971 = vmatmul.f32.vlgmr.msrb.gmra.mxu3 %v10868_v44 }
 0x1a4   : > { %3177 = vmatpush.msrb.mxu3 %v12377_v25 }
 0x1a5   : > { %2940 = vmatmul.f32.vlgmr.msrb.gmra.mxu2 %v10892_v56 }
 0x1a6   : > { %3152 = vmatpush.msrb.mxu2 %v12376_v37  ;;  %3179 = vmatpush.msrb.mxu3 %v12379_v2 }
 0x1a7   : > { %2888 = vmatmul.f32.vlgmr.msrb.gmra.mxu0 %v10868_v44  ;;  %3022 = vmatmul.f32.vlgmr.msra.gmra.mxu1 %v10878_v22 }
 0x1a8   : > { %3155 = vmatpush.msrb.mxu2 %v12378_v7  ;;  %3093 = vmatpush.msrb.mxu0 %v12377_v25 }
 0x1a9   : > { %3229 = vmatpush.msra.mxu1 %v12377_v25 }
 0x1aa   : > { %3095 = vmatpush.msrb.mxu0 %v12379_v2 }
 0x1ab   : > { %3231 = vmatpush.msra.mxu1 %v12379_v2  ;;  %3072 = vmatmul.f32.vlgmr.msra.gmra.mxu3 %v10868_v44 }
 0x1ac   : > { %3287 = vmatpush.msra.mxu3 %v12381_v5 }
 0x1ad   : > { %3049 = vmatmul.f32.vlgmr.msra.gmra.mxu2 %v10868_v44 }
 0x1ae   : > { %3254 = vmatpush.msra.mxu2 %v12380_v52 }
 0x1af   : > { %2997 = vmatmul.f32.vlgmr.msra.gmra.mxu0 %v10871_v23  ;;  %3132 = vmatmul.f32.vlgmr.msrb.gmra.mxu1 %v10868_v44 }
 0x1b0   : > { %3354 = vmatpush.msrb.mxu1 %v12380_v52 }
 0x1b3   : > { %3183 = vmatmul.f32.vlgmr.msrb.gmra.mxu3 %v10878_v22  ;;  %v12389_v22 = vld [vmem:[#allocation48_spill] sm:$0xff] }
 0x1b5   : > { %3158 = vmatmul.f32.vlgmr.msrb.gmra.mxu2 %v10871_v23 }
 0x1b7   : > { %3101 = vmatmul.f32.vlgmr.msrb.gmra.mxu0 %v10892_v56  ;;  %3233 = vmatmul.f32.vlgmr.msra.gmra.mxu1 %v10868_v44 }
 0x1ec   : > { %v2238_v53 = vpop.f32.mrf.mxu0 }
 0x1ee   : > { %v2265_v20 = vpop.f32.mrf.mxu1 }
 0x1f0   : > { %v2208_v60 = vpop.f32.mrf.mxu3 }
 0x1f4   : > { %v2352_v57 = vpop.f32.mrf.mxu0 }
 0x1f8   : > { %v2167_v4 = vpop.f32.mrf.mxu2 }
 0x1f9   : > { %v2168_v24 = vadd.f32 %v10740_v31, %v2167_v4  ;;  %v1813_v4 = vadd.f32 %v10848_v3, %v1790_v43  ;;  %v2323_v31 = vpop.f32.mrf.mxu3  ;;  %v2393_v43 = vpop.f32.mrf.mxu1 }
 0x1fb   : > { %v2209_v11 = vadd.f32 %v2208_v60, %v2168_v24  ;;  %v1899_v24 = vadd.f32 %v10850_v39, %v1873_v50  ;;  %v12382_v60 = vld [vmem:[#allocation39_spill] sm:$0xff]  ;;  %v1815_v3 = vadd.f32 %v10749_v15, %v1813_v4  ;;  %v2353_v39 = vadd.f32 %v10752_v59, %v2352_v57 }
 0x1fc   : > { %3256 = vmatpush.msra.mxu2 %v12382_v60  ;;  %v12385_v50 = vld [vmem:[#allocation59_spill] sm:$0xff]  ;;  %3356 = vmatpush.msrb.mxu1 %v12382_v60 }
 0x1fd   : > { %v2239_v37 = vadd.f32 %v2238_v53, %v2209_v11  ;;  %v12383_v53 = vld [vmem:[#allocation58_spill] sm:$0xff]  ;;  %v1924_v11 = vadd.f32 %v10852_v0, %v1899_v24  ;;  %v12386_v15 = vld [vmem:[#allocation47_spill] sm:$0xff]  ;;  %v12387_v0 = vld [vmem:[#allocation60_spill] sm:$0xff]  ;;  %v2394_v4 = vadd.f32 %v2393_v43, %v2353_v39 }
 0x1fe   : > { %3293 = vmatpush.msra.mxu3 %v12383_v53  ;;  %v9569_v39 = vld [vmem:[%s10231_s8 + $0xa] sm:$0x3] }
 0x1ff   : > { %v2266_v12 = vadd.f32 %v2265_v20, %v2239_v37  ;;  %v12384_v20 = vld [vmem:[#allocation43_spill] sm:$0xff]  ;;  %v1951_v59 = vadd.f32 %v10858_v48, %v1924_v11  ;;  %v1977_v48 = vmul.f32 %v10756_v19, %v10860_v16  ;;  %2749 = vperm.xlu1 %9676, %v9569_v39   ;;  %v12390_v43 = vld [vmem:[#allocation44_spill] sm:$0xff]  ;;  %v12391_v16 = vld [vmem:[#allocation46_spill] sm:$0xff] }
 0x200   : > { %v2298_v10 = vpop.f32.mrf.mxu2  ;;  %3204 = vmatpush.msra.mxu0 %v12384_v20  ;;  %3299 = vmatpush.msra.mxu3 %v12385_v50  ;;  %v12396_v39 = vld [vmem:[#allocation51_spill] sm:$0xff] }
 0x201   : > { %v2299_v41 = vadd.f32 %v2298_v10, %v2266_v12  ;;  %v2450_v24 = vpop.f32.mrf.mxu3  ;;  %v12388_v10 = vld [vmem:[#allocation45_spill] sm:$0xff]  ;;  %v2508_v19 = vpop.f32.mrf.mxu1 }
 0x202   : > { %3208 = vmatpush.msra.mxu0 %v12386_v15  ;;  %3305 = vmatpush.msra.mxu3 %v12387_v0 }
 0x203   : > { %v2324_v37 = vadd.f32 %v2323_v31, %v2299_v41  ;;  %3258 = vmatpush.msra.mxu2 %v12388_v10  ;;  %3358 = vmatpush.msrb.mxu1 %v12388_v10  ;;  %v2483_v41 = vpop.f32.mrf.mxu0 }
 0x204   : > { %3414 = vmatpush.msrb.mxu3 %v12380_v52  ;;  %3325 = vmatpush.msrb.mxu0 %v12390_v43 }
 0x205   : > { %v2696_v12 = vadd.f32 %v2324_v37, %v1815_v3  ;;  %3260 = vmatpush.msra.mxu2 %v12389_v22  ;;  %v1974_v3 = vadd.f32 %v10854_v32, %v1951_v59  ;;  %v2003_v37 = vadd.f32 %v10856_v63, %v1977_v48  ;;  %3360 = vmatpush.msrb.mxu1 %v12389_v22  ;;  %v12392_v32 = vld [vmem:[#allocation68_spill] sm:$0xff]  ;;  %v12393_v63 = vld [vmem:[#allocation49_spill] sm:$0xff]  ;;  %v12395_v48 = vld [vmem:[#allocation71_spill] sm:$0xff] }
 0x206   : > { %3416 = vmatpush.msrb.mxu3 %v12382_v60  ;;  %3328 = vmatpush.msrb.mxu0 %v12391_v16 }
 0x207   : > { %v9566_v31 = vmul.f32 -1.442695, %v2696_v12  ;;  %3472 = vmatpush.msra.mxu1 %v12392_v32  ;;  %v1976_v56 = vadd.f32 %v10764_v49, %v1974_v3  ;;  %3383 = vmatpush.msrb.mxu2 %v12393_v63  ;;  %v12397_v3 = vld [vmem:[#allocation52_spill] sm:$0xff] }
 0x208   : > { %v2423_v57 = vpop.f32.mrf.mxu2  ;;  %3418 = vmatpush.msrb.mxu3 %v12388_v10  ;;  %3210 = vmatmul.f32.vlgmr.msra.gmra.mxu0 %v10868_v44 }
 0x209   : > { %9697 = vpow2.f32 %v9566_v31  ;;  %v2424_v23 = vadd.f32 %v2423_v57, %v2394_v4  ;;  %v2034_v31 = vadd.f32 %v10865_v45, %v2003_v37  ;;  %3478 = vmatpush.msra.mxu1 %v12395_v48  ;;  %3387 = vmatpush.msrb.mxu2 %v12396_v39  ;;  %v2578_v49 = vpop.f32.mrf.mxu3  ;;  %v12399_v45 = vld [vmem:[#allocation54_spill] sm:$0xff] }
 0x20a   : > { %3420 = vmatpush.msrb.mxu3 %v12389_v22 }
 0x20b   : > { %v2451_v11 = vadd.f32 %v2450_v24, %v2424_v23  ;;  %v12394_v23 = vld [vmem:[#allocation50_spill] sm:$0xff]  ;;  %3391 = vmatpush.msrb.mxu2 %v12399_v45  ;;  %v2060_v37 = vadd.f32 %v10888_v42, %v2034_v31 }
 0x20c   : > { %3331 = vmatpush.msrb.mxu0 %v12394_v23 }
 0x20d   : > { %v2484_v12 = vadd.f32 %v2483_v41, %v2451_v11 }
 0x20e   : > { %3334 = vmatpush.msrb.mxu0 %v12397_v3 }
 0x20f   : > { %v9698_v59 = vpop.eup %9697  ;;  %v2509_v4 = vadd.f32 %v2508_v19, %v2484_v12  ;;  %v12398_v12 = vld [vmem:[#allocation75_spill] sm:$0xff] }
 0x210   : > { %v2700_v24 = vadd.f32 1.0, %v9698_v59  ;;  %v2537_v57 = vpop.f32.mrf.mxu2  ;;  %3484 = vmatpush.msra.mxu1 %v12398_v12  ;;  %v2608_v59 = vpop.f32.mrf.mxu0  ;;  %3439 = vmatpush.msra.mxu0 %v10436_v13 }
 0x211   : > { %v2716_v41 = vadd.f32 %v2509_v4, %v1976_v56  ;;  %v2538_v11 = vadd.f32 %v10761_v14, %v2537_v57  ;;  %v12400_v14 = vld [vmem:[#allocation78_spill] sm:$0xff]  ;;  %v12401_v4 = vld [vmem:[#allocation56_spill] sm:$0xff] }
 0x212   : > { %9699 = vrcp.f32 %v2700_v24  ;;  %3490 = vmatpush.msra.mxu1 %v12400_v14  ;;  %3395 = vmatpush.msrb.mxu2 %v12401_v4  ;;  %v2710_v39 = vand.u32 2147483647, %v2700_v24  ;;  %vm2706_vm11 = vweird.f32 %v2700_v24 }
 0x213   : > { %v9567_v19 = vmul.f32 -1.442695, %v2716_v41  ;;  %v2579_v63 = vadd.f32 %v2578_v49, %v2538_v11  ;;  %3441 = vmatpush.msra.mxu0 %v10442_v17  ;;  %v2085_v41 = vadd.f32 %v10874_v47, %v2060_v37  ;;  %v2635_v11 = vpop.f32.mrf.mxu1 }
 0x214   : > { %vm2711_vm13 = vcmp.eq.f32.partialorder %v2710_v39, 8.507059e+37 }
 0x215   : > { %9701 = vpow2.f32 %v9567_v19  ;;  %v2609_v56 = vadd.f32 %v2608_v59, %v2579_v63  ;;  %3443 = vmatpush.msra.mxu0 %v10461_v30  ;;  %v2112_v19 = vadd.f32 %v10881_v38, %v2085_v41  ;;  %v2712_v59 = vand.u32 2147483648, %v2700_v24 }
 0x217   : > { %v2636_v44 = vadd.f32 %v2635_v11, %v2609_v56  ;;  %3445 = vmatpush.msra.mxu0 %v10471_v35  ;;  %v2135_v37 = vadd.f32 %v10894_v6, %v2112_v19  ;;  %v2693_v56 = vpop.f32.mrf.mxu3  ;;  %v2713_v11 = vor.u32 1.1754944e-38, %v2712_v59 }
 0x218   : > { %v9700_v57 = vpop.eup %9699  ;;  %v2668_v42 = vpop.f32.mrf.mxu2 }
 0x219   : > { %v2702_v49 = vmul.f32 %v9700_v57, %v2700_v24  ;;  %v2669_v4 = vadd.f32 %v2668_v42, %v2636_v44  ;;  %vm2707_vm10 = vweird.f32 %v9700_v57  ;;  %v9573_v44 = vld [vmem:[%s10231_s8 + $0x8] sm:$0x3] }
 0x21a   : > { %vm2708_vm12 = vmor %vm2706_vm11, %vm2707_vm10  ;;  %3849 = vperm.xlu1 %9676, %v9573_v44  }
 0x21b   : > { %v9702_v31 = vpop.eup %9701  ;;  %v2703_v45 = vsub.f32 1.0, %v2702_v49  ;;  %v2694_v12 = vadd.f32 %v2693_v56, %v2669_v4 }
 0x21c   : > { %v2720_v63 = vadd.f32 1.0, %v9702_v31 }
 0x21d   : > { %v2704_v14 = vmul.f32 %v9700_v57, %v2703_v45  ;;  %v2137_v45 = vadd.f32 %v10773_v46, %v2135_v37 }
 0x21e   : > { %9703 = vrcp.f32 %v2720_v63  ;;  %v2732_v24 = vand.u32 2147483648, %v2720_v63  ;;  %v2730_v6 = vand.u32 2147483647, %v2720_v63  ;;  %vm2726_vm15 = vweird.f32 %v2720_v63 }
 0x21f   : > { %v2705_v47 = vadd.f32 %v9700_v57, %v2704_v14 }
 0x220   : > { %v2733_v39 = vor.u32 1.1754944e-38, %v2732_v24  ;;  %vm2731_vm2 = vcmp.eq.f32.partialorder %v2730_v6, 8.507059e+37  ;;  %v12404_v24 = vld [vmem:[#allocation21_spill] sm:$0xff] }
 0x221   : > { %v2709_v48 = vsel %vm2708_vm12, %v9700_v57, %v2705_v47  ;;  %v12405_v6 = vld [vmem:[#allocation37_spill] sm:$0xff] }
 0x222   : > { %v2714_v49 = vsel %vm2711_vm13, %v2713_v11, %v2709_v48  ;;  %v8244_v48 = vld [vmem:[%s10231_s8] sm:$0x3] }
 0x223   : > { %v2736_v38 = vmul.f32 %v2714_v49, %v2694_v12  ;;  %8247 = vperm.xlu1 %9676, %v8244_v48   ;;  %v12407_v48 = vld [vmem:[#allocation22_spill] sm:$0xff] }
 0x224   : > { %v9704_v41 = vpop.eup %9703 }
 0x225   : > { %v2722_v42 = vmul.f32 %v9704_v41, %v2720_v63  ;;  %v2737_v31 = vadd.f32 %v2736_v38, %v2137_v45  ;;  %vm2727_vm14 = vweird.f32 %v9704_v41  ;;  %v9572_v38 = vld [vmem:[%s10226_s7 + $0x8] sm:$0x3] }
 0x226   : > { %vm2728_vm1 = vmor %vm2726_vm15, %vm2727_vm14 }
 0x227   : > { %v2723_v14 = vsub.f32 1.0, %v2722_v42  ;;  %9705 = vtanh.f32 %v2737_v31  ;;  %v12402_v42 = vld [vmem:[#allocation66_spill] sm:$0xff] }
 0x229   : > { %v2724_v32 = vmul.f32 %v9704_v41, %v2723_v14  ;;  %v12403_v14 = vld [vmem:[#allocation67_spill] sm:$0xff] }
 0x22b   : > { %v2725_v19 = vadd.f32 %v9704_v41, %v2724_v32 }
 0x22d   : > { %v2729_v12 = vsel %vm2728_vm1, %v9704_v41, %v2725_v19  ;;  %v9706_v57 = vpop.eup %9705  ;;  %v3854_v41 = vsel %vm527_vm0, %v9572_v38, 0  ;;  %v12418_v38 = vld [vmem:[#allocation29_spill] sm:$0xff] }
 0x22e   : > { %v2734_v4 = vsel %vm2731_vm2, %v2733_v39, %v2729_v12  ;;  %v11013_v45 = vand.u32 4294901760, %v3854_v41  ;;  %v12406_v39 = vld [vmem:[#allocation69_spill] sm:$0xff] }
 0x22f   : > { %v2739_v46 = vsub.f32 1.0, %v2734_v4  ;;  %v2741_v47 = vmul.f32 %v2734_v4, %v10776_v29  ;;  %v12408_v4 = vld [vmem:[#allocation72_spill] sm:$0xff] }
 0x230   : > { %v11023_v44 = vsub.f32 %v3854_v41, %v11013_v45  ;;  %v12419_v41 = vld [vmem:[#allocation40_spill] sm:$0xff] }
 0x231   : > { %v2740_v59 = vmul.f32 %v9706_v57, %v2739_v46  ;;  %v12409_v46 = vld [vmem:[#allocation38_spill] sm:$0xff] }
 0x232   : > { %v11034_v31 = vand.u32 4294901760, %v11023_v44  ;;  %v12410_v57 = vld [vmem:[#allocation30_spill] sm:$0xff] }
 0x233   : > { %v10983_v37 = vadd.f32 %v2741_v47, %v2740_v59  ;;  %v12411_v59 = vld [vmem:[#allocation74_spill] sm:$0xff]  ;;  %v12412_v47 = vld [vmem:[#allocation31_spill] sm:$0xff] }
 0x234   : > { %v3877_v19 = vsub.f32 %v11023_v44, %v11034_v31 }
 0x235   : > { %v3239_v56 = vsel %vm1031_vm9, %v10983_v37, 0 }
 0x236   : > { %v10987_v11 = vand.u32 4294901760, %v3239_v56  ;;  %v3878_v12 = vand.u32 4294901760, %v3877_v19  ;;  %v12420_v19 = vld [vmem:[#allocation24_spill] sm:$0xff] }
 0x238   : > { %3307 = vmatmul.f32.vlgmr.msra.gmra.mxu3 %v10987_v11  ;;  %v3262_v32 = vsub.f32 %v3239_v56, %v10987_v11  ;;  %v12413_v56 = vld [vmem:[#allocation76_spill] sm:$0xff] }
 0x239   : > { %3539 = vmatpush.msra.mxu3 %v10436_v13 }
 0x23a   : > { %3337 = vmatmul.f32.vlgmr.msrb.gmra.mxu0 %v3262_v32  ;;  %v3263_v63 = vand.u32 4294901760, %v3262_v32 }
 0x23b   : > { %3541 = vmatpush.msra.mxu3 %v10442_v17  ;;  %3568 = vmatpush.msrb.mxu0 %v10469_v34 }
 0x23c   : > { %3364 = vmatmul.f32.vlgmr.msrb.gmra.mxu1 %v3263_v63  ;;  %v3264_v29 = vsub.f32 %v3262_v32, %v3263_v63 }
 0x23d   : > { %3543 = vmatpush.msra.mxu3 %v10461_v30  ;;  %3572 = vmatpush.msrb.mxu0 %v10483_v51 }
 0x23e   : > { %v3265_v49 = vand.u32 4294901760, %v3264_v29  ;;  %3599 = vmatpush.msrb.mxu1 %v10436_v13  ;;  %v12416_v29 = vld [vmem:[#allocation26_spill] sm:$0xff] }
 0x23f   : > { %3545 = vmatpush.msra.mxu3 %v10471_v35  ;;  %3576 = vmatpush.msrb.mxu0 %v10510_v21 }
 0x240   : > { %3266 = vmatmul.f32.vlgmr.msra.gmra.mxu2 %v3265_v49  ;;  %3422 = vmatmul.f32.vlgmr.msrb.gmra.mxu3 %v10987_v11 }
 0x241   : > { %3601 = vmatpush.msrb.mxu1 %v10442_v17  ;;  %3510 = vmatpush.msra.mxu2 %v12356_v27 }
 0x242   : > { %3451 = vmatmul.f32.vlgmr.msra.gmra.mxu0 %v3265_v49  ;;  %3657 = vmatpush.msrb.mxu3 %v12357_v28 }
 0x243   : > { %3580 = vmatpush.msrb.mxu0 %v10527_v62  ;;  %3603 = vmatpush.msrb.mxu1 %v10461_v30 }
 0x244   : > { %3492 = vmatmul.f32.vlgmr.msra.gmra.mxu1 %v10987_v11  ;;  %3513 = vmatpush.msra.mxu2 %v12358_v9 }
 0x245   : > { %3605 = vmatpush.msrb.mxu1 %v10471_v35  ;;  %3663 = vmatpush.msrb.mxu3 %v10582_v54 }
 0x246   : > { %3695 = vmatpush.msra.mxu0 %v10498_v1  ;;  %3516 = vmatpush.msra.mxu2 %v12359_v61 }
 0x247   : > { %3669 = vmatpush.msrb.mxu3 %v10592_v8  ;;  %3724 = vmatpush.msra.mxu1 %v10473_v36 }
 0x248   : > { %3397 = vmatmul.f32.vlgmr.msrb.gmra.mxu2 %v10987_v11  ;;  %3549 = vmatmul.f32.vlgmr.msra.gmra.mxu3 %v3263_v63 }
 0x249   : > { %3698 = vmatpush.msra.mxu0 %v10513_v18  ;;  %3519 = vmatpush.msra.mxu2 %v12360_v26 }
 0x24a   : > { %3582 = vmatmul.f32.vlgmr.msrb.gmra.mxu0 %v10987_v11  ;;  %3675 = vmatpush.msrb.mxu3 %v10599_v40 }
 0x24b   : > { %3701 = vmatpush.msra.mxu0 %v10532_v33  ;;  %3726 = vmatpush.msra.mxu1 %v10485_v55 }
 0x24c   : > { %3607 = vmatmul.f32.vlgmr.msrb.gmra.mxu1 %v10987_v11  ;;  %3624 = vmatpush.msrb.mxu2 %v10473_v36 }
 0x24d   : > { %3704 = vmatpush.msra.mxu0 %v10546_v58  ;;  %3728 = vmatpush.msra.mxu1 %v12402_v42 }
 0x24e   : > { %3784 = vmatpush.msra.mxu3 %v10473_v36  ;;  %3626 = vmatpush.msrb.mxu2 %v10485_v55 }
 0x24f   : > { %3730 = vmatpush.msra.mxu1 %v12403_v14  ;;  %3871 = vmatpush.msrb.mxu0 %v12404_v24 }
 0x250   : > { %3522 = vmatmul.f32.vlgmr.msra.gmra.mxu2 %v3262_v32  ;;  %3677 = vmatmul.f32.vlgmr.msrb.gmra.mxu3 %v10987_v11 }
 0x251   : > { %3786 = vmatpush.msra.mxu3 %v10485_v55  ;;  %3628 = vmatpush.msrb.mxu2 %v12402_v42 }
 0x252   : > { %3707 = vmatmul.f32.vlgmr.msra.gmra.mxu0 %v3262_v32  ;;  %3902 = vmatpush.msrb.mxu1 %v12405_v6  ;;  %v12414_v32 = vld [vmem:[#allocation25_spill] sm:$0xff] }
 0x253   : > { %3788 = vmatpush.msra.mxu3 %v12402_v42  ;;  %3630 = vmatpush.msrb.mxu2 %v12403_v14 }
 0x254   : > { %3734 = vmatmul.f32.vlgmr.msra.gmra.mxu1 %v3263_v63  ;;  %3873 = vmatpush.msrb.mxu0 %v12407_v48  ;;  %v12415_v63 = vld [vmem:[#allocation28_spill] sm:$0xff] }
 0x255   : > { %3753 = vmatpush.msra.mxu2 %v12406_v39  ;;  %3790 = vmatpush.msra.mxu3 %v12403_v14 }
 0x256   : > { %3908 = vmatpush.msrb.mxu1 %v12409_v46  ;;  %3982 = vmatpush.msra.mxu0 %v12410_v57 }
 0x257   : > { %3757 = vmatpush.msra.mxu2 %v12408_v4  ;;  %3955 = vmatpush.msrb.mxu3 %v12404_v24 }
 0x258   : > { %4007 = vmatpush.msra.mxu1 %v12404_v24  ;;  %3636 = vmatmul.f32.vlgmr.msrb.gmra.mxu2 %v3265_v49  ;;  %v12417_v49 = vld [vmem:[#allocation23_spill] sm:$0xff] }
 0x259   : > { %3792 = vmatmul.f32.vlgmr.msra.gmra.mxu3 %v10987_v11  ;;  %3761 = vmatpush.msra.mxu2 %v12411_v59 }
 0x25a   : > { %3986 = vmatpush.msra.mxu0 %v12412_v47  ;;  %4009 = vmatpush.msra.mxu1 %v12407_v48 }
 0x25b   : > { %3879 = vmatmul.f32.vlgmr.msrb.gmra.mxu0 %v3878_v12  ;;  %3765 = vmatpush.msra.mxu2 %v12413_v56 }
 0x25c   : > { %3910 = vmatmul.f32.vlgmr.msrb.gmra.mxu1 %v11013_v45  ;;  %4091 = vmatpush.msrb.mxu0 %v12415_v63  ;;  %v12421_v63 = vld [vmem:[#allocation41_spill] sm:$0xff] }
 0x25d   : > { %3930 = vmatpush.msrb.mxu2 %v12414_v32  ;;  %3957 = vmatpush.msrb.mxu3 %v12407_v48 }
 0x25e   : > { %4116 = vmatpush.msrb.mxu1 %v12417_v49  ;;  %4094 = vmatpush.msrb.mxu0 %v12418_v38  ;;  %v12423_v38 = vld [vmem:[#allocation55_spill] sm:$0xff] }
 0x25f   : > { %3933 = vmatpush.msrb.mxu2 %v12416_v29  ;;  %4063 = vmatpush.msra.mxu3 %v12419_v41  ;;  %v12424_v29 = vld [vmem:[#allocation32_spill] sm:$0xff] }
 0x260   : > { %3767 = vmatmul.f32.vlgmr.msra.gmra.mxu2 %v10987_v11  ;;  %4118 = vmatpush.msrb.mxu1 %v12420_v19  ;;  %v12422_v11 = vld [vmem:[#allocation53_spill] sm:$0xff] }
 0x261   : > { %3961 = vmatmul.f32.vlgmr.msrb.gmra.mxu3 %v11034_v31  ;;  %4032 = vmatpush.msra.mxu2 %v12417_v49 }
 0x262   : > { %4069 = vmatpush.msra.mxu3 %v12421_v63  ;;  %v12425_v63 = vld [vmem:[#allocation33_spill] sm:$0xff] }
 0x263   : > { %3988 = vmatmul.f32.vlgmr.msra.gmra.mxu0 %v11013_v45  ;;  %4034 = vmatpush.msra.mxu2 %v12420_v19 }
 0x264   : > { %4193 = vmatpush.msra.mxu0 %v12377_v25  ;;  %4011 = vmatmul.f32.vlgmr.msra.gmra.mxu1 %v11013_v45 }
 0x265   : > { %4168 = vmatpush.msrb.mxu3 %v12417_v49  ;;  %4224 = vmatpush.msra.mxu1 %v12422_v11 }
 0x266   : > { %4195 = vmatpush.msra.mxu0 %v12379_v2 }
 0x267   : > { %4170 = vmatpush.msrb.mxu3 %v12420_v19  ;;  %4230 = vmatpush.msra.mxu1 %v12423_v38  ;;  %v12426_v38 = vld [vmem:[#allocation35_spill] sm:$0xff] }
 0x268   : > { %3936 = vmatmul.f32.vlgmr.msrb.gmra.mxu2 %v11023_v44 }
 0x269   : > { %4071 = vmatmul.f32.vlgmr.msra.gmra.mxu3 %v11013_v45  ;;  %4143 = vmatpush.msrb.mxu2 %v12424_v29 }
 0x26a   : > { %4277 = vmatpush.msra.mxu3 %v12377_v25 }
 0x26b   : > { %4097 = vmatmul.f32.vlgmr.msrb.gmra.mxu0 %v11023_v44  ;;  %4147 = vmatpush.msrb.mxu2 %v12425_v63  ;;  %v11145_v63 = vld [vmem:[%s10261_s13 + $0x1] ss:$0 sm:$0xff] }
 0x26c   : > { %4279 = vmatpush.msra.mxu3 %v12379_v2  ;;  %4122 = vmatmul.f32.vlgmr.msrb.gmra.mxu1 %v11034_v31  ;;  %12436 = vst [vmem:[#allocation77_spill] sm:$0xff] %v11145_v63 }
 0x26d   : > { %4304 = vmatpush.msrb.mxu0 %v12384_v20  ;;  %4329 = vmatpush.msrb.mxu1 %v12377_v25 }
 0x26f   : > { %4308 = vmatpush.msrb.mxu0 %v12386_v15  ;;  %4331 = vmatpush.msrb.mxu1 %v12379_v2 }
 0x270   : > { %4040 = vmatmul.f32.vlgmr.msra.gmra.mxu2 %v3878_v12 }
 0x271   : > { %4172 = vmatmul.f32.vlgmr.msrb.gmra.mxu3 %v11013_v45  ;;  %4252 = vmatpush.msra.mxu2 %v12426_v38 }
 0x272   : > { %4387 = vmatpush.msrb.mxu3 %v12381_v5 }
 0x273   : > { %4201 = vmatmul.f32.vlgmr.msra.gmra.mxu0 %v3878_v12  ;;  %4255 = vmatpush.msra.mxu2 %v12378_v7  ;;  %v12429_v12 = vld [vmem:[#allocation49_spill] sm:$0xff] }
 0x274   : > { %4393 = vmatpush.msrb.mxu3 %v12383_v53  ;;  %4232 = vmatmul.f32.vlgmr.msra.gmra.mxu1 %v11013_v45 }
 0x275   : > { %4425 = vmatpush.msra.mxu0 %v12390_v43  ;;  %4454 = vmatpush.msra.mxu1 %v12380_v52  ;;  %v2780_v43 = vpop.f32.mrf.mxu0 }
 0x276   : > { %4399 = vmatpush.msrb.mxu3 %v12385_v50 }
 0x277   : > { %4428 = vmatpush.msra.mxu0 %v12391_v16  ;;  %4456 = vmatpush.msra.mxu1 %v12382_v60  ;;  %v12432_v16 = vld [vmem:[#allocation78_spill] sm:$0xff] }
 0x278   : > { %4405 = vmatpush.msrb.mxu3 %v12387_v0  ;;  %4149 = vmatmul.f32.vlgmr.msrb.gmra.mxu2 %v11013_v45 }
 0x279   : > { %4283 = vmatmul.f32.vlgmr.msra.gmra.mxu3 %v11034_v31  ;;  %4431 = vmatpush.msra.mxu0 %v12394_v23  ;;  %v12427_v31 = vld [vmem:[#allocation68_spill] sm:$0xff]  ;;  %v12431_v23 = vld [vmem:[#allocation51_spill] sm:$0xff] }
 0x27a   : > { %4354 = vmatpush.msrb.mxu2 %v12380_v52  ;;  %4458 = vmatpush.msra.mxu1 %v12388_v10 }
 0x27b   : > { %4310 = vmatmul.f32.vlgmr.msrb.gmra.mxu0 %v11013_v45  ;;  %4514 = vmatpush.msra.mxu3 %v12380_v52 }
 0x27c   : > { %4434 = vmatpush.msra.mxu0 %v12397_v3  ;;  %4333 = vmatmul.f32.vlgmr.msrb.gmra.mxu1 %v11013_v45  ;;  %v12428_v45 = vld [vmem:[#allocation71_spill] sm:$0xff] }
 0x27d   : > { %4356 = vmatpush.msrb.mxu2 %v12382_v60  ;;  %4460 = vmatpush.msra.mxu1 %v12389_v22  ;;  %v12430_v3 = vld [vmem:[#allocation75_spill] sm:$0xff]  ;;  %v2889_v0 = vpop.f32.mrf.mxu0 }
 0x27e   : > { %4516 = vmatpush.msra.mxu3 %v12382_v60  ;;  %4539 = vmatpush.msrb.mxu0 %v10436_v13  ;;  %v2750_v60 = vpop.permute.xlu1 %2749 }
 0x27f   : > { %4358 = vmatpush.msrb.mxu2 %v12388_v10  ;;  %4572 = vmatpush.msrb.mxu1 %v12427_v31  ;;  %v12434_v31 = vld [vmem:[#allocation56_spill] sm:$0xff]  ;;  %v2916_v29 = vmul.f32 %v11145_v63, %v2750_v60 }
 0x280   : > { %4518 = vmatpush.msra.mxu3 %v12388_v10  ;;  %4258 = vmatmul.f32.vlgmr.msra.gmra.mxu2 %v11023_v44  ;;  %v12433_v44 = vld [vmem:[#allocation54_spill] sm:$0xff]  ;;  %v2862_v10 = vpop.f32.mrf.mxu3 }
 0x281   : > { %4541 = vmatpush.msrb.mxu0 %v10442_v17  ;;  %4360 = vmatpush.msrb.mxu2 %v12389_v22 }
 0x282   : > { %4520 = vmatpush.msra.mxu3 %v12389_v22  ;;  %4578 = vmatpush.msrb.mxu1 %v12428_v45  ;;  %v2811_v22 = vpop.f32.mrf.mxu1  ;;  %v2837_v45 = vpop.f32.mrf.mxu2 }
 0x283   : > { %4543 = vmatpush.msrb.mxu0 %v10461_v30  ;;  %4483 = vmatpush.msra.mxu2 %v12429_v12 }
 0x284   : > { %4584 = vmatpush.msrb.mxu1 %v12430_v3 }
 0x285   : > { %4545 = vmatpush.msrb.mxu0 %v10471_v35  ;;  %4487 = vmatpush.msra.mxu2 %v12431_v23  ;;  %v2998_v50 = vpop.f32.mrf.mxu0 }
 0x286   : > { %4590 = vmatpush.msrb.mxu1 %v12432_v16 }
 0x287   : > { %4491 = vmatpush.msra.mxu2 %v12433_v44  ;;  %v11135_v44 = vld [vmem:[%s10261_s13] ss:$0 sm:$0xff] }
 0x288   : > { %v2972_v12 = vpop.f32.mrf.mxu3  ;;  %12435 = vst [vmem:[#allocation61_spill] sm:$0xff] %v11135_v44 }
 0x289   : > { %4495 = vmatpush.msra.mxu2 %v12434_v31  ;;  %v2752_v31 = vmul.f32 %v11135_v44, %v2750_v60  ;;  %v11149_v44 = vld [vmem:[%s10215_s18] ss:$0 sm:$0xff] }
 0x28a   : > { %v2912_v15 = vpop.f32.mrf.mxu1  ;;  %v2941_v20 = vpop.f32.mrf.mxu2 }
 0x28b   : > { %v2781_v2 = vadd.f32 %v2780_v43, %v2752_v31  ;;  %v2942_v56 = vadd.f32 %v2941_v20, %v2916_v29 }
 0x28d   : > { %v3102_v23 = vpop.f32.mrf.mxu0  ;;  %v2812_v38 = vadd.f32 %v2811_v22, %v2781_v2  ;;  %v2973_v22 = vadd.f32 %v2972_v12, %v2942_v56 }
 0x28f   : > { %v2838_v19 = vadd.f32 %v2837_v45, %v2812_v38  ;;  %v2999_v63 = vadd.f32 %v2998_v50, %v2973_v22 }
 0x290   : > { %v3073_v53 = vpop.f32.mrf.mxu3 }
 0x291   : > { %v2863_v41 = vadd.f32 %v2862_v10, %v2838_v19  ;;  %v11153_v19 = vld [vmem:[%s10215_s18 + $0x1] ss:$0 sm:$0xff] }
 0x292   : > { %v3023_v3 = vpop.f32.mrf.mxu1  ;;  %v3050_v16 = vpop.f32.mrf.mxu2 }
 0x293   : > { %v2890_v2 = vadd.f32 %v2889_v0, %v2863_v41  ;;  %v3024_v29 = vadd.f32 %v3023_v3, %v2999_v63 }
 0x295   : > { %v11140_v7 = vpop.f32.mrf.mxu0  ;;  %v2913_v4 = vadd.f32 %v2912_v15, %v2890_v2 }
 0x298   : > { %v11138_v52 = vpop.f32.mrf.mxu3 }
 0x29a   : > { %v3133_v5 = vpop.f32.mrf.mxu1  ;;  %v3159_v25 = vpop.f32.mrf.mxu2 }
 0x2a2   : > { %v11142_v11 = vpop.f32.mrf.mxu1 }
 0x2b7   : > { %v3338_v32 = vpop.f32.mrf.mxu0 }
 0x2b9   : > { %v3365_v31 = vpop.f32.mrf.mxu1 }
 0x2bb   : > { %v3308_v49 = vpop.f32.mrf.mxu3 }
 0x2bf   : > { %v3452_v45 = vpop.f32.mrf.mxu0 }
 0x2c0   : > { %v3453_v48 = vadd.f32 %v11153_v19, %v3452_v45 }
 0x2c3   : > { %v3267_v47 = vpop.f32.mrf.mxu2  ;;  %v3423_v46 = vpop.f32.mrf.mxu3 }
 0x2c4   : > { %v3268_v43 = vadd.f32 %v11149_v44, %v3267_v47  ;;  %v11157_v47 = vld [vmem:[%s10205_s30] ss:$0 sm:$0xff] }
 0x2c5   : > { %v2915_v0 = vadd.f32 %v11157_v47, %v2913_v4 }
 0x2c6   : > { %v3309_v59 = vadd.f32 %v3308_v49, %v3268_v43  ;;  %v3493_v49 = vpop.f32.mrf.mxu1 }
 0x2c7   : > { %v3494_v50 = vadd.f32 %v3493_v49, %v3453_v48  ;;  %v3583_v43 = vpop.f32.mrf.mxu0 }
 0x2c8   : > { %v3339_v57 = vadd.f32 %v3338_v32, %v3309_v59  ;;  %v3051_v32 = vadd.f32 %v3050_v16, %v3024_v29  ;;  %v11165_v16 = vld [vmem:[%s10205_s30 + $0x1] ss:$0 sm:$0xff] }
 0x2ca   : > { %v3366_v38 = vadd.f32 %v3365_v31, %v3339_v57  ;;  %v11161_v57 = vld [vmem:[%s10261_s13 + $0x2] ss:$0 sm:$0xff]  ;;  %v3074_v31 = vadd.f32 %v3073_v53, %v3051_v32 }
 0x2cb   : > { %v3398_v10 = vpop.f32.mrf.mxu2  ;;  %v3077_v41 = vmul.f32 %v11161_v57, %v2750_v60  ;;  %v3550_v3 = vpop.f32.mrf.mxu3 }
 0x2cc   : > { %v3399_v20 = vadd.f32 %v3398_v10, %v3366_v38  ;;  %v3076_v48 = vadd.f32 %v11165_v16, %v3074_v31 }
 0x2cd   : > { %v3103_v4 = vadd.f32 %v3102_v23, %v3077_v41 }
 0x2ce   : > { %v3424_v56 = vadd.f32 %v3423_v46, %v3399_v20  ;;  %v3608_v22 = vpop.f32.mrf.mxu1 }
 0x2cf   : > { %v3134_v10 = vadd.f32 %v3133_v5, %v3103_v4  ;;  %v3708_v32 = vpop.f32.mrf.mxu0 }
 0x2d0   : > { %v3796_v59 = vadd.f32 %v3424_v56, %v2915_v0  ;;  %v11169_v0 = vld [vmem:[%s10215_s18 + $0x2] ss:$0 sm:$0xff] }
 0x2d2   : > { %v9570_v15 = vmul.f32 -1.442695, %v3796_v59  ;;  %v3160_v59 = vadd.f32 %v3159_v25, %v3134_v10 }
 0x2d3   : > { %v3523_v63 = vpop.f32.mrf.mxu2  ;;  %v3678_v53 = vpop.f32.mrf.mxu3 }
 0x2d4   : > { %9707 = vpow2.f32 %v9570_v15  ;;  %v3524_v12 = vadd.f32 %v3523_v63, %v3494_v50  ;;  %v3185_v41 = vadd.f32 %v11138_v52, %v3160_v59 }
 0x2d6   : > { %v3551_v2 = vadd.f32 %v3550_v3, %v3524_v12  ;;  %v3735_v3 = vpop.f32.mrf.mxu1 }
 0x2d8   : > { %v3584_v46 = vadd.f32 %v3583_v43, %v3551_v2  ;;  %v3212_v2 = vadd.f32 %v11140_v7, %v3185_v41 }
 0x2da   : > { %v9708_v38 = vpop.eup %9707  ;;  %v3609_v45 = vadd.f32 %v3608_v22, %v3584_v46  ;;  %v3235_v52 = vadd.f32 %v11142_v11, %v3212_v2 }
 0x2db   : > { %v3800_v20 = vadd.f32 1.0, %v9708_v38  ;;  %v3637_v60 = vpop.f32.mrf.mxu2 }
 0x2dc   : > { %v3816_v29 = vadd.f32 %v3609_v45, %v3076_v48  ;;  %v3638_v56 = vadd.f32 %v11169_v0, %v3637_v60  ;;  %v3793_v45 = vpop.f32.mrf.mxu3 }
 0x2dd   : > { %9709 = vrcp.f32 %v3800_v20  ;;  %v3812_v46 = vand.u32 2147483648, %v3800_v20  ;;  %v3810_v25 = vand.u32 2147483647, %v3800_v20  ;;  %vm3806_vm4 = vweird.f32 %v3800_v20 }
 0x2de   : > { %v9571_v49 = vmul.f32 -1.442695, %v3816_v29  ;;  %v3679_v23 = vadd.f32 %v3678_v53, %v3638_v56 }
 0x2df   : > { %v3813_v10 = vor.u32 1.1754944e-38, %v3812_v46  ;;  %vm3811_vm6 = vcmp.eq.f32.partialorder %v3810_v25, 8.507059e+37 }
 0x2e0   : > { %9711 = vpow2.f32 %v9571_v49  ;;  %v3709_v50 = vadd.f32 %v3708_v32, %v3679_v23  ;;  %v11176_v49 = vld [vmem:[%s10205_s30 + $0x2] ss:$0 sm:$0xff] }
 0x2e1   : > { %v3237_v23 = vadd.f32 %v11176_v49, %v3235_v52  ;;  %v12437_v52 = vld [vmem:[#allocation22_spill] sm:$0xff] }
 0x2e2   : > { %v3736_v5 = vadd.f32 %v3735_v3, %v3709_v50 }
 0x2e3   : > { %v9710_v15 = vpop.eup %9709  ;;  %v3768_v12 = vpop.f32.mrf.mxu2 }
 0x2e4   : > { %v3802_v63 = vmul.f32 %v9710_v15, %v3800_v20  ;;  %v3769_v22 = vadd.f32 %v3768_v12, %v3736_v5  ;;  %vm3807_vm3 = vweird.f32 %v9710_v15 }
 0x2e5   : > { %vm3808_vm5 = vmor %vm3806_vm4, %vm3807_vm3 }
 0x2e6   : > { %v9712_v43 = vpop.eup %9711  ;;  %v3803_v31 = vsub.f32 1.0, %v3802_v63  ;;  %v3794_v60 = vadd.f32 %v3793_v45, %v3769_v22  ;;  %v12438_v45 = vld [vmem:[#allocation72_spill] sm:$0xff] }
 0x2e7   : > { %v3820_v4 = vadd.f32 1.0, %v9712_v43 }
 0x2e8   : > { %v3804_v38 = vmul.f32 %v9710_v15, %v3803_v31 }
 0x2e9   : > { %9713 = vrcp.f32 %v3820_v4  ;;  %v3832_v41 = vand.u32 2147483648, %v3820_v4  ;;  %v3830_v11 = vand.u32 2147483647, %v3820_v4  ;;  %vm3826_vm8 = vweird.f32 %v3820_v4 }
 0x2ea   : > { %v3805_v48 = vadd.f32 %v9710_v15, %v3804_v38 }
 0x2eb   : > { %vm3831_vm11 = vcmp.eq.f32.partialorder %v3830_v11, 8.507059e+37  ;;  %v3911_v11 = vpop.f32.mrf.mxu1 }
 0x2ec   : > { %v3809_v29 = vsel %vm3808_vm5, %v9710_v15, %v3805_v48  ;;  %v3833_v15 = vor.u32 1.1754944e-38, %v3832_v41  ;;  %v12449_v41 = vld [vmem:[#allocation24_spill] sm:$0xff] }
 0x2ed   : > { %v3814_v56 = vsel %vm3811_vm6, %v3813_v10, %v3809_v29  ;;  %v12439_v10 = vld [vmem:[#allocation38_spill] sm:$0xff] }
 0x2ee   : > { %v3836_v7 = vmul.f32 %v3814_v56, %v3794_v60  ;;  %v12440_v60 = vld [vmem:[#allocation30_spill] sm:$0xff]  ;;  %v12442_v56 = vld [vmem:[#allocation31_spill] sm:$0xff] }
 0x2ef   : > { %v9714_v53 = vpop.eup %9713  ;;  %v12441_v29 = vld [vmem:[#allocation74_spill] sm:$0xff] }
 0x2f0   : > { %v3822_v59 = vmul.f32 %v9714_v53, %v3820_v4  ;;  %v3837_v32 = vadd.f32 %v3836_v7, %v3237_v23  ;;  %vm3827_vm7 = vweird.f32 %v9714_v53  ;;  %v12443_v7 = vld [vmem:[#allocation76_spill] sm:$0xff]  ;;  %v12445_v23 = vld [vmem:[#allocation25_spill] sm:$0xff] }
 0x2f1   : > { %vm3828_vm10 = vmor %vm3826_vm8, %vm3827_vm7 }
 0x2f2   : > { %v3823_v50 = vsub.f32 1.0, %v3822_v59  ;;  %9715 = vtanh.f32 %v3837_v32  ;;  %v12446_v59 = vld [vmem:[#allocation41_spill] sm:$0xff]  ;;  %v12447_v32 = vld [vmem:[#allocation26_spill] sm:$0xff] }
 0x2f4   : > { %v3824_v20 = vmul.f32 %v9714_v53, %v3823_v50  ;;  %v12448_v50 = vld [vmem:[#allocation23_spill] sm:$0xff] }
 0x2f6   : > { %v3825_v3 = vadd.f32 %v9714_v53, %v3824_v20  ;;  %v3880_v20 = vpop.f32.mrf.mxu0 }
 0x2f8   : > { %v3829_v5 = vsel %vm3828_vm10, %v9714_v53, %v3825_v3  ;;  %v9716_v43 = vpop.eup %9715  ;;  %v12444_v53 = vld [vmem:[#allocation40_spill] sm:$0xff]  ;;  %v3962_v3 = vpop.f32.mrf.mxu3 }
 0x2f9   : > { %v3834_v63 = vsel %vm3831_vm11, %v3833_v15, %v3829_v5  ;;  %v3937_v5 = vpop.f32.mrf.mxu2 }
 0x2fa   : > { %v3839_v12 = vsub.f32 1.0, %v3834_v63  ;;  %v3841_v2 = vmul.f32 %v3834_v63, %v10983_v37  ;;  %v11252_v63 = vpop.f32.mrf.mxu1 }
 0x2fc   : > { %v3840_v31 = vmul.f32 %v9716_v43, %v3839_v12 }
 0x2fe   : > { %v11180_v46 = vadd.f32 %v3841_v2, %v3840_v31  ;;  %v3989_v15 = vpop.f32.mrf.mxu0 }
 0x300   : > { %v4339_v22 = vsel %vm1031_vm9, %v11180_v46, 0  ;;  %v4072_v12 = vpop.f32.mrf.mxu3 }
 0x301   : > { %v11184_v38 = vand.u32 4294901760, %v4339_v22  ;;  %v4041_v31 = vpop.f32.mrf.mxu2 }
 0x302   : > { %v11256_v2 = vpop.f32.mrf.mxu1 }
 0x303   : > { %4407 = vmatmul.f32.vlgmr.msrb.gmra.mxu3 %v11184_v38  ;;  %v4362_v4 = vsub.f32 %v4339_v22, %v11184_v38 }
 0x304   : > { %4639 = vmatpush.msrb.mxu3 %v10436_v13 }
 0x305   : > { %4437 = vmatmul.f32.vlgmr.msra.gmra.mxu0 %v4362_v4  ;;  %v4363_v25 = vand.u32 4294901760, %v4362_v4 }
 0x306   : > { %4641 = vmatpush.msrb.mxu3 %v10442_v17  ;;  %4668 = vmatpush.msra.mxu0 %v10469_v34  ;;  %v11254_v43 = vpop.f32.mrf.mxu0 }
 0x307   : > { %4464 = vmatmul.f32.vlgmr.msra.gmra.mxu1 %v4363_v25  ;;  %v4364_v37 = vsub.f32 %v4362_v4, %v4363_v25 }
 0x308   : > { %4643 = vmatpush.msrb.mxu3 %v10461_v30  ;;  %4672 = vmatpush.msra.mxu0 %v10483_v51  ;;  %v11258_v22 = vpop.f32.mrf.mxu3 }
 0x309   : > { %v4365_v48 = vand.u32 4294901760, %v4364_v37  ;;  %4699 = vmatpush.msra.mxu1 %v10436_v13 }
 0x30a   : > { %4645 = vmatpush.msrb.mxu3 %v10471_v35  ;;  %4676 = vmatpush.msra.mxu0 %v10510_v21 }
 0x30b   : > { %4366 = vmatmul.f32.vlgmr.msrb.gmra.mxu2 %v4365_v48  ;;  %4522 = vmatmul.f32.vlgmr.msra.gmra.mxu3 %v11184_v38 }
 0x30c   : > { %4701 = vmatpush.msra.mxu1 %v10442_v17  ;;  %4610 = vmatpush.msrb.mxu2 %v12356_v27 }
 0x30d   : > { %4551 = vmatmul.f32.vlgmr.msrb.gmra.mxu0 %v4365_v48  ;;  %4757 = vmatpush.msra.mxu3 %v12357_v28 }
 0x30e   : > { %4680 = vmatpush.msra.mxu0 %v10527_v62  ;;  %4703 = vmatpush.msra.mxu1 %v10461_v30 }
 0x30f   : > { %4592 = vmatmul.f32.vlgmr.msrb.gmra.mxu1 %v11184_v38  ;;  %4613 = vmatpush.msrb.mxu2 %v12358_v9 }
 0x310   : > { %4705 = vmatpush.msra.mxu1 %v10471_v35  ;;  %4763 = vmatpush.msra.mxu3 %v10582_v54 }
 0x311   : > { %4795 = vmatpush.msrb.mxu0 %v10498_v1  ;;  %4616 = vmatpush.msrb.mxu2 %v12359_v61 }
 0x312   : > { %4769 = vmatpush.msra.mxu3 %v10592_v8  ;;  %4824 = vmatpush.msrb.mxu1 %v10473_v36 }
 0x313   : > { %4497 = vmatmul.f32.vlgmr.msra.gmra.mxu2 %v11184_v38  ;;  %4649 = vmatmul.f32.vlgmr.msrb.gmra.mxu3 %v4363_v25 }
 0x314   : > { %4798 = vmatpush.msrb.mxu0 %v10513_v18  ;;  %4619 = vmatpush.msrb.mxu2 %v12360_v26 }
 0x315   : > { %4682 = vmatmul.f32.vlgmr.msra.gmra.mxu0 %v11184_v38  ;;  %4775 = vmatpush.msra.mxu3 %v10599_v40 }
 0x316   : > { %4801 = vmatpush.msrb.mxu0 %v10532_v33  ;;  %4826 = vmatpush.msrb.mxu1 %v10485_v55 }
 0x317   : > { %4707 = vmatmul.f32.vlgmr.msra.gmra.mxu1 %v11184_v38  ;;  %4724 = vmatpush.msra.mxu2 %v10473_v36 }
 0x318   : > { %4804 = vmatpush.msrb.mxu0 %v10546_v58  ;;  %4828 = vmatpush.msrb.mxu1 %v12402_v42 }
 0x319   : > { %4884 = vmatpush.msrb.mxu3 %v10473_v36  ;;  %4726 = vmatpush.msra.mxu2 %v10485_v55 }
 0x31a   : > { %4830 = vmatpush.msrb.mxu1 %v12403_v14  ;;  %4971 = vmatpush.msra.mxu0 %v12404_v24 }
 0x31b   : > { %4622 = vmatmul.f32.vlgmr.msrb.gmra.mxu2 %v4362_v4  ;;  %4777 = vmatmul.f32.vlgmr.msra.gmra.mxu3 %v11184_v38 }
 0x31c   : > { %4886 = vmatpush.msrb.mxu3 %v10485_v55  ;;  %4728 = vmatpush.msra.mxu2 %v12402_v42 }
 0x31d   : > { %4807 = vmatmul.f32.vlgmr.msrb.gmra.mxu0 %v4362_v4  ;;  %5002 = vmatpush.msra.mxu1 %v12405_v6  ;;  %v11262_v4 = vpop.f32.mrf.mxu2  ;;  %v12453_v6 = vld [vmem:[#allocation28_spill] sm:$0xff] }
 0x31e   : > { %4888 = vmatpush.msrb.mxu3 %v12402_v42  ;;  %4730 = vmatpush.msra.mxu2 %v12403_v14  ;;  %v12460_v42 = vld [vmem:[#allocation42_spill] sm:$0xff] }
 0x31f   : > { %4834 = vmatmul.f32.vlgmr.msrb.gmra.mxu1 %v4363_v25  ;;  %4973 = vmatpush.msra.mxu0 %v12437_v52  ;;  %v9576_v25 = vld [vmem:[%s10226_s7 + $0x6] sm:$0x3] }
 0x320   : > { %4853 = vmatpush.msrb.mxu2 %v12406_v39  ;;  %4890 = vmatpush.msrb.mxu3 %v12403_v14  ;;  %v4954_v37 = vsel %vm527_vm0, %v9576_v25, 0 }
 0x321   : > { %5008 = vmatpush.msra.mxu1 %v12439_v10  ;;  %5082 = vmatpush.msrb.mxu0 %v12440_v60  ;;  %v12452_v10 = vld [vmem:[#allocation33_spill] sm:$0xff] }
 0x322   : > { %4857 = vmatpush.msrb.mxu2 %v12438_v45  ;;  %5055 = vmatpush.msra.mxu3 %v12404_v24 }
 0x323   : > { %4736 = vmatmul.f32.vlgmr.msra.gmra.mxu2 %v4365_v48  ;;  %4892 = vmatmul.f32.vlgmr.msrb.gmra.mxu3 %v11184_v38  ;;  %v11266_v48 = vpop.permute.xlu1 %3849 }
 0x324   : > { %4861 = vmatpush.msrb.mxu2 %v12441_v29  ;;  %5057 = vmatpush.msra.mxu3 %v12437_v52  ;;  %v11278_v29 = vpop.f32.mrf.mxu3 }
 0x325   : > { %5086 = vmatpush.msrb.mxu0 %v12442_v56  ;;  %5107 = vmatpush.msrb.mxu1 %v12404_v24  ;;  %v12458_v24 = vld [vmem:[#allocation35_spill] sm:$0xff] }
 0x326   : > { %4865 = vmatpush.msrb.mxu2 %v12443_v7  ;;  %5163 = vmatpush.msrb.mxu3 %v12444_v53  ;;  %v12450_v53 = vld [vmem:[#allocation61_spill] sm:$0xff] }
 0x327   : > { %5109 = vmatpush.msrb.mxu1 %v12437_v52 }
 0x328   : > { %5030 = vmatpush.msra.mxu2 %v12445_v23  ;;  %5169 = vmatpush.msrb.mxu3 %v12446_v59  ;;  %v11268_v59 = vand.u32 4294901760, %v4954_v37  ;;  %v11272_v23 = vpop.f32.mrf.mxu1 }
 0x32a   : > { %5033 = vmatpush.msra.mxu2 %v12447_v32  ;;  %v3852_v32 = vmul.f32 %v12450_v53, %v11266_v48  ;;  %v11275_v7 = vsub.f32 %v4954_v37, %v11268_v59  ;;  %5010 = vmatmul.f32.vlgmr.msra.gmra.mxu1 %v11268_v59  ;;  %v12451_v53 = vld [vmem:[#allocation32_spill] sm:$0xff] }
 0x32b   : > { %4867 = vmatmul.f32.vlgmr.msrb.gmra.mxu2 %v11184_v38  ;;  %v11260_v38 = vpop.f32.mrf.mxu0  ;;  %5216 = vmatpush.msra.mxu1 %v12448_v50 }
 0x32c   : > { %5132 = vmatpush.msrb.mxu2 %v12448_v50  ;;  %v3881_v56 = vadd.f32 %v3880_v20, %v3852_v32  ;;  %v11282_v25 = vand.u32 4294901760, %v11275_v7  ;;  %v11292_v20 = vpop.f32.mrf.mxu2 }
 0x32d   : > { %5218 = vmatpush.msra.mxu1 %v12449_v41 }
 0x32e   : > { %5134 = vmatpush.msrb.mxu2 %v12449_v41  ;;  %v4977_v37 = vsub.f32 %v11275_v7, %v11282_v25  ;;  %5061 = vmatmul.f32.vlgmr.msra.gmra.mxu3 %v11282_v25  ;;  %v3912_v32 = vadd.f32 %v3911_v11, %v3881_v56  ;;  %v12454_v56 = vld [vmem:[#allocation53_spill] sm:$0xff] }
 0x32f   : > { %5268 = vmatpush.msra.mxu3 %v12448_v50  ;;  %v12455_v11 = vld [vmem:[#allocation77_spill] sm:$0xff] }
 0x330   : > { %v11296_v45 = vand.u32 4294901760, %v4977_v37  ;;  %v3938_v52 = vadd.f32 %v3937_v5, %v3912_v32  ;;  %v11298_v39 = vpop.f32.mrf.mxu1  ;;  %v4016_v50 = vmul.f32 %v12455_v11, %v11266_v48  ;;  %v12456_v32 = vld [vmem:[#allocation29_spill] sm:$0xff] }
 0x331   : > { %5270 = vmatpush.msra.mxu3 %v12449_v41 }
 0x332   : > { %4979 = vmatmul.f32.vlgmr.msra.gmra.mxu0 %v11296_v45  ;;  %5111 = vmatmul.f32.vlgmr.msrb.gmra.mxu1 %v11268_v59  ;;  %v3963_v37 = vadd.f32 %v3962_v3, %v3938_v52  ;;  %v4042_v41 = vadd.f32 %v4041_v31, %v4016_v50  ;;  %v12461_v52 = vld [vmem:[#allocation34_spill] sm:$0xff] }
 0x333   : > { %5036 = vmatmul.f32.vlgmr.msra.gmra.mxu2 %v11275_v7  ;;  %v11285_v60 = vpop.f32.mrf.mxu0  ;;  %5191 = vmatpush.msra.mxu0 %v12453_v6  ;;  %v12459_v6 = vld [vmem:[#allocation27_spill] sm:$0xff] }
 0x334   : > { %5243 = vmatpush.msra.mxu2 %v12451_v53  ;;  %5324 = vmatpush.msrb.mxu1 %v12454_v56  ;;  %v3990_v11 = vadd.f32 %v3989_v15, %v3963_v37  ;;  %v4073_v3 = vadd.f32 %v4072_v12, %v4042_v41  ;;  %v12462_v12 = vld [vmem:[#allocation36_spill] sm:$0xff] }
 0x335   : > { %5194 = vmatpush.msra.mxu0 %v12456_v32 }
 0x336   : > { %5247 = vmatpush.msra.mxu2 %v12452_v10  ;;  %v12457_v10 = vld [vmem:[#allocation55_spill] sm:$0xff]  ;;  %5171 = vmatmul.f32.vlgmr.msrb.gmra.mxu3 %v11268_v59  ;;  %v4099_v41 = vadd.f32 %v11254_v43, %v4073_v3 }
 0x337   : > { %5330 = vmatpush.msrb.mxu1 %v12457_v10  ;;  %5377 = vmatpush.msrb.mxu3 %v12459_v6 }
 0x339   : > { %5379 = vmatpush.msrb.mxu3 %v12461_v52 }
 0x33a   : > { %5088 = vmatmul.f32.vlgmr.msrb.gmra.mxu0 %v11268_v59  ;;  %5222 = vmatmul.f32.vlgmr.msra.gmra.mxu1 %v11282_v25 }
 0x33b   : > { %5140 = vmatmul.f32.vlgmr.msrb.gmra.mxu2 %v11296_v45  ;;  %5293 = vmatpush.msrb.mxu0 %v12459_v6 }
 0x33c   : > { %5352 = vmatpush.msrb.mxu2 %v12458_v24  ;;  %5429 = vmatpush.msra.mxu1 %v12459_v6 }
 0x33d   : > { %5295 = vmatpush.msrb.mxu0 %v12461_v52 }
 0x33e   : > { %5355 = vmatpush.msrb.mxu2 %v12460_v42  ;;  %5431 = vmatpush.msra.mxu1 %v12461_v52  ;;  %v12467_v42 = vld [vmem:[#allocation59_spill] sm:$0xff] }
 0x33f   : > { %5272 = vmatmul.f32.vlgmr.msra.gmra.mxu3 %v11268_v59 }
 0x342   : > { %5197 = vmatmul.f32.vlgmr.msra.gmra.mxu0 %v11275_v7  ;;  %5332 = vmatmul.f32.vlgmr.msrb.gmra.mxu1 %v11268_v59 }
 0x343   : > { %5249 = vmatmul.f32.vlgmr.msra.gmra.mxu2 %v11268_v59  ;;  %5554 = vmatpush.msrb.mxu1 %v12462_v12 }
 0x344   : > { %5454 = vmatpush.msra.mxu2 %v12462_v12 }
 0x347   : > { %5383 = vmatmul.f32.vlgmr.msrb.gmra.mxu3 %v11282_v25 }
 0x34a   : > { %5301 = vmatmul.f32.vlgmr.msrb.gmra.mxu0 %v11296_v45  ;;  %5433 = vmatmul.f32.vlgmr.msra.gmra.mxu1 %v11268_v59  ;;  %v12475_v45 = vld [vmem:[#allocation49_spill] sm:$0xff] }
 0x34b   : > { %5358 = vmatmul.f32.vlgmr.msrb.gmra.mxu2 %v11275_v7 }
 0x382   : > { %v4438_v5 = vpop.f32.mrf.mxu0 }
 0x384   : > { %v4465_v58 = vpop.f32.mrf.mxu1 }
 0x386   : > { %v4408_v53 = vpop.f32.mrf.mxu3 }
 0x38a   : > { %v4552_v31 = vpop.f32.mrf.mxu0 }
 0x38b   : > { %v4553_v43 = vadd.f32 %v11153_v19, %v4552_v31 }
 0x38c   : > { %v4593_v3 = vpop.f32.mrf.mxu1 }
 0x38e   : > { %v4367_v14 = vpop.f32.mrf.mxu2 }
 0x38f   : > { %v4368_v56 = vadd.f32 %v11149_v44, %v4367_v14  ;;  %v4013_v14 = vadd.f32 %v11252_v63, %v3990_v11  ;;  %v4523_v44 = vpop.f32.mrf.mxu3  ;;  %v4124_v11 = vadd.f32 %v11256_v2, %v4099_v41  ;;  %v12469_v2 = vld [vmem:[#allocation60_spill] sm:$0xff] }
 0x391   : > { %v4409_v32 = vadd.f32 %v4408_v53, %v4368_v56  ;;  %v12463_v56 = vld [vmem:[#allocation57_spill] sm:$0xff]  ;;  %v4015_v63 = vadd.f32 %v11157_v47, %v4013_v14  ;;  %v12468_v47 = vld [vmem:[#allocation47_spill] sm:$0xff]  ;;  %v4151_v19 = vadd.f32 %v11262_v4, %v4124_v11  ;;  %v4594_v14 = vadd.f32 %v4593_v3, %v4553_v43  ;;  %v12471_v4 = vld [vmem:[#allocation48_spill] sm:$0xff] }
 0x392   : > { %5487 = vmatpush.msra.mxu3 %v12463_v56  ;;  %v4177_v11 = vmul.f32 %v11161_v57, %v11266_v48  ;;  %v12472_v43 = vld [vmem:[#allocation44_spill] sm:$0xff]  ;;  %v12476_v48 = vld [vmem:[#allocation71_spill] sm:$0xff] }
 0x393   : > { %v4439_v50 = vadd.f32 %v4438_v5, %v4409_v32  ;;  %v12464_v5 = vld [vmem:[#allocation39_spill] sm:$0xff]  ;;  %v12465_v32 = vld [vmem:[#allocation58_spill] sm:$0xff]  ;;  %v12473_v3 = vld [vmem:[#allocation68_spill] sm:$0xff] }
 0x394   : > { %5456 = vmatpush.msra.mxu2 %v12464_v5  ;;  %5493 = vmatpush.msra.mxu3 %v12465_v32 }
 0x395   : > { %v4466_v15 = vadd.f32 %v4465_v58, %v4439_v50  ;;  %v12466_v50 = vld [vmem:[#allocation43_spill] sm:$0xff]  ;;  %5556 = vmatpush.msrb.mxu1 %v12464_v5 }
 0x396   : > { %v4498_v53 = vpop.f32.mrf.mxu2  ;;  %5404 = vmatpush.msra.mxu0 %v12466_v50  ;;  %5499 = vmatpush.msra.mxu3 %v12467_v42 }
 0x397   : > { %v4499_v37 = vadd.f32 %v4498_v53, %v4466_v15  ;;  %v4650_v41 = vpop.f32.mrf.mxu3  ;;  %v12470_v53 = vld [vmem:[#allocation45_spill] sm:$0xff] }
 0x398   : > { %5408 = vmatpush.msra.mxu0 %v12468_v47  ;;  %5505 = vmatpush.msra.mxu3 %v12469_v2 }
 0x399   : > { %v4524_v58 = vadd.f32 %v4523_v44, %v4499_v37  ;;  %5458 = vmatpush.msra.mxu2 %v12470_v53  ;;  %5558 = vmatpush.msrb.mxu1 %v12470_v53  ;;  %v4683_v37 = vpop.f32.mrf.mxu0 }
 0x39a   : > { %5614 = vmatpush.msrb.mxu3 %v12462_v12  ;;  %5525 = vmatpush.msrb.mxu0 %v12472_v43 }
 0x39b   : > { %v4896_v15 = vadd.f32 %v4524_v58, %v4015_v63  ;;  %5460 = vmatpush.msra.mxu2 %v12471_v4  ;;  %v4174_v63 = vadd.f32 %v11258_v22, %v4151_v19  ;;  %5560 = vmatpush.msrb.mxu1 %v12471_v4  ;;  %v4708_v22 = vpop.f32.mrf.mxu1  ;;  %v12474_v19 = vld [vmem:[#allocation46_spill] sm:$0xff] }
 0x39c   : > { %5616 = vmatpush.msrb.mxu3 %v12464_v5  ;;  %5528 = vmatpush.msrb.mxu0 %v12474_v19 }
 0x39d   : > { %v9574_v44 = vmul.f32 -1.442695, %v4896_v15  ;;  %5672 = vmatpush.msra.mxu1 %v12473_v3  ;;  %v4203_v15 = vadd.f32 %v11260_v38, %v4177_v11  ;;  %5583 = vmatpush.msrb.mxu2 %v12475_v45  ;;  %v12479_v11 = vld [vmem:[#allocation75_spill] sm:$0xff] }
 0x39e   : > { %v4623_v31 = vpop.f32.mrf.mxu2  ;;  %5618 = vmatpush.msrb.mxu3 %v12470_v53  ;;  %5410 = vmatmul.f32.vlgmr.msra.gmra.mxu0 %v11268_v59 }
 0x39f   : > { %9717 = vpow2.f32 %v9574_v44  ;;  %v4624_v7 = vadd.f32 %v4623_v31, %v4594_v14  ;;  %v4176_v44 = vadd.f32 %v11165_v16, %v4174_v63  ;;  %5678 = vmatpush.msra.mxu1 %v12476_v48  ;;  %v4234_v45 = vadd.f32 %v11272_v23, %v4203_v15  ;;  %v4778_v16 = vpop.f32.mrf.mxu3  ;;  %v12480_v63 = vld [vmem:[#allocation52_spill] sm:$0xff]  ;;  %v12482_v48 = vld [vmem:[#allocation78_spill] sm:$0xff] }
 0x3a0   : > { %5620 = vmatpush.msrb.mxu3 %v12471_v4 }
 0x3a1   : > { %v4651_v25 = vadd.f32 %v4650_v41, %v4624_v7  ;;  %v12477_v7 = vld [vmem:[#allocation50_spill] sm:$0xff]  ;;  %5684 = vmatpush.msra.mxu1 %v12479_v11 }
 0x3a2   : > { %5531 = vmatpush.msrb.mxu0 %v12477_v7 }
 0x3a3   : > { %v4684_v58 = vadd.f32 %v4683_v37, %v4651_v25  ;;  %v12478_v37 = vld [vmem:[#allocation51_spill] sm:$0xff]  ;;  %5690 = vmatpush.msra.mxu1 %v12482_v48 }
 0x3a4   : > { %5587 = vmatpush.msrb.mxu2 %v12478_v37  ;;  %5534 = vmatpush.msrb.mxu0 %v12480_v63 }
 0x3a5   : > { %v9718_v14 = vpop.eup %9717  ;;  %v4709_v57 = vadd.f32 %v4708_v22, %v4684_v58  ;;  %v12481_v58 = vld [vmem:[#allocation54_spill] sm:$0xff] }
 0x3a6   : > { %v4900_v41 = vadd.f32 1.0, %v9718_v14  ;;  %v4737_v31 = vpop.f32.mrf.mxu2  ;;  %5591 = vmatpush.msrb.mxu2 %v12481_v58  ;;  %5639 = vmatpush.msra.mxu0 %v10436_v13 }
 0x3a7   : > { %v4916_v38 = vadd.f32 %v4709_v57, %v4176_v44  ;;  %v4738_v25 = vadd.f32 %v11169_v0, %v4737_v31  ;;  %v4260_v44 = vadd.f32 %v11292_v20, %v4234_v45  ;;  %v4808_v57 = vpop.f32.mrf.mxu0  ;;  %v12483_v0 = vld [vmem:[#allocation56_spill] sm:$0xff] }
 0x3a8   : > { %9719 = vrcp.f32 %v4900_v41  ;;  %5595 = vmatpush.msrb.mxu2 %v12483_v0  ;;  %5641 = vmatpush.msra.mxu0 %v10442_v17  ;;  %v4910_v48 = vand.u32 2147483647, %v4900_v41  ;;  %vm4906_vm13 = vweird.f32 %v4900_v41 }
 0x3a9   : > { %v9575_v22 = vmul.f32 -1.442695, %v4916_v38  ;;  %v4779_v14 = vadd.f32 %v4778_v16, %v4738_v25  ;;  %v4285_v31 = vadd.f32 %v11278_v29, %v4260_v44  ;;  %v4835_v38 = vpop.f32.mrf.mxu1 }
 0x3aa   : > { %5643 = vmatpush.msra.mxu0 %v10461_v30  ;;  %vm4911_vm15 = vcmp.eq.f32.partialorder %v4910_v48, 8.507059e+37 }
 0x3ab   : > { %9721 = vpow2.f32 %v9575_v22  ;;  %v4809_v23 = vadd.f32 %v4808_v57, %v4779_v14  ;;  %v4312_v58 = vadd.f32 %v11285_v60, %v4285_v31  ;;  %v4912_v22 = vand.u32 2147483648, %v4900_v41  ;;  %v9577_v60 = vld [vmem:[%s10231_s8 + $0x6] sm:$0x3] }
 0x3ac   : > { %5645 = vmatpush.msra.mxu0 %v10471_v35  ;;  %4949 = vperm.xlu2 %9677, %v9577_v60  }
 0x3ad   : > { %v4836_v59 = vadd.f32 %v4835_v38, %v4809_v23  ;;  %v4335_v44 = vadd.f32 %v11298_v39, %v4312_v58  ;;  %v4893_v23 = vpop.f32.mrf.mxu3  ;;  %v4913_v38 = vor.u32 1.1754944e-38, %v4912_v22 }
 0x3ae   : > { %v9720_v15 = vpop.eup %9719  ;;  %v4868_v16 = vpop.f32.mrf.mxu2 }
 0x3af   : > { %v4902_v25 = vmul.f32 %v9720_v15, %v4900_v41  ;;  %v4869_v14 = vadd.f32 %v4868_v16, %v4836_v59  ;;  %vm4907_vm12 = vweird.f32 %v9720_v15  ;;  %v4337_v59 = vadd.f32 %v11176_v49, %v4335_v44 }
 0x3b0   : > { %vm4908_vm14 = vmor %vm4906_vm13, %vm4907_vm12 }
 0x3b1   : > { %v9722_v20 = vpop.eup %9721  ;;  %v4903_v45 = vsub.f32 1.0, %v4902_v25  ;;  %v4894_v37 = vadd.f32 %v4893_v23, %v4869_v14 }
 0x3b2   : > { %v4920_v0 = vadd.f32 1.0, %v9722_v20 }
 0x3b3   : > { %v4904_v57 = vmul.f32 %v9720_v15, %v4903_v45 }
 0x3b4   : > { %9723 = vrcp.f32 %v4920_v0  ;;  %v4930_v39 = vand.u32 2147483647, %v4920_v0  ;;  %vm4926_vm2 = vweird.f32 %v4920_v0 }
 0x3b5   : > { %v4905_v29 = vadd.f32 %v9720_v15, %v4904_v57  ;;  %v4932_v57 = vand.u32 2147483648, %v4920_v0 }
 0x3b6   : > { %vm4931_vm4 = vcmp.eq.f32.partialorder %v4930_v39, 8.507059e+37  ;;  %v12488_v39 = vld [vmem:[#allocation37_spill] sm:$0xff] }
 0x3b7   : > { %v4909_v11 = vsel %vm4908_vm14, %v9720_v15, %v4905_v29  ;;  %v4933_v15 = vor.u32 1.1754944e-38, %v4932_v57  ;;  %v12486_v57 = vld [vmem:[#allocation67_spill] sm:$0xff] }
 0x3b8   : > { %v4914_v25 = vsel %vm4911_vm15, %v4913_v38, %v4909_v11 }
 0x3b9   : > { %v4936_v31 = vmul.f32 %v4914_v25, %v4894_v37  ;;  %v9580_v25 = vld [vmem:[%s10226_s7 + $0x4] sm:$0x3] }
 0x3ba   : > { %v9724_v20 = vpop.eup %9723  ;;  %v6054_v60 = vsel %vm527_vm0, %v9580_v25, 0  ;;  %v12498_v25 = vld [vmem:[#allocation28_spill] sm:$0xff] }
 0x3bb   : > { %v4922_v16 = vmul.f32 %v9724_v20, %v4920_v0  ;;  %v4937_v45 = vadd.f32 %v4936_v31, %v4337_v59  ;;  %vm4927_vm1 = vweird.f32 %v9724_v20  ;;  %v11415_v31 = vand.u32 4294901760, %v6054_v60  ;;  %v12484_v59 = vld [vmem:[#allocation73_spill] sm:$0xff] }
 0x3bc   : > { %vm4928_vm3 = vmor %vm4926_vm2, %vm4927_vm1 }
 0x3bd   : > { %v4923_v3 = vsub.f32 1.0, %v4922_v16  ;;  %9725 = vtanh.f32 %v4937_v45  ;;  %v12485_v16 = vld [vmem:[#allocation66_spill] sm:$0xff] }
 0x3bf   : > { %v4924_v41 = vmul.f32 %v9724_v20, %v4923_v3 }
 0x3c1   : > { %v4925_v58 = vadd.f32 %v9724_v20, %v4924_v41  ;;  %v12487_v41 = vld [vmem:[#allocation21_spill] sm:$0xff] }
 0x3c3   : > { %v4929_v48 = vsel %vm4928_vm3, %v9724_v20, %v4925_v58  ;;  %v9726_v22 = vpop.eup %9725  ;;  %v11425_v20 = vsub.f32 %v6054_v60, %v11415_v31  ;;  %v12500_v60 = vld [vmem:[#allocation29_spill] sm:$0xff] }
 0x3c4   : > { %v4934_v11 = vsel %vm4931_vm4, %v4933_v15, %v4929_v48  ;;  %v12489_v15 = vld [vmem:[#allocation69_spill] sm:$0xff]  ;;  %v12490_v48 = vld [vmem:[#allocation22_spill] sm:$0xff] }
 0x3c5   : > { %v4939_v37 = vsub.f32 1.0, %v4934_v11  ;;  %v4941_v49 = vmul.f32 %v4934_v11, %v11180_v46  ;;  %v11436_v45 = vand.u32 4294901760, %v11425_v20 }
 0x3c7   : > { %v4940_v14 = vmul.f32 %v9726_v22, %v4939_v37  ;;  %v6077_v58 = vsub.f32 %v11425_v20, %v11436_v45  ;;  %v12491_v37 = vld [vmem:[#allocation72_spill] sm:$0xff]  ;;  %v12492_v22 = vld [vmem:[#allocation38_spill] sm:$0xff] }
 0x3c9   : > { %v11385_v29 = vadd.f32 %v4941_v49, %v4940_v14  ;;  %v6078_v11 = vand.u32 4294901760, %v6077_v58  ;;  %v12493_v14 = vld [vmem:[#allocation30_spill] sm:$0xff]  ;;  %v12501_v58 = vld [vmem:[#allocation23_spill] sm:$0xff] }
 0x3ca   : > { %v12494_v49 = vld [vmem:[#allocation74_spill] sm:$0xff] }
 0x3cb   : > { %v5439_v3 = vsel %vm1031_vm9, %v11385_v29, 0 }
 0x3cc   : > { %v11389_v44 = vand.u32 4294901760, %v5439_v3 }
 0x3ce   : > { %5507 = vmatmul.f32.vlgmr.msra.gmra.mxu3 %v11389_v44  ;;  %v5462_v0 = vsub.f32 %v5439_v3, %v11389_v44  ;;  %v12495_v3 = vld [vmem:[#allocation31_spill] sm:$0xff] }
 0x3cf   : > { %5739 = vmatpush.msra.mxu3 %v10436_v13 }
 0x3d0   : > { %5537 = vmatmul.f32.vlgmr.msrb.gmra.mxu0 %v5462_v0  ;;  %v5463_v23 = vand.u32 4294901760, %v5462_v0 }
 0x3d1   : > { %5741 = vmatpush.msra.mxu3 %v10442_v17  ;;  %5768 = vmatpush.msrb.mxu0 %v10469_v34 }
 0x3d2   : > { %5564 = vmatmul.f32.vlgmr.msrb.gmra.mxu1 %v5463_v23  ;;  %v5464_v46 = vsub.f32 %v5462_v0, %v5463_v23 }
 0x3d3   : > { %5743 = vmatpush.msra.mxu3 %v10461_v30  ;;  %5772 = vmatpush.msrb.mxu0 %v10483_v51 }
 0x3d4   : > { %v5465_v38 = vand.u32 4294901760, %v5464_v46  ;;  %5799 = vmatpush.msrb.mxu1 %v10436_v13  ;;  %v12497_v46 = vld [vmem:[#allocation25_spill] sm:$0xff] }
 0x3d5   : > { %5745 = vmatpush.msra.mxu3 %v10471_v35  ;;  %5776 = vmatpush.msrb.mxu0 %v10510_v21 }
 0x3d6   : > { %5466 = vmatmul.f32.vlgmr.msra.gmra.mxu2 %v5465_v38  ;;  %5622 = vmatmul.f32.vlgmr.msrb.gmra.mxu3 %v11389_v44 }
 0x3d7   : > { %5801 = vmatpush.msrb.mxu1 %v10442_v17  ;;  %5710 = vmatpush.msra.mxu2 %v12356_v27 }
 0x3d8   : > { %5651 = vmatmul.f32.vlgmr.msra.gmra.mxu0 %v5465_v38  ;;  %5857 = vmatpush.msrb.mxu3 %v12357_v28 }
 0x3d9   : > { %5780 = vmatpush.msrb.mxu0 %v10527_v62  ;;  %5803 = vmatpush.msrb.mxu1 %v10461_v30 }
 0x3da   : > { %5692 = vmatmul.f32.vlgmr.msra.gmra.mxu1 %v11389_v44  ;;  %5713 = vmatpush.msra.mxu2 %v12358_v9 }
 0x3db   : > { %5805 = vmatpush.msrb.mxu1 %v10471_v35  ;;  %5863 = vmatpush.msrb.mxu3 %v10582_v54 }
 0x3dc   : > { %5895 = vmatpush.msra.mxu0 %v10498_v1  ;;  %5716 = vmatpush.msra.mxu2 %v12359_v61 }
 0x3dd   : > { %5869 = vmatpush.msrb.mxu3 %v10592_v8  ;;  %5924 = vmatpush.msra.mxu1 %v10473_v36 }
 0x3de   : > { %5597 = vmatmul.f32.vlgmr.msrb.gmra.mxu2 %v11389_v44  ;;  %5749 = vmatmul.f32.vlgmr.msra.gmra.mxu3 %v5463_v23 }
 0x3df   : > { %5898 = vmatpush.msra.mxu0 %v10513_v18  ;;  %5719 = vmatpush.msra.mxu2 %v12360_v26 }
 0x3e0   : > { %5782 = vmatmul.f32.vlgmr.msrb.gmra.mxu0 %v11389_v44  ;;  %5875 = vmatpush.msrb.mxu3 %v10599_v40 }
 0x3e1   : > { %5901 = vmatpush.msra.mxu0 %v10532_v33  ;;  %5926 = vmatpush.msra.mxu1 %v10485_v55 }
 0x3e2   : > { %5807 = vmatmul.f32.vlgmr.msrb.gmra.mxu1 %v11389_v44  ;;  %5824 = vmatpush.msrb.mxu2 %v10473_v36 }
 0x3e3   : > { %5904 = vmatpush.msra.mxu0 %v12484_v59  ;;  %5928 = vmatpush.msra.mxu1 %v12485_v16 }
 0x3e4   : > { %5984 = vmatpush.msra.mxu3 %v10473_v36  ;;  %5826 = vmatpush.msrb.mxu2 %v10485_v55 }
 0x3e5   : > { %5930 = vmatpush.msra.mxu1 %v12486_v57  ;;  %6071 = vmatpush.msrb.mxu0 %v12487_v41 }
 0x3e6   : > { %5722 = vmatmul.f32.vlgmr.msra.gmra.mxu2 %v5462_v0  ;;  %5877 = vmatmul.f32.vlgmr.msrb.gmra.mxu3 %v11389_v44 }
 0x3e7   : > { %5986 = vmatpush.msra.mxu3 %v10485_v55  ;;  %5828 = vmatpush.msrb.mxu2 %v12485_v16 }
 0x3e8   : > { %5907 = vmatmul.f32.vlgmr.msra.gmra.mxu0 %v5462_v0  ;;  %6102 = vmatpush.msrb.mxu1 %v12488_v39  ;;  %v9581_v0 = vld [vmem:[%s10231_s8 + $0x4] sm:$0x3] }
 0x3e9   : > { %5988 = vmatpush.msra.mxu3 %v12485_v16  ;;  %5830 = vmatpush.msrb.mxu2 %v12486_v57 }
 0x3ea   : > { %5934 = vmatmul.f32.vlgmr.msra.gmra.mxu1 %v5463_v23  ;;  %6073 = vmatpush.msrb.mxu0 %v12490_v48  ;;  %v12496_v23 = vld [vmem:[#allocation76_spill] sm:$0xff] }
 0x3eb   : > { %5953 = vmatpush.msra.mxu2 %v12489_v15  ;;  %5990 = vmatpush.msra.mxu3 %v12486_v57 }
 0x3ec   : > { %6108 = vmatpush.msrb.mxu1 %v12492_v22  ;;  %6182 = vmatpush.msra.mxu0 %v12493_v14 }
 0x3ed   : > { %5957 = vmatpush.msra.mxu2 %v12491_v37  ;;  %6155 = vmatpush.msrb.mxu3 %v12487_v41 }
 0x3ee   : > { %6207 = vmatpush.msra.mxu1 %v12487_v41  ;;  %5836 = vmatmul.f32.vlgmr.msrb.gmra.mxu2 %v5465_v38  ;;  %v12499_v38 = vld [vmem:[#allocation26_spill] sm:$0xff] }
 0x3ef   : > { %5992 = vmatmul.f32.vlgmr.msra.gmra.mxu3 %v11389_v44  ;;  %5961 = vmatpush.msra.mxu2 %v12494_v49 }
 0x3f0   : > { %6186 = vmatpush.msra.mxu0 %v12495_v3  ;;  %6209 = vmatpush.msra.mxu1 %v12490_v48 }
 0x3f1   : > { %6079 = vmatmul.f32.vlgmr.msrb.gmra.mxu0 %v6078_v11  ;;  %5965 = vmatpush.msra.mxu2 %v12496_v23  ;;  %v12502_v23 = vld [vmem:[#allocation24_spill] sm:$0xff] }
 0x3f2   : > { %6110 = vmatmul.f32.vlgmr.msrb.gmra.mxu1 %v11415_v31  ;;  %6291 = vmatpush.msrb.mxu0 %v12498_v25  ;;  %v12503_v25 = vld [vmem:[#allocation40_spill] sm:$0xff] }
 0x3f3   : > { %6130 = vmatpush.msrb.mxu2 %v12497_v46  ;;  %6049 = vperm.xlu2 %9677, %v9581_v0   ;;  %v12504_v0 = vld [vmem:[#allocation41_spill] sm:$0xff] }
 0x3f4   : > { %6157 = vmatpush.msrb.mxu3 %v12490_v48  ;;  %6294 = vmatpush.msrb.mxu0 %v12500_v60 }
 0x3f5   : > { %6133 = vmatpush.msrb.mxu2 %v12499_v38  ;;  %6316 = vmatpush.msrb.mxu1 %v12501_v58 }
 0x3f6   : > { %5967 = vmatmul.f32.vlgmr.msra.gmra.mxu2 %v11389_v44  ;;  %6263 = vmatpush.msra.mxu3 %v12503_v25  ;;  %v12505_v44 = vld [vmem:[#allocation53_spill] sm:$0xff]  ;;  %v12506_v25 = vld [vmem:[#allocation32_spill] sm:$0xff] }
 0x3f7   : > { %6161 = vmatmul.f32.vlgmr.msrb.gmra.mxu3 %v11436_v45  ;;  %6318 = vmatpush.msrb.mxu1 %v12502_v23 }
 0x3f8   : > { %6232 = vmatpush.msra.mxu2 %v12501_v58  ;;  %6269 = vmatpush.msra.mxu3 %v12504_v0  ;;  %v12507_v0 = vld [vmem:[#allocation33_spill] sm:$0xff] }
 0x3f9   : > { %6188 = vmatmul.f32.vlgmr.msra.gmra.mxu0 %v11415_v31 }
 0x3fa   : > { %6234 = vmatpush.msra.mxu2 %v12502_v23  ;;  %6393 = vmatpush.msra.mxu0 %v12459_v6 }
 0x3fb   : > { %6211 = vmatmul.f32.vlgmr.msra.gmra.mxu1 %v11415_v31  ;;  %6368 = vmatpush.msrb.mxu3 %v12501_v58 }
 0x3fc   : > { %6395 = vmatpush.msra.mxu0 %v12461_v52  ;;  %6424 = vmatpush.msra.mxu1 %v12505_v44 }
 0x3fd   : > { %6370 = vmatpush.msrb.mxu3 %v12502_v23 }
 0x3fe   : > { %6430 = vmatpush.msra.mxu1 %v12457_v10  ;;  %6136 = vmatmul.f32.vlgmr.msrb.gmra.mxu2 %v11425_v20 }
 0x3ff   : > { %6271 = vmatmul.f32.vlgmr.msra.gmra.mxu3 %v11415_v31  ;;  %6343 = vmatpush.msrb.mxu2 %v12506_v25 }
 0x400   : > { %6477 = vmatpush.msra.mxu3 %v12459_v6 }
 0x401   : > { %6297 = vmatmul.f32.vlgmr.msrb.gmra.mxu0 %v11425_v20  ;;  %6347 = vmatpush.msrb.mxu2 %v12507_v0  ;;  %v12508_v0 = vld [vmem:[#allocation42_spill] sm:$0xff] }
 0x402   : > { %6504 = vmatpush.msrb.mxu0 %v12466_v50  ;;  %6479 = vmatpush.msra.mxu3 %v12461_v52 }
 0x403   : > { %6322 = vmatmul.f32.vlgmr.msrb.gmra.mxu1 %v11436_v45 }
 0x404   : > { %6508 = vmatpush.msrb.mxu0 %v12468_v47  ;;  %6529 = vmatpush.msrb.mxu1 %v12459_v6 }
 0x406   : > { %6531 = vmatpush.msrb.mxu1 %v12461_v52  ;;  %6240 = vmatmul.f32.vlgmr.msra.gmra.mxu2 %v6078_v11  ;;  %v11548_v52 = vld [vmem:[%s10261_s13 + $0x1] ss:$0 sm:$0xff] }
 0x407   : > { %6372 = vmatmul.f32.vlgmr.msrb.gmra.mxu3 %v11415_v31  ;;  %6452 = vmatpush.msra.mxu2 %v12458_v24  ;;  %12518 = vst [vmem:[#allocation63_spill] sm:$0xff] %v11548_v52 }
 0x408   : > { %6587 = vmatpush.msrb.mxu3 %v12463_v56 }
 0x409   : > { %6401 = vmatmul.f32.vlgmr.msra.gmra.mxu0 %v6078_v11  ;;  %6455 = vmatpush.msra.mxu2 %v12508_v0  ;;  %v12511_v11 = vld [vmem:[#allocation49_spill] sm:$0xff]  ;;  %v4950_v0 = vpop.permute.xlu2 %4949 }
 0x40a   : > { %6593 = vmatpush.msrb.mxu3 %v12465_v32  ;;  %6625 = vmatpush.msra.mxu0 %v12472_v43  ;;  %v5116_v6 = vmul.f32 %v11548_v52, %v4950_v0 }
 0x40b   : > { %6432 = vmatmul.f32.vlgmr.msra.gmra.mxu1 %v11415_v31 }
 0x40c   : > { %6599 = vmatpush.msrb.mxu3 %v12467_v42  ;;  %6654 = vmatpush.msra.mxu1 %v12462_v12 }
 0x40d   : > { %6628 = vmatpush.msra.mxu0 %v12474_v19 }
 0x40e   : > { %6605 = vmatpush.msrb.mxu3 %v12469_v2  ;;  %6656 = vmatpush.msra.mxu1 %v12464_v5  ;;  %v5062_v2 = vpop.f32.mrf.mxu3 }
 0x40f   : > { %6349 = vmatmul.f32.vlgmr.msrb.gmra.mxu2 %v11415_v31  ;;  %6483 = vmatmul.f32.vlgmr.msra.gmra.mxu3 %v11436_v45  ;;  %v12509_v45 = vld [vmem:[#allocation68_spill] sm:$0xff] }
 0x410   : > { %6631 = vmatpush.msra.mxu0 %v12477_v7  ;;  %6554 = vmatpush.msrb.mxu2 %v12462_v12  ;;  %v12516_v7 = vld [vmem:[#allocation56_spill] sm:$0xff] }
 0x411   : > { %6510 = vmatmul.f32.vlgmr.msrb.gmra.mxu0 %v11415_v31  ;;  %6658 = vmatpush.msra.mxu1 %v12470_v53 }
 0x412   : > { %6634 = vmatpush.msra.mxu0 %v12480_v63  ;;  %6714 = vmatpush.msra.mxu3 %v12462_v12  ;;  %v12512_v63 = vld [vmem:[#allocation75_spill] sm:$0xff] }
 0x413   : > { %6533 = vmatmul.f32.vlgmr.msrb.gmra.mxu1 %v11415_v31  ;;  %6556 = vmatpush.msrb.mxu2 %v12464_v5  ;;  %v12510_v31 = vld [vmem:[#allocation71_spill] sm:$0xff] }
 0x414   : > { %6660 = vmatpush.msra.mxu1 %v12471_v4  ;;  %6716 = vmatpush.msra.mxu3 %v12464_v5  ;;  %v5011_v5 = vpop.f32.mrf.mxu1 }
 0x415   : > { %6739 = vmatpush.msrb.mxu0 %v10436_v13  ;;  %6558 = vmatpush.msrb.mxu2 %v12470_v53 }
 0x416   : > { %6718 = vmatpush.msra.mxu3 %v12470_v53  ;;  %6772 = vmatpush.msrb.mxu1 %v12509_v45  ;;  %v12513_v53 = vld [vmem:[#allocation51_spill] sm:$0xff]  ;;  %v12514_v45 = vld [vmem:[#allocation78_spill] sm:$0xff] }
 0x417   : > { %6458 = vmatmul.f32.vlgmr.msra.gmra.mxu2 %v11425_v20  ;;  %6741 = vmatpush.msrb.mxu0 %v10442_v17  ;;  %v12515_v20 = vld [vmem:[#allocation54_spill] sm:$0xff] }
 0x418   : > { %6560 = vmatpush.msrb.mxu2 %v12471_v4  ;;  %6720 = vmatpush.msra.mxu3 %v12471_v4  ;;  %v4980_v4 = vpop.f32.mrf.mxu0 }
 0x419   : > { %6743 = vmatpush.msrb.mxu0 %v10461_v30  ;;  %6778 = vmatpush.msrb.mxu1 %v12510_v31  ;;  %v5037_v31 = vpop.f32.mrf.mxu2 }
 0x41a   : > { %6683 = vmatpush.msra.mxu2 %v12511_v11  ;;  %v5172_v11 = vpop.f32.mrf.mxu3 }
 0x41b   : > { %6745 = vmatpush.msrb.mxu0 %v10471_v35  ;;  %6784 = vmatpush.msrb.mxu1 %v12512_v63 }
 0x41c   : > { %6687 = vmatpush.msra.mxu2 %v12513_v53  ;;  %v5112_v12 = vpop.f32.mrf.mxu1 }
 0x41d   : > { %6790 = vmatpush.msrb.mxu1 %v12514_v45 }
 0x41e   : > { %6691 = vmatpush.msra.mxu2 %v12515_v20  ;;  %v11538_v20 = vld [vmem:[%s10261_s13] ss:$0 sm:$0xff] }
 0x41f   : > { %12517 = vst [vmem:[#allocation62_spill] sm:$0xff] %v11538_v20 }
 0x420   : > { %6695 = vmatpush.msra.mxu2 %v12516_v7  ;;  %v5089_v19 = vpop.f32.mrf.mxu0  ;;  %v4952_v7 = vmul.f32 %v11538_v20, %v4950_v0  ;;  %v11552_v20 = vld [vmem:[%s10215_s18] ss:$0 sm:$0xff] }
 0x421   : > { %v5141_v43 = vpop.f32.mrf.mxu2 }
 0x422   : > { %v5273_v32 = vpop.f32.mrf.mxu3  ;;  %v4981_v47 = vadd.f32 %v4980_v4, %v4952_v7  ;;  %v5142_v46 = vadd.f32 %v5141_v43, %v5116_v6 }
 0x424   : > { %v5223_v63 = vpop.f32.mrf.mxu1  ;;  %v5012_v10 = vadd.f32 %v5011_v5, %v4981_v47  ;;  %v5173_v47 = vadd.f32 %v5172_v11, %v5142_v46 }
 0x426   : > { %v5038_v23 = vadd.f32 %v5037_v31, %v5012_v10 }
 0x428   : > { %v5198_v42 = vpop.f32.mrf.mxu0  ;;  %v5063_v38 = vadd.f32 %v5062_v2, %v5038_v23  ;;  %v11556_v23 = vld [vmem:[%s10215_s18 + $0x1] ss:$0 sm:$0xff] }
 0x429   : > { %v5250_v45 = vpop.f32.mrf.mxu2  ;;  %v5199_v52 = vadd.f32 %v5198_v42, %v5173_v47 }
 0x42a   : > { %v11541_v24 = vpop.f32.mrf.mxu3  ;;  %v5090_v5 = vadd.f32 %v5089_v19, %v5063_v38 }
 0x42b   : > { %v5224_v43 = vadd.f32 %v5223_v63, %v5199_v52 }
 0x42c   : > { %v5333_v56 = vpop.f32.mrf.mxu1  ;;  %v5113_v37 = vadd.f32 %v5112_v12, %v5090_v5 }
 0x430   : > { %v5302_v53 = vpop.f32.mrf.mxu0 }
 0x431   : > { %v5359_v25 = vpop.f32.mrf.mxu2 }
 0x434   : > { %v11545_v44 = vpop.f32.mrf.mxu1 }
 0x438   : > { %v11543_v50 = vpop.f32.mrf.mxu0 }
 0x44d   : > { %v5538_v58 = vpop.f32.mrf.mxu0 }
 0x44f   : > { %v5565_v7 = vpop.f32.mrf.mxu1 }
 0x451   : > { %v5508_v60 = vpop.f32.mrf.mxu3 }
 0x455   : > { %v5652_v31 = vpop.f32.mrf.mxu0 }
 0x456   : > { %v5653_v48 = vadd.f32 %v11556_v23, %v5652_v31 }
 0x457   : > { %v5693_v38 = vpop.f32.mrf.mxu1 }
 0x458   : > { %v5694_v42 = vadd.f32 %v5693_v38, %v5653_v48 }
 0x459   : > { %v5467_v3 = vpop.f32.mrf.mxu2  ;;  %v5623_v22 = vpop.f32.mrf.mxu3 }
 0x45a   : > { %v5468_v4 = vadd.f32 %v11552_v20, %v5467_v3  ;;  %v11560_v3 = vld [vmem:[%s10205_s30] ss:$0 sm:$0xff] }
 0x45b   : > { %v5115_v19 = vadd.f32 %v11560_v3, %v5113_v37 }
 0x45c   : > { %v5509_v49 = vadd.f32 %v5508_v60, %v5468_v4  ;;  %v5251_v60 = vadd.f32 %v5250_v45, %v5224_v43  ;;  %v11568_v45 = vld [vmem:[%s10205_s30 + $0x1] ss:$0 sm:$0xff] }
 0x45d   : > { %v5783_v4 = vpop.f32.mrf.mxu0 }
 0x45e   : > { %v5539_v14 = vadd.f32 %v5538_v58, %v5509_v49 }
 0x45f   : > { %v5808_v47 = vpop.f32.mrf.mxu1 }
 0x460   : > { %v5566_v10 = vadd.f32 %v5565_v7, %v5539_v14  ;;  %v11564_v14 = vld [vmem:[%s10261_s13 + $0x2] ss:$0 sm:$0xff]  ;;  %v5274_v7 = vadd.f32 %v5273_v32, %v5251_v60 }
 0x461   : > { %v5598_v2 = vpop.f32.mrf.mxu2  ;;  %v5277_v58 = vmul.f32 %v11564_v14, %v4950_v0  ;;  %v5750_v52 = vpop.f32.mrf.mxu3 }
 0x462   : > { %v5599_v6 = vadd.f32 %v5598_v2, %v5566_v10  ;;  %v5276_v48 = vadd.f32 %v11568_v45, %v5274_v7 }
 0x463   : > { %v5303_v37 = vadd.f32 %v5302_v53, %v5277_v58 }
 0x464   : > { %v5624_v46 = vadd.f32 %v5623_v22, %v5599_v6 }
 0x465   : > { %v5334_v2 = vadd.f32 %v5333_v56, %v5303_v37  ;;  %v5908_v60 = vpop.f32.mrf.mxu0 }
 0x466   : > { %v5996_v49 = vadd.f32 %v5624_v46, %v5115_v19  ;;  %v11572_v19 = vld [vmem:[%s10215_s18 + $0x2] ss:$0 sm:$0xff] }
 0x468   : > { %v9578_v12 = vmul.f32 -1.442695, %v5996_v49  ;;  %v5360_v49 = vadd.f32 %v5359_v25, %v5334_v2 }
 0x469   : > { %v5723_v63 = vpop.f32.mrf.mxu2  ;;  %v5878_v32 = vpop.f32.mrf.mxu3 }
 0x46a   : > { %9727 = vpow2.f32 %v9578_v12  ;;  %v5724_v11 = vadd.f32 %v5723_v63, %v5694_v42  ;;  %v5385_v58 = vadd.f32 %v11541_v24, %v5360_v49 }
 0x46c   : > { %v5751_v5 = vadd.f32 %v5750_v52, %v5724_v11  ;;  %v5935_v52 = vpop.f32.mrf.mxu1 }
 0x46e   : > { %v5784_v22 = vadd.f32 %v5783_v4, %v5751_v5  ;;  %v5412_v5 = vadd.f32 %v11543_v50, %v5385_v58 }
 0x470   : > { %v9728_v10 = vpop.eup %9727  ;;  %v5809_v31 = vadd.f32 %v5808_v47, %v5784_v22  ;;  %v5435_v24 = vadd.f32 %v11545_v44, %v5412_v5 }
 0x471   : > { %v6000_v6 = vadd.f32 1.0, %v9728_v10  ;;  %v5837_v0 = vpop.f32.mrf.mxu2 }
 0x472   : > { %v6016_v43 = vadd.f32 %v5809_v31, %v5276_v48  ;;  %v5838_v46 = vadd.f32 %v11572_v19, %v5837_v0  ;;  %v5993_v31 = vpop.f32.mrf.mxu3 }
 0x473   : > { %9729 = vrcp.f32 %v6000_v6  ;;  %v6012_v22 = vand.u32 2147483648, %v6000_v6  ;;  %v6010_v25 = vand.u32 2147483647, %v6000_v6  ;;  %vm6006_vm6 = vweird.f32 %v6000_v6 }
 0x474   : > { %v9579_v38 = vmul.f32 -1.442695, %v6016_v43  ;;  %v5879_v53 = vadd.f32 %v5878_v32, %v5838_v46 }
 0x475   : > { %v6013_v2 = vor.u32 1.1754944e-38, %v6012_v22  ;;  %vm6011_vm8 = vcmp.eq.f32.partialorder %v6010_v25, 8.507059e+37 }
 0x476   : > { %9731 = vpow2.f32 %v9579_v38  ;;  %v5909_v42 = vadd.f32 %v5908_v60, %v5879_v53  ;;  %v11579_v38 = vld [vmem:[%s10205_s30 + $0x2] ss:$0 sm:$0xff] }
 0x477   : > { %v5437_v53 = vadd.f32 %v11579_v38, %v5435_v24  ;;  %v9584_v24 = vld [vmem:[%s10226_s7 + $0x2] sm:$0x3] }
 0x478   : > { %v5936_v56 = vadd.f32 %v5935_v52, %v5909_v42 }
 0x479   : > { %v9730_v12 = vpop.eup %9729  ;;  %v5968_v11 = vpop.f32.mrf.mxu2 }
 0x47a   : > { %v6002_v63 = vmul.f32 %v9730_v12, %v6000_v6  ;;  %v5969_v47 = vadd.f32 %v5968_v11, %v5936_v56  ;;  %vm6007_vm5 = vweird.f32 %v9730_v12 }
 0x47b   : > { %vm6008_vm7 = vmor %vm6006_vm6, %vm6007_vm5 }
 0x47c   : > { %v9732_v4 = vpop.eup %9731  ;;  %v6003_v7 = vsub.f32 1.0, %v6002_v63  ;;  %v5994_v0 = vadd.f32 %v5993_v31, %v5969_v47  ;;  %v7154_v31 = vsel %vm527_vm0, %v9584_v24, 0  ;;  %v12541_v24 = vld [vmem:[#allocation47_spill] sm:$0xff] }
 0x47d   : > { %v6020_v37 = vadd.f32 1.0, %v9732_v4 }
 0x47e   : > { %v6004_v10 = vmul.f32 %v9730_v12, %v6003_v7 }
 0x47f   : > { %9733 = vrcp.f32 %v6020_v37  ;;  %v6032_v58 = vand.u32 2147483648, %v6020_v37  ;;  %v6030_v44 = vand.u32 2147483647, %v6020_v37  ;;  %vm6026_vm11 = vweird.f32 %v6020_v37 }
 0x480   : > { %v6005_v48 = vadd.f32 %v9730_v12, %v6004_v10 }
 0x481   : > { %vm6031_vm13 = vcmp.eq.f32.partialorder %v6030_v44, 8.507059e+37  ;;  %v12526_v44 = vld [vmem:[#allocation25_spill] sm:$0xff] }
 0x482   : > { %v6009_v43 = vsel %vm6008_vm7, %v9730_v12, %v6005_v48  ;;  %v6033_v12 = vor.u32 1.1754944e-38, %v6032_v58  ;;  %v12524_v58 = vld [vmem:[#allocation31_spill] sm:$0xff] }
 0x483   : > { %v6014_v46 = vsel %vm6011_vm8, %v6013_v2, %v6009_v43  ;;  %v11613_v2 = vand.u32 4294901760, %v7154_v31 }
 0x484   : > { %v6036_v50 = vmul.f32 %v6014_v46, %v5994_v0 }
 0x485   : > { %v9734_v32 = vpop.eup %9733  ;;  %v11623_v0 = vsub.f32 %v7154_v31, %v11613_v2  ;;  %v12542_v31 = vld [vmem:[#allocation35_spill] sm:$0xff] }
 0x486   : > { %v6022_v49 = vmul.f32 %v9734_v32, %v6020_v37  ;;  %v6037_v60 = vadd.f32 %v6036_v50, %v5437_v53  ;;  %vm6027_vm10 = vweird.f32 %v9734_v32  ;;  %v12519_v50 = vld [vmem:[#allocation22_spill] sm:$0xff]  ;;  %v12520_v53 = vld [vmem:[#allocation72_spill] sm:$0xff] }
 0x487   : > { %vm6028_vm12 = vmor %vm6026_vm11, %vm6027_vm10  ;;  %v11634_v43 = vand.u32 4294901760, %v11623_v0 }
 0x488   : > { %v6023_v42 = vsub.f32 1.0, %v6022_v49  ;;  %9735 = vtanh.f32 %v6037_v60  ;;  %v12521_v49 = vld [vmem:[#allocation38_spill] sm:$0xff] }
 0x489   : > { %v7177_v46 = vsub.f32 %v11623_v0, %v11634_v43  ;;  %v12522_v60 = vld [vmem:[#allocation30_spill] sm:$0xff] }
 0x48a   : > { %v6024_v6 = vmul.f32 %v9734_v32, %v6023_v42  ;;  %v12523_v42 = vld [vmem:[#allocation74_spill] sm:$0xff] }
 0x48c   : > { %v6025_v52 = vadd.f32 %v9734_v32, %v6024_v6  ;;  %v12525_v6 = vld [vmem:[#allocation76_spill] sm:$0xff] }
 0x48e   : > { %v6029_v56 = vsel %vm6028_vm12, %v9734_v32, %v6025_v52  ;;  %v9736_v4 = vpop.eup %9735  ;;  %v7178_v32 = vand.u32 4294901760, %v7177_v46  ;;  %v12527_v52 = vld [vmem:[#allocation28_spill] sm:$0xff]  ;;  %v12543_v46 = vld [vmem:[#allocation57_spill] sm:$0xff] }
 0x48f   : > { %v6034_v63 = vsel %vm6031_vm13, %v6033_v12, %v6029_v56  ;;  %v12528_v12 = vld [vmem:[#allocation26_spill] sm:$0xff]  ;;  %v12529_v56 = vld [vmem:[#allocation23_spill] sm:$0xff] }
 0x490   : > { %v6039_v11 = vsub.f32 1.0, %v6034_v63  ;;  %v6041_v5 = vmul.f32 %v6034_v63, %v11385_v29  ;;  %v12530_v63 = vld [vmem:[#allocation29_spill] sm:$0xff] }
 0x492   : > { %v6040_v7 = vmul.f32 %v9736_v4, %v6039_v11  ;;  %v12531_v11 = vld [vmem:[#allocation40_spill] sm:$0xff] }
 0x493   : > { %v12532_v4 = vld [vmem:[#allocation24_spill] sm:$0xff] }
 0x494   : > { %v11583_v22 = vadd.f32 %v6041_v5, %v6040_v7  ;;  %v12533_v7 = vld [vmem:[#allocation41_spill] sm:$0xff]  ;;  %v12534_v5 = vld [vmem:[#allocation27_spill] sm:$0xff] }
 0x496   : > { %v6539_v47 = vsel %vm1031_vm9, %v11583_v22, 0 }
 0x497   : > { %v11587_v10 = vand.u32 4294901760, %v6539_v47 }
 0x499   : > { %6607 = vmatmul.f32.vlgmr.msrb.gmra.mxu3 %v11587_v10  ;;  %v6562_v37 = vsub.f32 %v6539_v47, %v11587_v10  ;;  %v12535_v47 = vld [vmem:[#allocation34_spill] sm:$0xff] }
 0x49a   : > { %6839 = vmatpush.msrb.mxu3 %v10436_v13 }
 0x49b   : > { %6637 = vmatmul.f32.vlgmr.msra.gmra.mxu0 %v6562_v37  ;;  %v6563_v25 = vand.u32 4294901760, %v6562_v37 }
 0x49c   : > { %6841 = vmatpush.msrb.mxu3 %v10442_v17  ;;  %6868 = vmatpush.msra.mxu0 %v10469_v34 }
 0x49d   : > { %6664 = vmatmul.f32.vlgmr.msra.gmra.mxu1 %v6563_v25  ;;  %v6564_v29 = vsub.f32 %v6562_v37, %v6563_v25 }
 0x49e   : > { %6843 = vmatpush.msrb.mxu3 %v10461_v30  ;;  %6872 = vmatpush.msra.mxu0 %v10483_v51 }
 0x49f   : > { %v6565_v48 = vand.u32 4294901760, %v6564_v29  ;;  %6899 = vmatpush.msra.mxu1 %v10436_v13  ;;  %v12539_v29 = vld [vmem:[#allocation33_spill] sm:$0xff] }
 0x4a0   : > { %6845 = vmatpush.msrb.mxu3 %v10471_v35  ;;  %6876 = vmatpush.msra.mxu0 %v10510_v21 }
 0x4a1   : > { %6566 = vmatmul.f32.vlgmr.msrb.gmra.mxu2 %v6565_v48  ;;  %6722 = vmatmul.f32.vlgmr.msra.gmra.mxu3 %v11587_v10 }
 0x4a2   : > { %6901 = vmatpush.msra.mxu1 %v10442_v17  ;;  %6810 = vmatpush.msrb.mxu2 %v12356_v27 }
 0x4a3   : > { %6751 = vmatmul.f32.vlgmr.msrb.gmra.mxu0 %v6565_v48  ;;  %6957 = vmatpush.msra.mxu3 %v12357_v28 }
 0x4a4   : > { %6880 = vmatpush.msra.mxu0 %v10527_v62  ;;  %6903 = vmatpush.msra.mxu1 %v10461_v30 }
 0x4a5   : > { %6792 = vmatmul.f32.vlgmr.msrb.gmra.mxu1 %v11587_v10  ;;  %6813 = vmatpush.msrb.mxu2 %v12358_v9 }
 0x4a6   : > { %6905 = vmatpush.msra.mxu1 %v10471_v35  ;;  %6963 = vmatpush.msra.mxu3 %v10582_v54 }
 0x4a7   : > { %6995 = vmatpush.msrb.mxu0 %v10498_v1  ;;  %6816 = vmatpush.msrb.mxu2 %v12359_v61 }
 0x4a8   : > { %6969 = vmatpush.msra.mxu3 %v10592_v8  ;;  %7024 = vmatpush.msrb.mxu1 %v10473_v36 }
 0x4a9   : > { %6697 = vmatmul.f32.vlgmr.msra.gmra.mxu2 %v11587_v10  ;;  %6849 = vmatmul.f32.vlgmr.msrb.gmra.mxu3 %v6563_v25 }
 0x4aa   : > { %6998 = vmatpush.msrb.mxu0 %v10513_v18  ;;  %6819 = vmatpush.msrb.mxu2 %v12360_v26 }
 0x4ab   : > { %6882 = vmatmul.f32.vlgmr.msra.gmra.mxu0 %v11587_v10  ;;  %6975 = vmatpush.msra.mxu3 %v10599_v40 }
 0x4ac   : > { %7001 = vmatpush.msrb.mxu0 %v10532_v33  ;;  %7026 = vmatpush.msrb.mxu1 %v10485_v55 }
 0x4ad   : > { %6907 = vmatmul.f32.vlgmr.msra.gmra.mxu1 %v11587_v10  ;;  %6924 = vmatpush.msra.mxu2 %v10473_v36 }
 0x4ae   : > { %7004 = vmatpush.msrb.mxu0 %v12484_v59  ;;  %7028 = vmatpush.msrb.mxu1 %v12485_v16 }
 0x4af   : > { %7084 = vmatpush.msrb.mxu3 %v10473_v36  ;;  %6926 = vmatpush.msra.mxu2 %v10485_v55 }
 0x4b0   : > { %7030 = vmatpush.msrb.mxu1 %v12486_v57  ;;  %7171 = vmatpush.msra.mxu0 %v12487_v41 }
 0x4b1   : > { %6822 = vmatmul.f32.vlgmr.msrb.gmra.mxu2 %v6562_v37  ;;  %6977 = vmatmul.f32.vlgmr.msra.gmra.mxu3 %v11587_v10 }
 0x4b2   : > { %7086 = vmatpush.msrb.mxu3 %v10485_v55  ;;  %6928 = vmatpush.msra.mxu2 %v12485_v16 }
 0x4b3   : > { %7007 = vmatmul.f32.vlgmr.msrb.gmra.mxu0 %v6562_v37  ;;  %7202 = vmatpush.msra.mxu1 %v12488_v39  ;;  %v12537_v37 = vld [vmem:[#allocation55_spill] sm:$0xff] }
 0x4b4   : > { %7088 = vmatpush.msrb.mxu3 %v12485_v16  ;;  %6930 = vmatpush.msra.mxu2 %v12486_v57 }
 0x4b5   : > { %7034 = vmatmul.f32.vlgmr.msrb.gmra.mxu1 %v6563_v25  ;;  %7173 = vmatpush.msra.mxu0 %v12519_v50  ;;  %v12538_v25 = vld [vmem:[#allocation32_spill] sm:$0xff] }
 0x4b6   : > { %7053 = vmatpush.msrb.mxu2 %v12489_v15  ;;  %7090 = vmatpush.msrb.mxu3 %v12486_v57 }
 0x4b7   : > { %7208 = vmatpush.msra.mxu1 %v12521_v49  ;;  %7282 = vmatpush.msrb.mxu0 %v12522_v60  ;;  %v12565_v60 = vld [vmem:[#allocation63_spill] sm:$0xff] }
 0x4b8   : > { %7057 = vmatpush.msrb.mxu2 %v12520_v53  ;;  %7255 = vmatpush.msra.mxu3 %v12487_v41 }
 0x4b9   : > { %7307 = vmatpush.msrb.mxu1 %v12487_v41  ;;  %6936 = vmatmul.f32.vlgmr.msra.gmra.mxu2 %v6565_v48  ;;  %v12540_v48 = vld [vmem:[#allocation43_spill] sm:$0xff] }
 0x4ba   : > { %7092 = vmatmul.f32.vlgmr.msrb.gmra.mxu3 %v11587_v10  ;;  %7061 = vmatpush.msrb.mxu2 %v12523_v42 }
 0x4bb   : > { %7286 = vmatpush.msrb.mxu0 %v12524_v58  ;;  %7309 = vmatpush.msrb.mxu1 %v12519_v50 }
 0x4bc   : > { %7179 = vmatmul.f32.vlgmr.msra.gmra.mxu0 %v7178_v32  ;;  %7065 = vmatpush.msrb.mxu2 %v12525_v6 }
 0x4bd   : > { %7210 = vmatmul.f32.vlgmr.msra.gmra.mxu1 %v11613_v2  ;;  %7391 = vmatpush.msra.mxu0 %v12527_v52 }
 0x4be   : > { %7230 = vmatpush.msra.mxu2 %v12526_v44  ;;  %7257 = vmatpush.msra.mxu3 %v12519_v50 }
 0x4bf   : > { %7416 = vmatpush.msra.mxu1 %v12529_v56  ;;  %7394 = vmatpush.msra.mxu0 %v12530_v63 }
 0x4c0   : > { %7233 = vmatpush.msra.mxu2 %v12528_v12  ;;  %7363 = vmatpush.msrb.mxu3 %v12531_v11 }
 0x4c1   : > { %7067 = vmatmul.f32.vlgmr.msrb.gmra.mxu2 %v11587_v10  ;;  %7418 = vmatpush.msra.mxu1 %v12532_v4  ;;  %v12536_v10 = vld [vmem:[#allocation53_spill] sm:$0xff] }
 0x4c2   : > { %7261 = vmatmul.f32.vlgmr.msra.gmra.mxu3 %v11634_v43  ;;  %7332 = vmatpush.msrb.mxu2 %v12529_v56 }
 0x4c3   : > { %7369 = vmatpush.msrb.mxu3 %v12533_v7 }
 0x4c4   : > { %7288 = vmatmul.f32.vlgmr.msrb.gmra.mxu0 %v11613_v2  ;;  %7334 = vmatpush.msrb.mxu2 %v12532_v4 }
 0x4c5   : > { %7493 = vmatpush.msrb.mxu0 %v12534_v5  ;;  %7311 = vmatmul.f32.vlgmr.msrb.gmra.mxu1 %v11613_v2 }
 0x4c6   : > { %7468 = vmatpush.msra.mxu3 %v12529_v56  ;;  %7524 = vmatpush.msrb.mxu1 %v12536_v10  ;;  %v12549_v10 = vld [vmem:[#allocation46_spill] sm:$0xff] }
 0x4c7   : > { %7495 = vmatpush.msrb.mxu0 %v12535_v47 }
 0x4c8   : > { %7470 = vmatpush.msra.mxu3 %v12532_v4  ;;  %7530 = vmatpush.msrb.mxu1 %v12537_v37  ;;  %v12547_v37 = vld [vmem:[#allocation59_spill] sm:$0xff] }
 0x4c9   : > { %7236 = vmatmul.f32.vlgmr.msra.gmra.mxu2 %v11623_v0 }
 0x4ca   : > { %7371 = vmatmul.f32.vlgmr.msrb.gmra.mxu3 %v11613_v2  ;;  %7443 = vmatpush.msra.mxu2 %v12538_v25  ;;  %v12545_v25 = vld [vmem:[#allocation58_spill] sm:$0xff] }
 0x4cb   : > { %7577 = vmatpush.msrb.mxu3 %v12534_v5 }
 0x4cc   : > { %7397 = vmatmul.f32.vlgmr.msra.gmra.mxu0 %v11623_v0  ;;  %7447 = vmatpush.msra.mxu2 %v12539_v29  ;;  %v12544_v29 = vld [vmem:[#allocation42_spill] sm:$0xff] }
 0x4cd   : > { %7579 = vmatpush.msrb.mxu3 %v12535_v47  ;;  %7422 = vmatmul.f32.vlgmr.msra.gmra.mxu1 %v11634_v43 }
 0x4ce   : > { %7604 = vmatpush.msra.mxu0 %v12540_v48  ;;  %7629 = vmatpush.msra.mxu1 %v12534_v5  ;;  %v12546_v48 = vld [vmem:[#allocation44_spill] sm:$0xff] }
 0x4d0   : > { %7608 = vmatpush.msra.mxu0 %v12541_v24  ;;  %7631 = vmatpush.msra.mxu1 %v12535_v47  ;;  %v12548_v24 = vld [vmem:[#allocation36_spill] sm:$0xff] }
 0x4d1   : > { %7340 = vmatmul.f32.vlgmr.msrb.gmra.mxu2 %v7178_v32  ;;  %v12550_v47 = vld [vmem:[#allocation60_spill] sm:$0xff] }
 0x4d2   : > { %7472 = vmatmul.f32.vlgmr.msra.gmra.mxu3 %v11613_v2  ;;  %7552 = vmatpush.msrb.mxu2 %v12542_v31  ;;  %v12551_v31 = vld [vmem:[#allocation39_spill] sm:$0xff] }
 0x4d3   : > { %7687 = vmatpush.msra.mxu3 %v12543_v46 }
 0x4d4   : > { %7501 = vmatmul.f32.vlgmr.msrb.gmra.mxu0 %v7178_v32  ;;  %7555 = vmatpush.msrb.mxu2 %v12544_v29  ;;  %v12552_v32 = vld [vmem:[#allocation50_spill] sm:$0xff]  ;;  %v6137_v29 = vpop.f32.mrf.mxu2 }
 0x4d5   : > { %7693 = vmatpush.msra.mxu3 %v12545_v25  ;;  %7532 = vmatmul.f32.vlgmr.msrb.gmra.mxu1 %v11613_v2 }
 0x4d6   : > { %7725 = vmatpush.msrb.mxu0 %v12546_v48  ;;  %7754 = vmatpush.msrb.mxu1 %v12548_v24  ;;  %v12553_v48 = vld [vmem:[#allocation45_spill] sm:$0xff] }
 0x4d7   : > { %7699 = vmatpush.msra.mxu3 %v12547_v37  ;;  %v12554_v37 = vld [vmem:[#allocation52_spill] sm:$0xff] }
 0x4d8   : > { %7728 = vmatpush.msrb.mxu0 %v12549_v10  ;;  %7756 = vmatpush.msrb.mxu1 %v12551_v31  ;;  %v6080_v10 = vpop.f32.mrf.mxu0 }
 0x4d9   : > { %7705 = vmatpush.msra.mxu3 %v12550_v47  ;;  %7449 = vmatmul.f32.vlgmr.msra.gmra.mxu2 %v11613_v2  ;;  %v12555_v47 = vld [vmem:[#allocation48_spill] sm:$0xff] }
 0x4da   : > { %7583 = vmatmul.f32.vlgmr.msrb.gmra.mxu3 %v11634_v43  ;;  %7731 = vmatpush.msrb.mxu0 %v12552_v32  ;;  %v12556_v43 = vld [vmem:[#allocation68_spill] sm:$0xff]  ;;  %v12559_v32 = vld [vmem:[#allocation75_spill] sm:$0xff] }
 0x4db   : > { %7654 = vmatpush.msra.mxu2 %v12548_v24  ;;  %7758 = vmatpush.msrb.mxu1 %v12553_v48 }
 0x4dc   : > { %7610 = vmatmul.f32.vlgmr.msra.gmra.mxu0 %v11613_v2  ;;  %7814 = vmatpush.msrb.mxu3 %v12548_v24  ;;  %v6162_v24 = vpop.f32.mrf.mxu3  ;;  %v6241_v5 = vpop.f32.mrf.mxu2 }
 0x4dd   : > { %7734 = vmatpush.msrb.mxu0 %v12554_v37  ;;  %7633 = vmatmul.f32.vlgmr.msra.gmra.mxu1 %v11613_v2  ;;  %v12557_v2 = vld [vmem:[#allocation71_spill] sm:$0xff]  ;;  %v12558_v37 = vld [vmem:[#allocation49_spill] sm:$0xff] }
 0x4de   : > { %7656 = vmatpush.msra.mxu2 %v12551_v31  ;;  %7760 = vmatpush.msrb.mxu1 %v12555_v47 }
 0x4df   : > { %7816 = vmatpush.msrb.mxu3 %v12551_v31  ;;  %7839 = vmatpush.msra.mxu0 %v10436_v13  ;;  %v12563_v31 = vld [vmem:[#allocation56_spill] sm:$0xff] }
 0x4e0   : > { %7658 = vmatpush.msra.mxu2 %v12553_v48  ;;  %7872 = vmatpush.msra.mxu1 %v12556_v43  ;;  %v12561_v43 = vld [vmem:[#allocation78_spill] sm:$0xff]  ;;  %v6189_v25 = vpop.f32.mrf.mxu0 }
 0x4e1   : > { %7818 = vmatpush.msrb.mxu3 %v12553_v48  ;;  %7558 = vmatmul.f32.vlgmr.msrb.gmra.mxu2 %v11623_v0  ;;  %v12560_v48 = vld [vmem:[#allocation51_spill] sm:$0xff]  ;;  %v12562_v0 = vld [vmem:[#allocation54_spill] sm:$0xff] }
 0x4e2   : > { %7841 = vmatpush.msra.mxu0 %v10442_v17  ;;  %7660 = vmatpush.msra.mxu2 %v12555_v47 }
 0x4e3   : > { %7820 = vmatpush.msrb.mxu3 %v12555_v47  ;;  %7878 = vmatpush.msra.mxu1 %v12557_v2  ;;  %v6111_v47 = vpop.f32.mrf.mxu1 }
 0x4e4   : > { %7843 = vmatpush.msra.mxu0 %v10461_v30  ;;  %7783 = vmatpush.msrb.mxu2 %v12558_v37  ;;  %v6272_v46 = vpop.f32.mrf.mxu3  ;;  %v6350_v11 = vpop.f32.mrf.mxu2 }
 0x4e5   : > { %7884 = vmatpush.msra.mxu1 %v12559_v32 }
 0x4e6   : > { %7845 = vmatpush.msra.mxu0 %v10471_v35  ;;  %7787 = vmatpush.msrb.mxu2 %v12560_v48  ;;  %v6050_v48 = vpop.permute.xlu2 %6049 }
 0x4e7   : > { %7890 = vmatpush.msra.mxu1 %v12561_v43  ;;  %v12564_v43 = vld [vmem:[#allocation62_spill] sm:$0xff]  ;;  %v6216_v49 = vmul.f32 %v12565_v60, %v6050_v48 }
 0x4e8   : > { %7791 = vmatpush.msrb.mxu2 %v12562_v0  ;;  %v6298_v37 = vpop.f32.mrf.mxu0  ;;  %v6052_v56 = vmul.f32 %v12564_v43, %v6050_v48 }
 0x4e9   : > { %v6242_v15 = vadd.f32 %v6241_v5, %v6216_v49 }
 0x4ea   : > { %7795 = vmatpush.msrb.mxu2 %v12563_v31  ;;  %v6081_v31 = vadd.f32 %v6080_v10, %v6052_v56 }
 0x4eb   : > { %v6212_v2 = vpop.f32.mrf.mxu1  ;;  %v6273_v16 = vadd.f32 %v6272_v46, %v6242_v15 }
 0x4ec   : > { %v6373_v4 = vpop.f32.mrf.mxu3  ;;  %v6459_v52 = vpop.f32.mrf.mxu2  ;;  %v6112_v44 = vadd.f32 %v6111_v47, %v6081_v31 }
 0x4ed   : > { %v6299_v47 = vadd.f32 %v6298_v37, %v6273_v16 }
 0x4ee   : > { %v6138_v58 = vadd.f32 %v6137_v29, %v6112_v44 }
 0x4f0   : > { %v6402_v32 = vpop.f32.mrf.mxu0  ;;  %v6163_v50 = vadd.f32 %v6162_v24, %v6138_v58 }
 0x4f2   : > { %v6190_v57 = vadd.f32 %v6189_v25, %v6163_v50  ;;  %v6377_v25 = vmul.f32 %v11564_v14, %v6050_v48 }
 0x4f3   : > { %v6323_v7 = vpop.f32.mrf.mxu1 }
 0x4f4   : > { %v11735_v0 = vpop.f32.mrf.mxu3  ;;  %v6213_v55 = vadd.f32 %v6212_v2, %v6190_v57  ;;  %v6324_v40 = vadd.f32 %v6323_v7, %v6299_v47  ;;  %v6403_v24 = vadd.f32 %v6402_v32, %v6377_v25 }
 0x4f6   : > { %v6215_v49 = vadd.f32 %v11560_v3, %v6213_v55 }
 0x4f8   : > { %v11737_v12 = vpop.f32.mrf.mxu0 }
 0x4fb   : > { %v6433_v63 = vpop.f32.mrf.mxu1 }
 0x4fc   : > { %v6434_v2 = vadd.f32 %v6433_v63, %v6403_v24 }
 0x503   : > { %v11739_v6 = vpop.f32.mrf.mxu1 }
 0x518   : > { %v6638_v53 = vpop.f32.mrf.mxu0 }
 0x51a   : > { %v6665_v43 = vpop.f32.mrf.mxu1 }
 0x51c   : > { %v6608_v42 = vpop.f32.mrf.mxu3 }
 0x520   : > { %v6752_v33 = vpop.f32.mrf.mxu0 }
 0x521   : > { %v6753_v60 = vadd.f32 %v11556_v23, %v6752_v33 }
 0x522   : > { %v6793_v5 = vpop.f32.mrf.mxu1 }
 0x523   : > { %v6794_v50 = vadd.f32 %v6793_v5, %v6753_v60 }
 0x524   : > { %v6567_v39 = vpop.f32.mrf.mxu2  ;;  %v6723_v59 = vpop.f32.mrf.mxu3 }
 0x525   : > { %v6568_v41 = vadd.f32 %v11552_v20, %v6567_v39  ;;  %v6351_v20 = vadd.f32 %v6350_v11, %v6324_v40 }
 0x527   : > { %v6609_v56 = vadd.f32 %v6608_v42, %v6568_v41  ;;  %v6374_v42 = vadd.f32 %v6373_v4, %v6351_v20 }
 0x528   : > { %v6883_v16 = vpop.f32.mrf.mxu0 }
 0x529   : > { %v6639_v10 = vadd.f32 %v6638_v53, %v6609_v56  ;;  %v6376_v55 = vadd.f32 %v11568_v45, %v6374_v42 }
 0x52a   : > { %v6908_v33 = vpop.f32.mrf.mxu1 }
 0x52b   : > { %v6666_v31 = vadd.f32 %v6665_v43, %v6639_v10  ;;  %v6460_v10 = vadd.f32 %v6459_v52, %v6434_v2 }
 0x52c   : > { %v6698_v44 = vpop.f32.mrf.mxu2  ;;  %v6850_v41 = vpop.f32.mrf.mxu3 }
 0x52d   : > { %v6699_v29 = vadd.f32 %v6698_v44, %v6666_v31  ;;  %v6485_v32 = vadd.f32 %v11735_v0, %v6460_v10 }
 0x52f   : > { %v6724_v58 = vadd.f32 %v6723_v59, %v6699_v29 }
 0x530   : > { %v7008_v47 = vpop.f32.mrf.mxu0 }
 0x531   : > { %v7096_v39 = vadd.f32 %v6724_v58, %v6215_v49 }
 0x532   : > { %v7035_v31 = vpop.f32.mrf.mxu1 }
 0x533   : > { %v9582_v15 = vmul.f32 -1.442695, %v7096_v39 }
 0x534   : > { %v6823_v53 = vpop.f32.mrf.mxu2  ;;  %v6978_v43 = vpop.f32.mrf.mxu3 }
 0x535   : > { %9737 = vpow2.f32 %v9582_v15  ;;  %v6824_v57 = vadd.f32 %v6823_v53, %v6794_v50 }
 0x537   : > { %v6851_v37 = vadd.f32 %v6850_v41, %v6824_v57 }
 0x539   : > { %v6884_v7 = vadd.f32 %v6883_v16, %v6851_v37 }
 0x53b   : > { %v9738_v23 = vpop.eup %9737  ;;  %v6909_v59 = vadd.f32 %v6908_v33, %v6884_v7 }
 0x53c   : > { %v7100_v3 = vadd.f32 1.0, %v9738_v23  ;;  %v6937_v40 = vpop.f32.mrf.mxu2 }
 0x53d   : > { %v7116_v11 = vadd.f32 %v6909_v59, %v6376_v55  ;;  %v6938_v46 = vadd.f32 %v11572_v19, %v6937_v40  ;;  %v6512_v19 = vadd.f32 %v11737_v12, %v6485_v32  ;;  %v7093_v0 = vpop.f32.mrf.mxu3 }
 0x53e   : > { %9739 = vrcp.f32 %v7100_v3  ;;  %v7112_v58 = vand.u32 2147483648, %v7100_v3  ;;  %v7110_v52 = vand.u32 2147483647, %v7100_v3  ;;  %vm7106_vm15 = vweird.f32 %v7100_v3 }
 0x53f   : > { %v9583_v56 = vmul.f32 -1.442695, %v7116_v11  ;;  %v6979_v4 = vadd.f32 %v6978_v43, %v6938_v46  ;;  %v6535_v50 = vadd.f32 %v11739_v6, %v6512_v19 }
 0x540   : > { %v7113_v15 = vor.u32 1.1754944e-38, %v7112_v58  ;;  %vm7111_vm2 = vcmp.eq.f32.partialorder %v7110_v52, 8.507059e+37  ;;  %v12572_v58 = vld [vmem:[#allocation21_spill] sm:$0xff] }
 0x541   : > { %9741 = vpow2.f32 %v9583_v56  ;;  %v7009_v14 = vadd.f32 %v7008_v47, %v6979_v4  ;;  %v6537_v42 = vadd.f32 %v11579_v38, %v6535_v50  ;;  %v12574_v52 = vld [vmem:[#allocation69_spill] sm:$0xff] }
 0x543   : > { %v7036_v45 = vadd.f32 %v7035_v31, %v7009_v14  ;;  %v8243_v14 = vld [vmem:[%s10226_s7] sm:$0x3] }
 0x544   : > { %v9740_v48 = vpop.eup %9739  ;;  %v7068_v29 = vpop.f32.mrf.mxu2  ;;  %v12566_v31 = vld [vmem:[#allocation79_spill] sm:$0xff] }
 0x545   : > { %v7102_v44 = vmul.f32 %v9740_v48, %v7100_v3  ;;  %v7069_v5 = vadd.f32 %v7068_v29, %v7036_v45  ;;  %vm7107_vm14 = vweird.f32 %v9740_v48  ;;  %v12568_v29 = vld [vmem:[#allocation64_spill] sm:$0xff] }
 0x546   : > { %vm7108_vm1 = vmor %vm7106_vm15, %vm7107_vm14 }
 0x547   : > { %v9742_v60 = vpop.eup %9741  ;;  %v7103_v49 = vsub.f32 1.0, %v7102_v44  ;;  %v7094_v41 = vadd.f32 %v7093_v0, %v7069_v5  ;;  %v12567_v44 = vld [vmem:[#allocation70_spill] sm:$0xff]  ;;  %v12573_v5 = vld [vmem:[#allocation37_spill] sm:$0xff]  ;;  %v12576_v0 = vld [vmem:[#allocation72_spill] sm:$0xff] }
 0x548   : > { %v7120_v63 = vadd.f32 1.0, %v9742_v60  ;;  %v12569_v60 = vld [vmem:[#allocation73_spill] sm:$0xff] }
 0x549   : > { %v7104_v39 = vmul.f32 %v9740_v48, %v7103_v49  ;;  %v12570_v49 = vld [vmem:[#allocation66_spill] sm:$0xff] }
 0x54a   : > { %9743 = vrcp.f32 %v7120_v63  ;;  %v7132_v24 = vand.u32 2147483648, %v7120_v63  ;;  %v7130_v23 = vand.u32 2147483647, %v7120_v63  ;;  %vm7126_vm4 = vweird.f32 %v7120_v63 }
 0x54b   : > { %v7105_v20 = vadd.f32 %v9740_v48, %v7104_v39 }
 0x54c   : > { %v7133_v55 = vor.u32 1.1754944e-38, %v7132_v24  ;;  %vm7131_vm6 = vcmp.eq.f32.partialorder %v7130_v23, 8.507059e+37  ;;  %v12587_v24 = vld [vmem:[#allocation40_spill] sm:$0xff]  ;;  %v12589_v23 = vld [vmem:[#allocation41_spill] sm:$0xff] }
 0x54d   : > { %v7109_v53 = vsel %vm7108_vm1, %v9740_v48, %v7105_v20  ;;  %v8252_v48 = vsel %vm527_vm0, %v8243_v14, 0  ;;  %v12575_v20 = vld [vmem:[#allocation22_spill] sm:$0xff]  ;;  %v12604_v14 = vld [vmem:[#allocation36_spill] sm:$0xff] }
 0x54e   : > { %v7114_v57 = vsel %vm7111_vm2, %v7113_v15, %v7109_v53  ;;  %v11783_v32 = vand.u32 4294901760, %v8252_v48  ;;  %v12577_v15 = vld [vmem:[#allocation38_spill] sm:$0xff] }
 0x54f   : > { %v7136_v16 = vmul.f32 %v7114_v57, %v7094_v41  ;;  %v12578_v41 = vld [vmem:[#allocation30_spill] sm:$0xff]  ;;  %v12580_v57 = vld [vmem:[#allocation31_spill] sm:$0xff] }
 0x550   : > { %v9744_v12 = vpop.eup %9743  ;;  %v11793_v45 = vsub.f32 %v8252_v48, %v11783_v32  ;;  %v12579_v53 = vld [vmem:[#allocation74_spill] sm:$0xff] }
 0x551   : > { %v7122_v37 = vmul.f32 %v9744_v12, %v7120_v63  ;;  %v7137_v25 = vadd.f32 %v7136_v16, %v6537_v42  ;;  %vm7127_vm3 = vweird.f32 %v9744_v12  ;;  %v12571_v63 = vld [vmem:[#allocation67_spill] sm:$0xff]  ;;  %v12581_v16 = vld [vmem:[#allocation76_spill] sm:$0xff]  ;;  %v12605_v48 = vld [vmem:[#allocation46_spill] sm:$0xff] }
 0x552   : > { %vm7128_vm5 = vmor %vm7126_vm4, %vm7127_vm3  ;;  %v11804_v19 = vand.u32 4294901760, %v11793_v45  ;;  %v12583_v42 = vld [vmem:[#allocation28_spill] sm:$0xff] }
 0x553   : > { %v7123_v7 = vsub.f32 1.0, %v7122_v37  ;;  %9745 = vtanh.f32 %v7137_v25  ;;  %v12584_v37 = vld [vmem:[#allocation26_spill] sm:$0xff]  ;;  %v12585_v25 = vld [vmem:[#allocation23_spill] sm:$0xff] }
 0x554   : > { %v8275_v39 = vsub.f32 %v11793_v45, %v11804_v19 }
 0x555   : > { %v7124_v33 = vmul.f32 %v9744_v12, %v7123_v7  ;;  %v12586_v7 = vld [vmem:[#allocation29_spill] sm:$0xff] }
 0x556   : > { %v8276_v50 = vand.u32 4294901760, %v8275_v39  ;;  %v12608_v39 = vld [vmem:[#allocation50_spill] sm:$0xff] }
 0x557   : > { %v7125_v6 = vadd.f32 %v9744_v12, %v7124_v33  ;;  %v12588_v33 = vld [vmem:[#allocation24_spill] sm:$0xff] }
 0x559   : > { %v7129_v59 = vsel %vm7128_vm5, %v9744_v12, %v7125_v6  ;;  %v9746_v11 = vpop.eup %9745  ;;  %v12582_v12 = vld [vmem:[#allocation25_spill] sm:$0xff]  ;;  %v12590_v6 = vld [vmem:[#allocation27_spill] sm:$0xff] }
 0x55a   : > { %v7134_v3 = vsel %vm7131_vm6, %v7133_v55, %v7129_v59  ;;  %v12591_v55 = vld [vmem:[#allocation34_spill] sm:$0xff]  ;;  %v12592_v59 = vld [vmem:[#allocation53_spill] sm:$0xff] }
 0x55b   : > { %v7139_v40 = vsub.f32 1.0, %v7134_v3  ;;  %v7141_v38 = vmul.f32 %v7134_v3, %v11583_v22  ;;  %v12593_v3 = vld [vmem:[#allocation55_spill] sm:$0xff] }
 0x55d   : > { %v7140_v46 = vmul.f32 %v9746_v11, %v7139_v40  ;;  %v12594_v40 = vld [vmem:[#allocation32_spill] sm:$0xff]  ;;  %v12595_v11 = vld [vmem:[#allocation33_spill] sm:$0xff] }
 0x55f   : > { %v11753_v2 = vadd.f32 %v7141_v38, %v7140_v46  ;;  %v12596_v46 = vld [vmem:[#allocation43_spill] sm:$0xff] }
 0x560   : > { %v12597_v38 = vld [vmem:[#allocation47_spill] sm:$0xff] }
 0x561   : > { %v7639_v43 = vsel %vm1031_vm9, %v11753_v2, 0 }
 0x562   : > { %v11757_v56 = vand.u32 4294901760, %v7639_v43 }
 0x564   : > { %7707 = vmatmul.f32.vlgmr.msra.gmra.mxu3 %v11757_v56  ;;  %v7662_v4 = vsub.f32 %v7639_v43, %v11757_v56  ;;  %v12598_v43 = vld [vmem:[#allocation35_spill] sm:$0xff] }
 0x565   : > { %7939 = vmatpush.msra.mxu3 %v10436_v13 }
 0x566   : > { %7737 = vmatmul.f32.vlgmr.msrb.gmra.mxu0 %v7662_v4  ;;  %v7663_v10 = vand.u32 4294901760, %v7662_v4 }
 0x567   : > { %7941 = vmatpush.msra.mxu3 %v10442_v17  ;;  %7968 = vmatpush.msrb.mxu0 %v10469_v34 }
 0x568   : > { %7764 = vmatmul.f32.vlgmr.msrb.gmra.mxu1 %v7663_v10  ;;  %v7664_v22 = vsub.f32 %v7662_v4, %v7663_v10 }
 0x569   : > { %7943 = vmatpush.msra.mxu3 %v10461_v30  ;;  %7972 = vmatpush.msrb.mxu0 %v10483_v51 }
 0x56a   : > { %v7665_v47 = vand.u32 4294901760, %v7664_v22  ;;  %7999 = vmatpush.msrb.mxu1 %v10436_v13  ;;  %v12602_v22 = vld [vmem:[#allocation44_spill] sm:$0xff] }
 0x56b   : > { %7945 = vmatpush.msra.mxu3 %v10471_v35  ;;  %7976 = vmatpush.msrb.mxu0 %v10510_v21 }
 0x56c   : > { %7666 = vmatmul.f32.vlgmr.msra.gmra.mxu2 %v7665_v47  ;;  %7822 = vmatmul.f32.vlgmr.msrb.gmra.mxu3 %v11757_v56 }
 0x56d   : > { %8001 = vmatpush.msrb.mxu1 %v10442_v17  ;;  %7910 = vmatpush.msra.mxu2 %v12356_v27 }
 0x56e   : > { %7851 = vmatmul.f32.vlgmr.msra.gmra.mxu0 %v7665_v47  ;;  %8057 = vmatpush.msrb.mxu3 %v12357_v28 }
 0x56f   : > { %7980 = vmatpush.msrb.mxu0 %v10527_v62  ;;  %8003 = vmatpush.msrb.mxu1 %v10461_v30 }
 0x570   : > { %7892 = vmatmul.f32.vlgmr.msra.gmra.mxu1 %v11757_v56  ;;  %7913 = vmatpush.msra.mxu2 %v12358_v9 }
 0x571   : > { %8005 = vmatpush.msrb.mxu1 %v10471_v35  ;;  %8063 = vmatpush.msrb.mxu3 %v10582_v54 }
 0x572   : > { %8095 = vmatpush.msra.mxu0 %v10498_v1  ;;  %7916 = vmatpush.msra.mxu2 %v12359_v61 }
 0x573   : > { %8069 = vmatpush.msrb.mxu3 %v10592_v8  ;;  %8124 = vmatpush.msra.mxu1 %v10473_v36 }
 0x574   : > { %7797 = vmatmul.f32.vlgmr.msrb.gmra.mxu2 %v11757_v56  ;;  %7949 = vmatmul.f32.vlgmr.msra.gmra.mxu3 %v7663_v10 }
 0x575   : > { %8098 = vmatpush.msra.mxu0 %v10513_v18  ;;  %7919 = vmatpush.msra.mxu2 %v12360_v26 }
 0x576   : > { %7982 = vmatmul.f32.vlgmr.msrb.gmra.mxu0 %v11757_v56  ;;  %8075 = vmatpush.msrb.mxu3 %v12566_v31 }
 0x577   : > { %8101 = vmatpush.msra.mxu0 %v12567_v44  ;;  %8126 = vmatpush.msra.mxu1 %v12568_v29 }
 0x578   : > { %8007 = vmatmul.f32.vlgmr.msrb.gmra.mxu1 %v11757_v56  ;;  %8024 = vmatpush.msrb.mxu2 %v10473_v36 }
 0x579   : > { %8104 = vmatpush.msra.mxu0 %v12569_v60  ;;  %8128 = vmatpush.msra.mxu1 %v12570_v49 }
 0x57a   : > { %8184 = vmatpush.msra.mxu3 %v10473_v36  ;;  %8026 = vmatpush.msrb.mxu2 %v12568_v29 }
 0x57b   : > { %8130 = vmatpush.msra.mxu1 %v12571_v63  ;;  %8269 = vmatpush.msrb.mxu0 %v12572_v58 }
 0x57c   : > { %7922 = vmatmul.f32.vlgmr.msra.gmra.mxu2 %v7662_v4  ;;  %8077 = vmatmul.f32.vlgmr.msrb.gmra.mxu3 %v11757_v56 }
 0x57d   : > { %8186 = vmatpush.msra.mxu3 %v12568_v29  ;;  %8028 = vmatpush.msrb.mxu2 %v12570_v49 }
 0x57e   : > { %8107 = vmatmul.f32.vlgmr.msra.gmra.mxu0 %v7662_v4  ;;  %8300 = vmatpush.msrb.mxu1 %v12573_v5  ;;  %v12600_v4 = vld [vmem:[#allocation42_spill] sm:$0xff]  ;;  %v12607_v5 = vld [vmem:[#allocation39_spill] sm:$0xff] }
 0x57f   : > { %8188 = vmatpush.msra.mxu3 %v12570_v49  ;;  %8030 = vmatpush.msrb.mxu2 %v12571_v63 }
 0x580   : > { %8134 = vmatmul.f32.vlgmr.msra.gmra.mxu1 %v7663_v10  ;;  %8271 = vmatpush.msrb.mxu0 %v12575_v20  ;;  %v12601_v10 = vld [vmem:[#allocation58_spill] sm:$0xff] }
 0x581   : > { %8153 = vmatpush.msra.mxu2 %v12574_v52  ;;  %8190 = vmatpush.msra.mxu3 %v12571_v63 }
 0x582   : > { %8306 = vmatpush.msrb.mxu1 %v12577_v15  ;;  %8380 = vmatpush.msra.mxu0 %v12578_v41  ;;  %v12611_v15 = vld [vmem:[#allocation48_spill] sm:$0xff]  ;;  %v12614_v41 = vld [vmem:[#allocation49_spill] sm:$0xff] }
 0x583   : > { %8157 = vmatpush.msra.mxu2 %v12576_v0  ;;  %8353 = vmatpush.msrb.mxu3 %v12572_v58 }
 0x584   : > { %8405 = vmatpush.msra.mxu1 %v12572_v58  ;;  %8036 = vmatmul.f32.vlgmr.msrb.gmra.mxu2 %v7665_v47  ;;  %v12603_v47 = vld [vmem:[#allocation59_spill] sm:$0xff]  ;;  %v12606_v58 = vld [vmem:[#allocation60_spill] sm:$0xff] }
 0x585   : > { %8192 = vmatmul.f32.vlgmr.msra.gmra.mxu3 %v11757_v56  ;;  %8161 = vmatpush.msra.mxu2 %v12579_v53 }
 0x586   : > { %8384 = vmatpush.msra.mxu0 %v12580_v57  ;;  %8407 = vmatpush.msra.mxu1 %v12575_v20  ;;  %v12615_v57 = vld [vmem:[#allocation75_spill] sm:$0xff] }
 0x587   : > { %8277 = vmatmul.f32.vlgmr.msrb.gmra.mxu0 %v8276_v50  ;;  %8165 = vmatpush.msra.mxu2 %v12581_v16 }
 0x588   : > { %8308 = vmatmul.f32.vlgmr.msrb.gmra.mxu1 %v11783_v32  ;;  %8489 = vmatpush.msrb.mxu0 %v12583_v42  ;;  %v12617_v42 = vld [vmem:[#allocation78_spill] sm:$0xff] }
 0x589   : > { %8328 = vmatpush.msrb.mxu2 %v12582_v12  ;;  %8355 = vmatpush.msrb.mxu3 %v12575_v20  ;;  %v12609_v20 = vld [vmem:[#allocation45_spill] sm:$0xff]  ;;  %v12616_v12 = vld [vmem:[#allocation51_spill] sm:$0xff] }
 0x58a   : > { %8514 = vmatpush.msrb.mxu1 %v12585_v25  ;;  %8492 = vmatpush.msrb.mxu0 %v12586_v7  ;;  %v7211_v7 = vpop.f32.mrf.mxu1 }
 0x58b   : > { %8331 = vmatpush.msrb.mxu2 %v12584_v37  ;;  %8461 = vmatpush.msra.mxu3 %v12587_v24  ;;  %v12619_v37 = vld [vmem:[#allocation56_spill] sm:$0xff]  ;;  %v7262_v24 = vpop.f32.mrf.mxu3 }
 0x58c   : > { %8167 = vmatmul.f32.vlgmr.msra.gmra.mxu2 %v11757_v56  ;;  %8516 = vmatpush.msrb.mxu1 %v12588_v33  ;;  %v12599_v56 = vld [vmem:[#allocation57_spill] sm:$0xff] }
 0x58d   : > { %8359 = vmatmul.f32.vlgmr.msrb.gmra.mxu3 %v11804_v19  ;;  %8430 = vmatpush.msra.mxu2 %v12585_v25 }
 0x58e   : > { %8467 = vmatpush.msra.mxu3 %v12589_v23  ;;  %v7237_v23 = vpop.f32.mrf.mxu2 }
 0x58f   : > { %8386 = vmatmul.f32.vlgmr.msra.gmra.mxu0 %v11783_v32  ;;  %8432 = vmatpush.msra.mxu2 %v12588_v33 }
 0x590   : > { %8591 = vmatpush.msra.mxu0 %v12590_v6  ;;  %8409 = vmatmul.f32.vlgmr.msra.gmra.mxu1 %v11783_v32 }
 0x591   : > { %8566 = vmatpush.msrb.mxu3 %v12585_v25  ;;  %8622 = vmatpush.msra.mxu1 %v12592_v59  ;;  %v7180_v25 = vpop.f32.mrf.mxu0 }
 0x592   : > { %8593 = vmatpush.msra.mxu0 %v12591_v55 }
 0x593   : > { %8568 = vmatpush.msrb.mxu3 %v12588_v33  ;;  %8628 = vmatpush.msra.mxu1 %v12593_v3 }
 0x594   : > { %8334 = vmatmul.f32.vlgmr.msrb.gmra.mxu2 %v11793_v45 }
 0x595   : > { %8469 = vmatmul.f32.vlgmr.msra.gmra.mxu3 %v11783_v32  ;;  %8541 = vmatpush.msrb.mxu2 %v12594_v40 }
 0x596   : > { %8675 = vmatpush.msra.mxu3 %v12590_v6  ;;  %v7341_v3 = vpop.f32.mrf.mxu2 }
 0x597   : > { %8495 = vmatmul.f32.vlgmr.msrb.gmra.mxu0 %v11793_v45  ;;  %8545 = vmatpush.msrb.mxu2 %v12595_v11 }
 0x598   : > { %8677 = vmatpush.msra.mxu3 %v12591_v55  ;;  %8520 = vmatmul.f32.vlgmr.msrb.gmra.mxu1 %v11804_v19 }
 0x599   : > { %8702 = vmatpush.msrb.mxu0 %v12596_v46  ;;  %8727 = vmatpush.msrb.mxu1 %v12590_v6  ;;  %v7289_v33 = vpop.f32.mrf.mxu0  ;;  %v7312_v6 = vpop.f32.mrf.mxu1 }
 0x59b   : > { %8706 = vmatpush.msrb.mxu0 %v12597_v38  ;;  %8729 = vmatpush.msrb.mxu1 %v12591_v55  ;;  %v7372_v55 = vpop.f32.mrf.mxu3 }
 0x59c   : > { %8438 = vmatmul.f32.vlgmr.msra.gmra.mxu2 %v8276_v50 }
 0x59d   : > { %8570 = vmatmul.f32.vlgmr.msrb.gmra.mxu3 %v11783_v32  ;;  %8650 = vmatpush.msra.mxu2 %v12598_v43  ;;  %v7150_v43 = vpop.permute.xlu0 %7149 }
 0x59e   : > { %8785 = vmatpush.msrb.mxu3 %v12599_v56  ;;  %v7450_v38 = vpop.f32.mrf.mxu2 }
 0x59f   : > { %8599 = vmatmul.f32.vlgmr.msra.gmra.mxu0 %v8276_v50  ;;  %8653 = vmatpush.msra.mxu2 %v12600_v4  ;;  %v12610_v50 = vld [vmem:[#allocation52_spill] sm:$0xff]  ;;  %v11907_v4 = vld [vmem:[%s10261_s13] ss:$0 sm:$0xff] }
 0x5a0   : > { %8791 = vmatpush.msrb.mxu3 %v12601_v10  ;;  %8630 = vmatmul.f32.vlgmr.msra.gmra.mxu1 %v11783_v32  ;;  %12620 = vst [vmem:[#allocation65_spill] sm:$0xff] %v11907_v4  ;;  %v7152_v10 = vmul.f32 %v11907_v4, %v7150_v43 }
 0x5a1   : > { %8823 = vmatpush.msra.mxu0 %v12602_v22  ;;  %8852 = vmatpush.msra.mxu1 %v12604_v14  ;;  %v7398_v59 = vpop.f32.mrf.mxu0  ;;  %v7423_v40 = vpop.f32.mrf.mxu1 }
 0x5a2   : > { %8797 = vmatpush.msrb.mxu3 %v12603_v47  ;;  %v7181_v47 = vadd.f32 %v7180_v25, %v7152_v10 }
 0x5a3   : > { %8826 = vmatpush.msra.mxu0 %v12605_v48  ;;  %8854 = vmatpush.msra.mxu1 %v12607_v5  ;;  %v7473_v11 = vpop.f32.mrf.mxu3 }
 0x5a4   : > { %8803 = vmatpush.msrb.mxu3 %v12606_v58  ;;  %8547 = vmatmul.f32.vlgmr.msrb.gmra.mxu2 %v11783_v32  ;;  %v7212_v58 = vadd.f32 %v7211_v7, %v7181_v47 }
 0x5a5   : > { %8681 = vmatmul.f32.vlgmr.msra.gmra.mxu3 %v11804_v19  ;;  %8829 = vmatpush.msra.mxu0 %v12608_v39  ;;  %v12612_v19 = vld [vmem:[#allocation68_spill] sm:$0xff] }
 0x5a6   : > { %8752 = vmatpush.msrb.mxu2 %v12604_v14  ;;  %8856 = vmatpush.msra.mxu1 %v12609_v20  ;;  %v7559_v48 = vpop.f32.mrf.mxu2  ;;  %v7238_v39 = vadd.f32 %v7237_v23, %v7212_v58 }
 0x5a7   : > { %8708 = vmatmul.f32.vlgmr.msrb.gmra.mxu0 %v11783_v32  ;;  %8912 = vmatpush.msra.mxu3 %v12604_v14 }
 0x5a8   : > { %8832 = vmatpush.msra.mxu0 %v12610_v50  ;;  %8731 = vmatmul.f32.vlgmr.msrb.gmra.mxu1 %v11783_v32  ;;  %v12613_v32 = vld [vmem:[#allocation71_spill] sm:$0xff] }
 0x5a9   : > { %8754 = vmatpush.msrb.mxu2 %v12607_v5  ;;  %8858 = vmatpush.msra.mxu1 %v12611_v15  ;;  %v7502_v46 = vpop.f32.mrf.mxu0  ;;  %v11904_v56 = vpop.f32.mrf.mxu1  ;;  %v11917_v50 = vld [vmem:[%s10261_s13 + $0x1] ss:$0 sm:$0xff] }
 0x5aa   : > { %8914 = vmatpush.msra.mxu3 %v12607_v5  ;;  %8937 = vmatpush.msrb.mxu0 %v10436_v13  ;;  %12621 = vst [vmem:[#allocation80_spill] sm:$0xff] %v11917_v50 }
 0x5ab   : > { %8756 = vmatpush.msrb.mxu2 %v12609_v20  ;;  %8970 = vmatpush.msrb.mxu1 %v12612_v19  ;;  %v11910_v22 = vpop.f32.mrf.mxu3 }
 0x5ac   : > { %8916 = vmatpush.msra.mxu3 %v12609_v20  ;;  %8656 = vmatmul.f32.vlgmr.msra.gmra.mxu2 %v11793_v45  ;;  %v12618_v45 = vld [vmem:[#allocation54_spill] sm:$0xff] }
 0x5ad   : > { %8939 = vmatpush.msrb.mxu0 %v10442_v17  ;;  %8758 = vmatpush.msrb.mxu2 %v12611_v15 }
 0x5ae   : > { %8918 = vmatpush.msra.mxu3 %v12611_v15  ;;  %8976 = vmatpush.msrb.mxu1 %v12613_v32  ;;  %v7316_v15 = vmul.f32 %v11917_v50, %v7150_v43  ;;  %v7263_v32 = vadd.f32 %v7262_v24, %v7238_v39  ;;  %v11925_v39 = vld [vmem:[%s10215_s18 + $0x1] ss:$0 sm:$0xff] }
 0x5af   : > { %8941 = vmatpush.msrb.mxu0 %v10461_v30  ;;  %8881 = vmatpush.msra.mxu2 %v12614_v41 }
 0x5b0   : > { %8982 = vmatpush.msrb.mxu1 %v12615_v57  ;;  %v7342_v41 = vadd.f32 %v7341_v3, %v7316_v15 }
 0x5b1   : > { %8943 = vmatpush.msrb.mxu0 %v10471_v35  ;;  %8885 = vmatpush.msra.mxu2 %v12616_v12  ;;  %v11912_v14 = vpop.f32.mrf.mxu0  ;;  %v11914_v5 = vpop.f32.mrf.mxu1  ;;  %v11921_v12 = vld [vmem:[%s10215_s18] ss:$0 sm:$0xff] }
 0x5b2   : > { %8988 = vmatpush.msrb.mxu1 %v12617_v42  ;;  %v7373_v25 = vadd.f32 %v7372_v55, %v7342_v41 }
 0x5b3   : > { %8889 = vmatpush.msra.mxu2 %v12618_v45 }
 0x5b4   : > { %v7399_v58 = vadd.f32 %v7398_v59, %v7373_v25 }
 0x5b5   : > { %8893 = vmatpush.msra.mxu2 %v12619_v37  ;;  %v7290_v37 = vadd.f32 %v7289_v33, %v7263_v32 }
 0x5b6   : > { %v7424_v3 = vadd.f32 %v7423_v40, %v7399_v58 }
 0x5b7   : > { %v7313_v47 = vadd.f32 %v7312_v6, %v7290_v37 }
 0x5b8   : > { %v7451_v32 = vadd.f32 %v7450_v38, %v7424_v3  ;;  %v11937_v38 = vld [vmem:[%s10205_s30 + $0x1] ss:$0 sm:$0xff] }
 0x5e3   : > { %v7738_v19 = vpop.f32.mrf.mxu0 }
 0x5e5   : > { %v7765_v45 = vpop.f32.mrf.mxu1 }
 0x5e7   : > { %v7708_v20 = vpop.f32.mrf.mxu3 }
 0x5eb   : > { %v7852_v50 = vpop.f32.mrf.mxu0 }
 0x5ec   : > { %v7853_v15 = vadd.f32 %v11925_v39, %v7852_v50 }
 0x5ef   : > { %v7667_v57 = vpop.f32.mrf.mxu2  ;;  %v7823_v10 = vpop.f32.mrf.mxu3 }
 0x5f0   : > { %v7668_v42 = vadd.f32 %v11921_v12, %v7667_v57  ;;  %v11929_v57 = vld [vmem:[%s10205_s30] ss:$0 sm:$0xff] }
 0x5f1   : > { %v7315_v33 = vadd.f32 %v11929_v57, %v7313_v47 }
 0x5f2   : > { %v7709_v7 = vadd.f32 %v7708_v20, %v7668_v42  ;;  %v7893_v20 = vpop.f32.mrf.mxu1 }
 0x5f3   : > { %v7894_v6 = vadd.f32 %v7893_v20, %v7853_v15  ;;  %v7983_v40 = vpop.f32.mrf.mxu0 }
 0x5f4   : > { %v7739_v23 = vadd.f32 %v7738_v19, %v7709_v7 }
 0x5f6   : > { %v7766_v4 = vadd.f32 %v7765_v45, %v7739_v23  ;;  %v11933_v45 = vld [vmem:[%s10261_s13 + $0x2] ss:$0 sm:$0xff] }
 0x5f7   : > { %v7798_v16 = vpop.f32.mrf.mxu2  ;;  %v7950_v41 = vpop.f32.mrf.mxu3  ;;  %v7477_v37 = vmul.f32 %v11933_v45, %v7150_v43 }
 0x5f8   : > { %v7799_v24 = vadd.f32 %v7798_v16, %v7766_v4  ;;  %v7474_v4 = vadd.f32 %v7473_v11, %v7451_v32 }
 0x5f9   : > { %v7503_v7 = vadd.f32 %v7502_v46, %v7477_v37 }
 0x5fa   : > { %v7824_v55 = vadd.f32 %v7823_v10, %v7799_v24  ;;  %v8008_v23 = vpop.f32.mrf.mxu1  ;;  %v7476_v47 = vadd.f32 %v11937_v38, %v7474_v4 }
 0x5fb   : > { %v8108_v32 = vpop.f32.mrf.mxu0 }
 0x5fc   : > { %v8196_v19 = vadd.f32 %v7824_v55, %v7315_v33  ;;  %v11941_v33 = vld [vmem:[%s10215_s18 + $0x2] ss:$0 sm:$0xff]  ;;  %v7534_v55 = vadd.f32 %v11904_v56, %v7503_v7  ;;  %s9356_s18 = sshll.u32 %s462_s23, 4  ;;  %s9357_s18 = int_to_ptr.vmem [resolvable:$true] %s9356_s18 }
 0x5fe   : > { %v9586_v59 = vmul.f32 -1.442695, %v8196_v19  ;;  %v7560_v19 = vadd.f32 %v7559_v48, %v7534_v55 }
 0x5ff   : > { %v7923_v42 = vpop.f32.mrf.mxu2  ;;  %v8078_v43 = vpop.f32.mrf.mxu3 }
 0x600   : > { %9747 = vpow2.f32 %v9586_v59  ;;  %v7924_v16 = vadd.f32 %v7923_v42, %v7894_v6 }
 0x602   : > { %v7951_v50 = vadd.f32 %v7950_v41, %v7924_v16  ;;  %v7585_v41 = vadd.f32 %v11910_v22, %v7560_v19  ;;  %v8135_v42 = vpop.f32.mrf.mxu1 }
 0x604   : > { %v7984_v25 = vadd.f32 %v7983_v40, %v7951_v50 }
 0x606   : > { %v9748_v10 = vpop.eup %9747  ;;  %v8009_v58 = vadd.f32 %v8008_v23, %v7984_v25  ;;  %v7612_v25 = vadd.f32 %v11912_v14, %v7585_v41 }
 0x607   : > { %v8200_v24 = vadd.f32 1.0, %v9748_v10  ;;  %v8037_v3 = vpop.f32.mrf.mxu2 }
 0x608   : > { %v8216_v15 = vadd.f32 %v8009_v58, %v7476_v47  ;;  %v8038_v11 = vadd.f32 %v11941_v33, %v8037_v3  ;;  %v7635_v22 = vadd.f32 %v11914_v5, %v7612_v25  ;;  %v8193_v58 = vpop.f32.mrf.mxu3 }
 0x609   : > { %9749 = vrcp.f32 %v8200_v24  ;;  %v8212_v7 = vand.u32 2147483648, %v8200_v24  ;;  %v8210_v48 = vand.u32 2147483647, %v8200_v24  ;;  %vm8206_vm7 = vweird.f32 %v8200_v24 }
 0x60a   : > { %v9587_v20 = vmul.f32 -1.442695, %v8216_v15  ;;  %v8079_v46 = vadd.f32 %v8078_v43, %v8038_v11 }
 0x60b   : > { %v8213_v3 = vor.u32 1.1754944e-38, %v8212_v7  ;;  %vm8211_vm10 = vcmp.eq.f32.partialorder %v8210_v48, 8.507059e+37 }
 0x60c   : > { %9751 = vpow2.f32 %v9587_v20  ;;  %v8109_v6 = vadd.f32 %v8108_v32, %v8079_v46  ;;  %v11949_v20 = vld [vmem:[%s10205_s30 + $0x2] ss:$0 sm:$0xff]  ;;  %s12626_s30 = smov %s12625_s26 }
 0x60d   : > { %v7637_v46 = vadd.f32 %v11949_v20, %v7635_v22  ;;  %s9934_s11 = scalar_lea.hbm %s12626_s30, 4  ;;  %p9935_p4 = scmp.lt.s32.totalorder %s9929_s29, %s12626_s30 }
 0x60e   : > { %v8136_v16 = vadd.f32 %v8135_v42, %v8109_v6  ;;  %p9936_p0 = scmp.lt.s32.totalorder %s9934_s11, %s9930_s19 }
 0x60f   : > { %v9750_v59 = vpop.eup %9749  ;;  %v8168_v4 = vpop.f32.mrf.mxu2 }
 0x610   : > { %v8202_v40 = vmul.f32 %v9750_v59, %v8200_v24  ;;  %v8169_v23 = vadd.f32 %v8168_v4, %v8136_v16  ;;  %vm8207_vm0 = vweird.f32 %v9750_v59  ;;  %p9937_p5 = por %p9936_p0, %p9935_p4 }
 0x611   : > { %vm8208_vm8 = vmor %vm8206_vm7, %vm8207_vm0  ;;  %vm9341_vm0 = vcmask 254976  }
 0x612   : > { %v9752_v50 = vpop.eup %9751  ;;  %v8203_v37 = vsub.f32 1.0, %v8202_v40  ;;  %v8194_v15 = vadd.f32 %v8193_v58, %v8169_v23  ;;  %p9938_p7 = pnand %p9937_p5, %p9933_p3 }
 0x613   : > { %v8220_v56 = vadd.f32 1.0, %v9752_v50 }
 0x614   : > { %v8204_v10 = vmul.f32 %v9750_v59, %v8203_v37 }
 0x615   : > { %9753 = vrcp.f32 %v8220_v56  ;;  %v8232_v41 = vand.u32 2147483648, %v8220_v56  ;;  %v8230_v5 = vand.u32 2147483647, %v8220_v56  ;;  %vm8226_vm12 = vweird.f32 %v8220_v56 }
 0x616   : > { %v8205_v47 = vadd.f32 %v9750_v59, %v8204_v10 }
 0x617   : > { %vm8231_vm14 = vcmp.eq.f32.partialorder %v8230_v5, 8.507059e+37 }
 0x618   : > { %v8209_v11 = vsel %vm8208_vm8, %v9750_v59, %v8205_v47  ;;  %v8233_v59 = vor.u32 1.1754944e-38, %v8232_v41 }
 0x619   : > { %v8214_v55 = vsel %vm8211_vm10, %v8213_v3, %v8209_v11 }
 0x61a   : > { %v8236_v14 = vmul.f32 %v8214_v55, %v8194_v15 }
 0x61b   : > { %v9754_v43 = vpop.eup %9753 }
 0x61c   : > { %v8222_v19 = vmul.f32 %v9754_v43, %v8220_v56  ;;  %v8237_v32 = vadd.f32 %v8236_v14, %v7637_v46  ;;  %vm8227_vm11 = vweird.f32 %v9754_v43 }
 0x61d   : > { %vm8228_vm13 = vmor %vm8226_vm12, %vm8227_vm11 }
 0x61e   : > { %v8223_v6 = vsub.f32 1.0, %v8222_v19  ;;  %9755 = vtanh.f32 %v8237_v32 }
 0x620   : > { %v8224_v24 = vmul.f32 %v9754_v43, %v8223_v6 }
 0x622   : > { %v8225_v42 = vadd.f32 %v9754_v43, %v8224_v24 }
 0x624   : > { %v8229_v16 = vsel %vm8228_vm13, %v9754_v43, %v8225_v42  ;;  %v9756_v50 = vpop.eup %9755 }
 0x625   : > { %v8234_v40 = vsel %vm8231_vm14, %v8233_v59, %v8229_v16 }
 0x626   : > { %v8239_v4 = vsub.f32 1.0, %v8234_v40  ;;  %v8241_v25 = vmul.f32 %v8234_v40, %v11753_v2 }
 0x628   : > { %v8240_v37 = vmul.f32 %v9756_v50, %v8239_v4 }
 0x62a   : > { %v11953_v7 = vadd.f32 %v8241_v25, %v8240_v37 }
 0x62c   : > { %v8737_v23 = vsel %vm1031_vm9, %v11953_v7, 0 }
 0x62d   : > { %v8759_v10 = vand.u32 4294901760, %v8737_v23 }
 0x62f   : > { %8805 = vmatmul.f32.vlgmr.msrb.gmra.mxu3 %v8759_v10  ;;  %v8760_v48 = vsub.f32 %v8737_v23, %v8759_v10 }
 0x630   : > { %9037 = vmatpush.msrb.mxu3 %v10436_v13 }
 0x631   : > { %8835 = vmatmul.f32.vlgmr.msra.gmra.mxu0 %v8760_v48  ;;  %v8761_v56 = vand.u32 4294901760, %v8760_v48 }
 0x632   : > { %9039 = vmatpush.msrb.mxu3 %v10442_v17  ;;  %9066 = vmatpush.msra.mxu0 %v10469_v34  ;;  %v8335_v34 = vpop.f32.mrf.mxu2 }
 0x633   : > { %8862 = vmatmul.f32.vlgmr.msra.gmra.mxu1 %v8761_v56  ;;  %v8762_v47 = vsub.f32 %v8760_v48, %v8761_v56 }
 0x634   : > { %9041 = vmatpush.msrb.mxu3 %v10461_v30  ;;  %9070 = vmatpush.msra.mxu0 %v10483_v51 }
 0x635   : > { %v8763_v2 = vand.u32 4294901760, %v8762_v47  ;;  %9097 = vmatpush.msra.mxu1 %v10436_v13  ;;  %v8309_v13 = vpop.f32.mrf.mxu1 }
 0x636   : > { %9043 = vmatpush.msrb.mxu3 %v10471_v35  ;;  %9074 = vmatpush.msra.mxu0 %v10510_v21 }
 0x637   : > { %8764 = vmatmul.f32.vlgmr.msrb.gmra.mxu2 %v8763_v2  ;;  %8920 = vmatmul.f32.vlgmr.msra.gmra.mxu3 %v8759_v10 }
 0x638   : > { %9099 = vmatpush.msra.mxu1 %v10442_v17  ;;  %9008 = vmatpush.msrb.mxu2 %v12356_v27  ;;  %v8360_v17 = vpop.f32.mrf.mxu3 }
 0x639   : > { %8949 = vmatmul.f32.vlgmr.msrb.gmra.mxu0 %v8763_v2  ;;  %9155 = vmatpush.msra.mxu3 %v12357_v28  ;;  %v8248_v28 = vpop.permute.xlu1 %8247 }
 0x63a   : > { %9078 = vmatpush.msra.mxu0 %v10527_v62  ;;  %9101 = vmatpush.msra.mxu1 %v10461_v30  ;;  %v8278_v62 = vpop.f32.mrf.mxu0 }
 0x63b   : > { %8990 = vmatmul.f32.vlgmr.msrb.gmra.mxu1 %v8759_v10  ;;  %9011 = vmatpush.msrb.mxu2 %v12358_v9 }
 0x63c   : > { %9103 = vmatpush.msra.mxu1 %v10471_v35  ;;  %9161 = vmatpush.msra.mxu3 %v10582_v54  ;;  %v12622_v54 = vld [vmem:[#allocation76_spill] sm:$0xff] }
 0x63d   : > { %9193 = vmatpush.msrb.mxu0 %v10498_v1  ;;  %9014 = vmatpush.msrb.mxu2 %v12359_v61  ;;  %v8410_v35 = vpop.f32.mrf.mxu1  ;;  %v8439_v1 = vpop.f32.mrf.mxu2  ;;  %v12623_v61 = vld [vmem:[#allocation65_spill] sm:$0xff] }
 0x63e   : > { %9167 = vmatpush.msra.mxu3 %v10592_v8  ;;  %9222 = vmatpush.msrb.mxu1 %v10473_v36 }
 0x63f   : > { %8895 = vmatmul.f32.vlgmr.msra.gmra.mxu2 %v8759_v10  ;;  %9047 = vmatmul.f32.vlgmr.msrb.gmra.mxu3 %v8761_v56 }
 0x640   : > { %9196 = vmatpush.msrb.mxu0 %v10513_v18  ;;  %9017 = vmatpush.msrb.mxu2 %v12360_v26  ;;  %v8250_v26 = vmul.f32 %v12623_v61, %v8248_v28 }
 0x641   : > { %9080 = vmatmul.f32.vlgmr.msra.gmra.mxu0 %v8759_v10  ;;  %9173 = vmatpush.msra.mxu3 %v12566_v31 }
 0x642   : > { %9199 = vmatpush.msrb.mxu0 %v12567_v44  ;;  %9224 = vmatpush.msrb.mxu1 %v12568_v29  ;;  %v8387_v30 = vpop.f32.mrf.mxu0  ;;  %v8279_v44 = vadd.f32 %v8278_v62, %v8250_v26 }
 0x643   : > { %9105 = vmatmul.f32.vlgmr.msra.gmra.mxu1 %v8759_v10  ;;  %9122 = vmatpush.msra.mxu2 %v10473_v36 }
 0x644   : > { %9202 = vmatpush.msrb.mxu0 %v12569_v60  ;;  %9226 = vmatpush.msrb.mxu1 %v12570_v49 }
 0x645   : > { %9282 = vmatpush.msrb.mxu3 %v10473_v36  ;;  %9124 = vmatpush.msra.mxu2 %v12568_v29  ;;  %v8470_v36 = vpop.f32.mrf.mxu3  ;;  %v8521_v21 = vpop.f32.mrf.mxu1 }
 0x646   : > { %9228 = vmatpush.msrb.mxu1 %v12571_v63  ;;  %v8548_v27 = vpop.f32.mrf.mxu2 }
 0x647   : > { %9020 = vmatmul.f32.vlgmr.msrb.gmra.mxu2 %v8760_v48  ;;  %9175 = vmatmul.f32.vlgmr.msra.gmra.mxu3 %v8759_v10 }
 0x648   : > { %9284 = vmatpush.msrb.mxu3 %v12568_v29  ;;  %9126 = vmatpush.msra.mxu2 %v12570_v49 }
 0x649   : > { %9205 = vmatmul.f32.vlgmr.msrb.gmra.mxu0 %v8760_v48 }
 0x64a   : > { %9286 = vmatpush.msrb.mxu3 %v12570_v49  ;;  %9128 = vmatpush.msra.mxu2 %v12571_v63  ;;  %v8496_v51 = vpop.f32.mrf.mxu0  ;;  %v8310_v49 = vadd.f32 %v8309_v13, %v8279_v44 }
 0x64b   : > { %9232 = vmatmul.f32.vlgmr.msrb.gmra.mxu1 %v8761_v56 }
 0x64c   : > { %9251 = vmatpush.msrb.mxu2 %v12574_v52  ;;  %9288 = vmatpush.msrb.mxu3 %v12571_v63  ;;  %v8336_v52 = vadd.f32 %v8335_v34, %v8310_v49 }
 0x64d   : > { %v8571_v18 = vpop.f32.mrf.mxu3  ;;  %v8631_v9 = vpop.f32.mrf.mxu1 }
 0x64e   : > { %9255 = vmatpush.msrb.mxu2 %v12576_v0  ;;  %v8657_v60 = vpop.f32.mrf.mxu2  ;;  %v8361_v3 = vadd.f32 %v8360_v17, %v8336_v52  ;;  %v8575_v17 = vmul.f32 %v11933_v45, %v8248_v28 }
 0x64f   : > { %9134 = vmatmul.f32.vlgmr.msra.gmra.mxu2 %v8763_v2  ;;  %9290 = vmatmul.f32.vlgmr.msrb.gmra.mxu3 %v8759_v10 }
 0x650   : > { %9259 = vmatpush.msrb.mxu2 %v12579_v53  ;;  %v12624_v53 = vld [vmem:[#allocation80_spill] sm:$0xff]  ;;  %v8388_v43 = vadd.f32 %v8387_v30, %v8361_v3 }
 0x651   : > { %v8414_v22 = vmul.f32 %v12624_v53, %v8248_v28 }
 0x652   : > { %9263 = vmatpush.msrb.mxu2 %v12622_v54  ;;  %v8600_v8 = vpop.f32.mrf.mxu0  ;;  %v8411_v41 = vadd.f32 %v8410_v35, %v8388_v43 }
 0x653   : > { %v8440_v15 = vadd.f32 %v8439_v1, %v8414_v22  ;;  %v8601_v34 = vadd.f32 %v8600_v8, %v8575_v17 }
 0x654   : > { %v8413_v50 = vadd.f32 %v11929_v57, %v8411_v41 }
 0x655   : > { %v11998_v31 = vpop.f32.mrf.mxu3  ;;  %v12002_v63 = vpop.f32.mrf.mxu1  ;;  %v8471_v46 = vadd.f32 %v8470_v36, %v8440_v15  ;;  %v8632_v61 = vadd.f32 %v8631_v9, %v8601_v34 }
 0x657   : > { %9265 = vmatmul.f32.vlgmr.msrb.gmra.mxu2 %v8759_v10  ;;  %v8497_v24 = vadd.f32 %v8496_v51, %v8471_v46  ;;  %v8658_v49 = vadd.f32 %v8657_v60, %v8632_v61 }
 0x659   : > { %v8522_v40 = vadd.f32 %v8521_v21, %v8497_v24  ;;  %v8683_v28 = vadd.f32 %v11998_v31, %v8658_v49 }
 0x65a   : > { %v12000_v29 = vpop.f32.mrf.mxu0 }
 0x65b   : > { %v8549_v23 = vadd.f32 %v8548_v27, %v8522_v40 }
 0x65d   : > { %v8572_v62 = vadd.f32 %v8571_v18, %v8549_v23 }
 0x65f   : > { %v8574_v57 = vadd.f32 %v11937_v38, %v8572_v62 }
 0x6ae   : > { %v8836_v58 = vpop.f32.mrf.mxu0 }
 0x6b0   : > { %v8863_v14 = vpop.f32.mrf.mxu1 }
 0x6b2   : > { %v8806_v0 = vpop.f32.mrf.mxu3 }
 0x6b6   : > { %v8950_v42 = vpop.f32.mrf.mxu0 }
 0x6b7   : > { %v8951_v4 = vadd.f32 %v11925_v39, %v8950_v42 }
 0x6b8   : > { %v8991_v25 = vpop.f32.mrf.mxu1 }
 0x6b9   : > { %v8992_v10 = vadd.f32 %v8991_v25, %v8951_v4 }
 0x6ba   : > { %v8765_v11 = vpop.f32.mrf.mxu2  ;;  %v8921_v6 = vpop.f32.mrf.mxu3 }
 0x6bb   : > { %v8766_v55 = vadd.f32 %v11921_v12, %v8765_v11 }
 0x6bd   : > { %v8807_v19 = vadd.f32 %v8806_v0, %v8766_v55 }
 0x6be   : > { %v9081_v54 = vpop.f32.mrf.mxu0 }
 0x6bf   : > { %v8837_v32 = vadd.f32 %v8836_v58, %v8807_v19 }
 0x6c0   : > { %v9106_v39 = vpop.f32.mrf.mxu1 }
 0x6c1   : > { %v8864_v5 = vadd.f32 %v8863_v14, %v8837_v32 }
 0x6c2   : > { %v8896_v59 = vpop.f32.mrf.mxu2  ;;  %v9048_v56 = vpop.f32.mrf.mxu3 }
 0x6c3   : > { %v8897_v16 = vadd.f32 %v8896_v59, %v8864_v5 }
 0x6c5   : > { %v8922_v37 = vadd.f32 %v8921_v6, %v8897_v16 }
 0x6c6   : > { %v9206_v52 = vpop.f32.mrf.mxu0 }
 0x6c7   : > { %v9294_v12 = vadd.f32 %v8922_v37, %v8413_v50 }
 0x6c8   : > { %v9233_v0 = vpop.f32.mrf.mxu1 }
 0x6c9   : > { %v9588_v48 = vmul.f32 -1.442695, %v9294_v12 }
 0x6ca   : > { %v9021_v47 = vpop.f32.mrf.mxu2  ;;  %v9176_v26 = vpop.f32.mrf.mxu3 }
 0x6cb   : > { %9757 = vpow2.f32 %v9588_v48  ;;  %v9022_v2 = vadd.f32 %v9021_v47, %v8992_v10 }
 0x6cd   : > { %v9049_v13 = vadd.f32 %v9048_v56, %v9022_v2 }
 0x6cf   : > { %v9082_v30 = vadd.f32 %v9081_v54, %v9049_v13 }
 0x6d1   : > { %v9758_v35 = vpop.eup %9757  ;;  %v9107_v36 = vadd.f32 %v9106_v39, %v9082_v30 }
 0x6d2   : > { %v9298_v51 = vadd.f32 1.0, %v9758_v35  ;;  %v9135_v1 = vpop.f32.mrf.mxu2  ;;  %v9291_v31 = vpop.f32.mrf.mxu3 }
 0x6d3   : > { %v9314_v21 = vadd.f32 %v9107_v36, %v8574_v57  ;;  %v9136_v27 = vadd.f32 %v11941_v33, %v9135_v1  ;;  %v8710_v33 = vadd.f32 %v12000_v29, %v8683_v28 }
 0x6d4   : > { %9759 = vrcp.f32 %v9298_v51  ;;  %v9310_v15 = vand.u32 2147483648, %v9298_v51  ;;  %v9308_v60 = vand.u32 2147483647, %v9298_v51  ;;  %vm9304_vm15 = vweird.f32 %v9298_v51 }
 0x6d5   : > { %v9589_v44 = vmul.f32 -1.442695, %v9314_v21  ;;  %v9177_v18 = vadd.f32 %v9176_v26, %v9136_v27  ;;  %v8733_v43 = vadd.f32 %v12002_v63, %v8710_v33 }
 0x6d6   : > { %v9311_v46 = vor.u32 1.1754944e-38, %v9310_v15  ;;  %vm9309_vm2 = vcmp.eq.f32.partialorder %v9308_v60, 8.507059e+37 }
 0x6d7   : > { %9761 = vpow2.f32 %v9589_v44  ;;  %v9207_v45 = vadd.f32 %v9206_v52, %v9177_v18  ;;  %v8735_v24 = vadd.f32 %v11949_v20, %v8733_v43 }
 0x6d9   : > { %v9234_v38 = vadd.f32 %v9233_v0, %v9207_v45 }
 0x6da   : > { %v9760_v8 = vpop.eup %9759  ;;  %v9266_v22 = vpop.f32.mrf.mxu2 }
 0x6db   : > { %v9300_v53 = vmul.f32 %v9760_v8, %v9298_v51  ;;  %v9267_v11 = vadd.f32 %v9266_v22, %v9234_v38  ;;  %vm9305_vm9 = vweird.f32 %v9760_v8 }
 0x6dc   : > { %vm9306_vm1 = vmor %vm9304_vm15, %vm9305_vm9 }
 0x6dd   : > { %v9762_v58 = vpop.eup %9761  ;;  %v9301_v3 = vsub.f32 1.0, %v9300_v53  ;;  %v9292_v19 = vadd.f32 %v9291_v31, %v9267_v11 }
 0x6de   : > { %v9318_v9 = vadd.f32 1.0, %v9762_v58 }
 0x6df   : > { %v9302_v55 = vmul.f32 %v9760_v8, %v9301_v3 }
 0x6e0   : > { %9763 = vrcp.f32 %v9318_v9  ;;  %v9330_v16 = vand.u32 2147483648, %v9318_v9  ;;  %v9328_v63 = vand.u32 2147483647, %v9318_v9  ;;  %vm9324_vm4 = vweird.f32 %v9318_v9 }
 0x6e1   : > { %v9303_v14 = vadd.f32 %v9760_v8, %v9302_v55 }
 0x6e2   : > { %v9331_v50 = vor.u32 1.1754944e-38, %v9330_v16  ;;  %vm9329_vm6 = vcmp.eq.f32.partialorder %v9328_v63, 8.507059e+37 }
 0x6e3   : > { %v9307_v32 = vsel %vm9306_vm1, %v9760_v8, %v9303_v14 }
 0x6e4   : > { %v9312_v29 = vsel %vm9309_vm2, %v9311_v46, %v9307_v32 }
 0x6e5   : > { %v9334_v6 = vmul.f32 %v9312_v29, %v9292_v19 }
 0x6e6   : > { %v9764_v41 = vpop.eup %9763 }
 0x6e7   : > { %v9320_v5 = vmul.f32 %v9764_v41, %v9318_v9  ;;  %v9335_v42 = vadd.f32 %v9334_v6, %v8735_v24  ;;  %vm9325_vm3 = vweird.f32 %v9764_v41 }
 0x6e8   : > { %vm9326_vm5 = vmor %vm9324_vm4, %vm9325_vm3 }
 0x6e9   : > { %v9321_v59 = vsub.f32 1.0, %v9320_v5  ;;  %9765 = vtanh.f32 %v9335_v42 }
 0x6eb   : > { %v9322_v40 = vmul.f32 %v9764_v41, %v9321_v59 }
 0x6ed   : > { %v9323_v4 = vadd.f32 %v9764_v41, %v9322_v40 }
 0x6ef   : > { %v9327_v37 = vsel %vm9326_vm5, %v9764_v41, %v9323_v4  ;;  %v9766_v12 = vpop.eup %9765 }
 0x6f0   : > { %v9332_v20 = vsel %vm9329_vm6, %v9331_v50, %v9327_v37 }
 0x6f1   : > { %v9337_v25 = vsub.f32 1.0, %v9332_v20  ;;  %v9339_v10 = vmul.f32 %v9332_v20, %v11953_v7 }
 0x6f3   : > { %v9338_v23 = vmul.f32 %v9766_v12, %v9337_v25 }
 0x6f5   : > { %v9340_v48 = vadd.f32 %v9339_v10, %v9338_v23 }
 0x6f7   : > { %9342 = vst.msk [vmem:[%s462_s23] sm:$0x3] %vm9341_vm0, %v9340_v48 }
 0x6f8   : > { %9941 = shalt.err (!%p9938_p7)
}
 0x6f9   : > { %9616 = dma.vmem_to_hbm [thread:$0]  (%p10082_p11), %s9357_s18, 32, %s9359_s9, %s9344_s28  }
 0x6fa PF: > { %s12628_s22 = sld [smem:[#allocation15_spill]]  ;;  %p9632_p8 = pnand %p9533_p9, %p10086_p12 }
 0x6fc   : > { %p9633_p10 = pneg %p9632_p8 }
 0x700   : > { %s9370_s2 = sand.u32 1, %s12628_s22  }
 0x701   : > { %s9371_s14 = scalar_lea.sflag [#allocation4], %s9370_s2 }
 0x702   : > { %9971 = dma.done.wait (%p9633_p10), %s9371_s14, 32  }
 0x703   : > { %9973 = vsyncadd (%p9633_p10), %s9371_s14, 4294967264  ;;  %s12630_s27 = sld [smem:[#allocation17_spill]]  ;;  %s12633_s24 = smov %s9980_s25 }
 0x704   : > { %s12631_s21 = sld [smem:[#allocation16_spill]] }
 0x705   : > { %s12632_s26 = sld [smem:[#allocation18_spill]] }
 0x709   : > { %p26_p1 = scmp.ge.s32.totalorder %s12630_s27, 4  }
 0x70a   : > { %s12634_s25 = smov %s12631_s21 }
 0x70b   :  { %28 = sbr.rel (!%p26_p1) target bundleno = 14 (0xe), region = 163 }
 0x710   :  { %9377 = vsyncpa [#allocation3], 1 }
 0x711   :  { %9379 = vsyncpa [#allocation3 + $0x1], 1 }
 0x712   :  { %9380 = vsyncpa [#allocation6], 1 }
 0x713   :  { %9382 = vsyncpa [#allocation6 + $0x1], 1 }
 0x714   :  { %9383 = vsyncpa [#allocation9], 1 }
 0x715   :  { %9385 = vsyncpa [#allocation9 + $0x1], 1 }
 0x716   :  { %9386 = vsyncpa [#allocation4], 1 }
 0x717   :  { %9388 = vsyncpa [#allocation4 + $0x1], 1 }

</bundles_post_ra>
